<compile_context>
chip_gen: v6e
topology: v6e:2x2x1
jax: 0.10.0
libtpu: 0.0.40
codegen_flags: <defaults>
</compile_context>

<pallas_src>
import math
from functools import partial

import numpy as np
import jax
import jax.numpy as jnp
from jax import lax
from jax.experimental import pallas as pl
from jax.experimental.pallas import tpu as pltpu


# ----------------------------------------------------------------------------
# Pallas kernels
# ----------------------------------------------------------------------------

def _gemm_bias_lrelu_kernel(w_ref, x_ref, b_ref, o_ref, *, slope):
    """o[Co, TM] = leaky_relu(W[Co, K] @ X[K, TM] + b[Co, 1]).  Lane-dense out."""
    acc = jnp.dot(w_ref[...], x_ref[...], preferred_element_type=jnp.float32)
    acc = acc + b_ref[...]                       # [Co,1] broadcasts over lanes
    o_ref[...] = jnp.maximum(acc, slope * acc)   # fp32 epilogue (v5e safe)


def conv_gemm_lrelu(w_row, colsT, b_col, *, slope=0.1):
    """Spectral-normed conv as GEMM.  w_row:[Co,K] colsT:[K,M] b:[Co,1] -> [Co,M]."""
    Co, K = w_row.shape
    M = colsT.shape[1]
    # Big row tiles; keep >=2 parallel grid steps on the large layers (v7x).
    if M >= 1024 and (M // 2) % 128 == 0:
        tm = M // 2
    else:
        tm = M
    grid = (M // tm,)
    return pl.pallas_call(
        partial(_gemm_bias_lrelu_kernel, slope=slope),
        out_shape=jax.ShapeDtypeStruct((Co, M), jnp.float32),
        grid=grid,
        in_specs=[
            pl.BlockSpec((Co, K), lambda i: (0, 0)),   # weight, resident
            pl.BlockSpec((K, tm), lambda i: (0, i)),   # patch columns
            pl.BlockSpec((Co, 1), lambda i: (0, 0)),   # bias, resident
        ],
        out_specs=pl.BlockSpec((Co, tm), lambda i: (0, i)),
        compiler_params=pltpu.CompilerParams(dimension_semantics=("parallel",)),
    )(w_row, colsT, b_col)


def _tail_kernel(cols4_ref, w4_ref, b4_ref,
                 wq_ref, wk_ref, wv_ref, bq_ref, bk_ref, bv_ref, gamma_ref,
                 mask_ref, w5_ref, b5_ref, sel_ref, rmat_ref, cmat_ref,
                 wl_ref, bl_ref, o_ref, *, slope):
    """Fused tail: l4 conv + attn1 + l5 conv + sum(1^3 spatial) + Linear + tanh."""
    # ---- l4: Conv3d(k4,s2,p1) as GEMM on wrapper-im2col'd patches -------------
    h4 = jnp.dot(cols4_ref[...], w4_ref[...], preferred_element_type=jnp.float32)
    h4 = h4 + b4_ref[...]
    x4 = jnp.maximum(h4, slope * h4)                       # [B*S4, C4] = [16, 32]

    # ---- attn1: SAGAN self-attention, all batches in one shot -----------------
    q = jnp.dot(x4, wq_ref[...], preferred_element_type=jnp.float32) + bq_ref[...]
    k = jnp.dot(x4, wk_ref[...], preferred_element_type=jnp.float32) + bk_ref[...]
    v = jnp.dot(x4, wv_ref[...], preferred_element_type=jnp.float32) + bv_ref[...]
    e = lax.dot_general(q, k, (((1,), (1,)), ((), ())),
                        preferred_element_type=jnp.float32)          # [B*S4, B*S4]
    e = e + mask_ref[...]                     # block-diag: keys stay within batch
    e = e - jnp.max(e, axis=-1, keepdims=True)
    p = jnp.exp(e)
    attn = p * pl.reciprocal(jnp.sum(p, axis=-1, keepdims=True), approx=True)
    ctx = jnp.dot(attn, v, preferred_element_type=jnp.float32)        # [B*S4, C4]
    xa = gamma_ref[0, 0] * ctx + x4

    # ---- l5: Conv3d(k4,s2,p1), output spatial 1^3: only the central 2x2x2 taps
    #      touch data -> dense contraction via masked matmuls (no reshapes). ----
    t = jnp.dot(xa, w5_ref[...], preferred_element_type=jnp.float32)  # [B*S4, S4*C5]
    t = t * sel_ref[...]                      # keep row-p x tap-block-p terms only
    t = jnp.dot(rmat_ref[...], t, preferred_element_type=jnp.float32)   # [B, S4*C5]
    h5 = jnp.dot(t, cmat_ref[...], preferred_element_type=jnp.float32)  # [B, C5]
    h5 = h5 + b5_ref[...]
    y5 = jnp.maximum(h5, slope * h5)

    # ---- sum over (1x1x1) spatial == identity; last Linear + tanh -------------
    z = jnp.dot(y5, wl_ref[...], preferred_element_type=jnp.float32) + bl_ref[...]
    o_ref[...] = jnp.tanh(z)


# ----------------------------------------------------------------------------
# Plain-JAX glue (spectral norm, im2col, parameter plumbing)
# ----------------------------------------------------------------------------

def _spectral_normalize(w, n_iter=5, eps=1e-12):
    """Spectral norm (power iteration) on the (Cout, -1) reshape of w."""
    cout = w.shape[0]
    wm = w.reshape(cout, -1)
    v = jnp.ones((wm.shape[1],), jnp.float32) / math.sqrt(wm.shape[1])
    u = wm @ v
    for _ in range(n_iter):
        u = wm @ v
        u = u / (jnp.linalg.norm(u) + eps)
        v = wm.T @ u
        v = v / (jnp.linalg.norm(v) + eps)
    sigma = u @ (wm @ v)
    return w / sigma


def _im2col_T(x_cf, k=4, s=2, p=1):
    """x_cf: [B, C, D, H, W] -> colsT [C*k^3, B*od*oh*ow].

    K ordering is (ci, kd, kh, kw) so that w.reshape(Cout, Cin*k^3) matches.
    """
    B, C, D, H, W = x_cf.shape
    od = (D + 2 * p - k) // s + 1
    oh = (H + 2 * p - k) // s + 1
    ow = (W + 2 * p - k) // s + 1
    xp = jnp.pad(x_cf, ((0, 0), (0, 0), (p, p), (p, p), (p, p)))
    taps = []
    for kd in range(k):
        for kh in range(k):
            for kw in range(k):
                taps.append(
                    xp[:, :, kd:kd + s * od:s, kh:kh + s * oh:s, kw:kw + s * ow:s])
    cols = jnp.stack(taps, axis=2)                    # [B, C, k^3, od, oh, ow]
    cols = jnp.transpose(cols, (1, 2, 0, 3, 4, 5))    # [C, k^3, B, od, oh, ow]
    return cols.reshape(C * k ** 3, B * od * oh * ow), (od, oh, ow)


def fused_tail(cols4, w4_mat, b4, attn_p, w5_sn, b5, w_last, b_last, *, B,
               slope=0.1):
    """One pallas_call for l4 + attn1 + l5 + sum + last Linear + tanh."""
    M4, _ = cols4.shape
    C4 = w4_mat.shape[1]
    S4 = M4 // B
    Cq = attn_p["wq"].shape[0]
    C5 = w5_sn.shape[0]
    Z = w_last.shape[0]

    wq = attn_p["wq"].reshape(Cq, C4).T
    wk = attn_p["wk"].reshape(Cq, C4).T
    wv = attn_p["wv"].reshape(C4, C4).T
    bq = attn_p["bq"].reshape(1, Cq)
    bk = attn_p["bk"].reshape(1, Cq)
    bv = attn_p["bv"].reshape(1, C4)
    gamma = attn_p["gamma"]

    # Block-diagonal attention mask: a query only attends within its own batch.
    bid = np.arange(M4) // S4
    mask = np.where(bid[:, None] == bid[None, :], 0.0, -1e30).astype(np.float32)

    # l5 central-tap weight: W5arr[p=(d,h,w), ci, co] = w5[co, ci, d+1, h+1, w+1]
    w5c = w5_sn[:, :, 1:3, 1:3, 1:3]                                  # [C5,C4,2,2,2]
    w5arr = jnp.transpose(w5c, (2, 3, 4, 1, 0)).reshape(S4, C4, C5)
    w5cat = jnp.transpose(w5arr, (1, 0, 2)).reshape(C4, S4 * C5)      # [ci, p*C5+co]

    # Static 0/1 helpers for the block-diagonal (per-batch flatten) contraction.
    sel = np.zeros((M4, S4 * C5), np.float32)
    for b in range(B):
        for s in range(S4):
            sel[b * S4 + s, s * C5:(s + 1) * C5] = 1.0
    rmat = (np.arange(B)[:, None] == bid[None, :]).astype(np.float32)  # [B, M4]
    cmat = np.tile(np.eye(C5, dtype=np.float32), (S4, 1))              # [S4*C5, C5]

    return pl.pallas_call(
        partial(_tail_kernel, slope=slope),
        out_shape=jax.ShapeDtypeStruct((B, Z), jnp.float32),
    )(cols4, w4_mat, b4.reshape(1, C4),
      wq, wk, wv, bq, bk, bv, gamma,
      jnp.asarray(mask), w5cat, b5.reshape(1, C5),
      jnp.asarray(sel), jnp.asarray(rmat), jnp.asarray(cmat),
      w_last.T, b_last.reshape(1, Z))


def encoder_forward(x, params):
    """x: [B, 1, D, H, W] (NCDHW).  Returns tanh(Linear(sum_spatial(l5 features)))."""
    B = x.shape[0]
    act = x
    # l1..l3: SN Conv3d(k4,s2,p1) + LeakyReLU(0.1) as lane-dense GEMMs (bf16 MXU).
    for w, b in params["convs"][:3]:
        w_sn = _spectral_normalize(w)
        cout = w_sn.shape[0]
        colsT, (od, oh, ow) = _im2col_T(act)
        w_row = w_sn.reshape(cout, -1)
        y = conv_gemm_lrelu(w_row.astype(jnp.bfloat16),
                            colsT.astype(jnp.bfloat16),
                            b.reshape(cout, 1))
        act = y.reshape(cout, B, od, oh, ow).transpose(1, 0, 2, 3, 4)

    # Fused tail: l4 + attn1 + l5 + sum-over-spatial + last Linear + tanh.
    w4, b4 = params["convs"][3]
    w5, b5 = params["convs"][4]
    w4_sn = _spectral_normalize(w4)
    w5_sn = _spectral_normalize(w5)
    cols4T, (od, oh, ow) = _im2col_T(act)
    assert (od, oh, ow) == (2, 2, 2), "fused tail expects a 32^3 input volume"
    cols4 = cols4T.T                                          # [B*8, 64*C3]
    w4_mat = w4_sn.reshape(w4_sn.shape[0], -1).T              # [64*C3, C4]
    return fused_tail(cols4, w4_mat, b4, params["attn"], w5_sn, b5,
                      params["last_w"], params["last_b"], B=B)


# ----------------------------------------------------------------------------
# Deterministic synthetic parameters (PyTorch layouts)
# ----------------------------------------------------------------------------

def init_params(key, conv_dim=4, z_size=8):
    dims = [(1, conv_dim),
            (conv_dim, 2 * conv_dim),
            (2 * conv_dim, 4 * conv_dim),
            (4 * conv_dim, 8 * conv_dim),
            (8 * conv_dim, 16 * conv_dim)]
    keys = iter(jax.random.split(key, 32))
    convs = []
    for cin, cout in dims:
        std = 1.0 / math.sqrt(cin * 4 * 4 * 4)
        w = std * jax.random.normal(next(keys), (cout, cin, 4, 4, 4), jnp.float32)
        b = std * jax.random.normal(next(keys), (cout,), jnp.float32)
        convs.append((w, b))

    C = 8 * conv_dim
    Cq = C // 8
    std = 1.0 / math.sqrt(C)
    attn = dict(
        wq=std * jax.random.normal(next(keys), (Cq, C, 1, 1, 1), jnp.float32),
        bq=std * jax.random.normal(next(keys), (Cq,), jnp.float32),
        wk=std * jax.random.normal(next(keys), (Cq, C, 1, 1, 1), jnp.float32),
        bk=std * jax.random.normal(next(keys), (Cq,), jnp.float32),
        wv=std * jax.random.normal(next(keys), (C, C, 1, 1, 1), jnp.float32),
        bv=std * jax.random.normal(next(keys), (C,), jnp.float32),
        gamma=jnp.zeros((1, 1), jnp.float32),
    )

    Cl = 16 * conv_dim
    std = 1.0 / math.sqrt(Cl)
    return dict(
        convs=convs,
        attn=attn,
        last_w=std * jax.random.normal(next(keys), (z_size, Cl), jnp.float32),
        last_b=std * jax.random.normal(next(keys), (z_size,), jnp.float32),
    )


# ----------------------------------------------------------------------------

if __name__ == "__main__":
    conv_dim = 4      # params.filterD
    z_size = 8        # params.z_size
    B, D, H, W = 2, 32, 32, 32   # 5 stride-2 convs need spatial >= 32

    key = jax.random.PRNGKey(0)
    kx, kp = jax.random.split(key)
    params = init_params(kp, conv_dim=conv_dim, z_size=z_size)

    # Native PyTorch NCDHW input layout (channel-first), used directly.
    x = jax.random.normal(kx, (B, 1, D, H, W), jnp.float32)

    fwd = jax.jit(encoder_forward)
    out = jax.block_until_ready(fwd(x, params))

    assert out.shape == (B, z_size), out.shape
    assert bool(jnp.all(jnp.isfinite(out)))
    print("KERNEL_OK")
</pallas_src>

<mosaic_0001>
module attributes {stable_mosaic.version = 11 : i64} {
  func.func @_gemm_bias_lrelu_kernel(%arg0: i32, %arg1: memref<4x64xbf16, #tpu.memory_space<vmem>>, %arg2: memref<64x4096xbf16, #tpu.memory_space<vmem>>, %arg3: memref<4x1xf32, #tpu.memory_space<vmem>>, %arg4: memref<4x4096xf32, #tpu.memory_space<vmem>>) attributes {dimension_semantics = [#tpu.dimension_semantics<parallel>], iteration_bounds = array<i64: 2>, scalar_prefetch = 0 : i64, scratch_operands = 0 : i64, tpu.core_type = #tpu.core_type<tc>, window_params = [{pipeline_mode = #tpu.pipeline_mode<synchronous>, transform_indices = @transform_0, window_bounds = array<i64: 4, 64>}, {transform_indices = @transform_1, window_bounds = array<i64: 64, 4096>}, {pipeline_mode = #tpu.pipeline_mode<synchronous>, transform_indices = @transform_2, window_bounds = array<i64: 4, 1>}, {transform_indices = @transform_3, window_bounds = array<i64: 4, 4096>}]} {
    %c0 = arith.constant 0 : index
    %c0_0 = arith.constant 0 : index
    %0 = vector.load %arg1[%c0, %c0_0] : memref<4x64xbf16, #tpu.memory_space<vmem>>, vector<4x64xbf16>
    %c0_1 = arith.constant 0 : index
    %c0_2 = arith.constant 0 : index
    %1 = vector.load %arg2[%c0_1, %c0_2] : memref<64x4096xbf16, #tpu.memory_space<vmem>>, vector<64x4096xbf16>
    %cst = arith.constant dense<0.000000e+00> : vector<4x4096xf32>
    %2 = tpu.matmul %0, %1, %cst {dimension_numbers = #tpu.dot_dimension_numbers<[1], [0], [0], [1], [0, 0, 1, 1], [], []>} : vector<4x64xbf16>, vector<64x4096xbf16>, vector<4x4096xf32> -> vector<4x4096xf32>
    %c0_3 = arith.constant 0 : index
    %c0_4 = arith.constant 0 : index
    %3 = vector.load %arg3[%c0_3, %c0_4] : memref<4x1xf32, #tpu.memory_space<vmem>>, vector<4x1xf32>
    %4 = vector.broadcast %3 : vector<4x1xf32> to vector<4x4096xf32>
    %5 = arith.addf %2, %4 : vector<4x4096xf32>
    %cst_5 = arith.constant 1.000000e-01 : f32
    %6 = vector.broadcast %cst_5 : f32 to vector<4x4096xf32>
    %7 = arith.mulf %6, %5 : vector<4x4096xf32>
    %8 = arith.maximumf %5, %7 : vector<4x4096xf32>
    %c0_6 = arith.constant 0 : index
    %c0_7 = arith.constant 0 : index
    %9 = vector.load %arg4[%c0_6, %c0_7] : memref<4x4096xf32, #tpu.memory_space<vmem>>, vector<4x4096xf32>
    tpu.vector_store %arg4[%c0_6, %c0_7], %8 {strides = array<i32>} : memref<4x4096xf32, #tpu.memory_space<vmem>>, vector<4x4096xf32>,
    return
  }
  func.func @transform_0(%arg0: i32) -> (i32, i32) {
    %c0_i32 = arith.constant 0 : i32
    %c0_i32_0 = arith.constant 0 : i32
    %c0_i32_1 = arith.constant 0 : i32
    return %c0_i32, %c0_i32_0 : i32, i32
  }
  func.func @transform_1(%arg0: i32) -> (i32, i32) {
    %c0_i32 = arith.constant 0 : i32
    %c0_i32_0 = arith.constant 0 : i32
    return %c0_i32, %arg0 : i32, i32
  }
  func.func @transform_2(%arg0: i32) -> (i32, i32) {
    %c0_i32 = arith.constant 0 : i32
    %c0_i32_0 = arith.constant 0 : i32
    %c0_i32_1 = arith.constant 0 : i32
    return %c0_i32, %c0_i32_0 : i32, i32
  }
  func.func @transform_3(%arg0: i32) -> (i32, i32) {
    %c0_i32 = arith.constant 0 : i32
    %c0_i32_0 = arith.constant 0 : i32
    return %c0_i32, %arg0 : i32, i32
  }
}

module attributes {stable_mosaic.version = 11 : i64} {
  func.func @_gemm_bias_lrelu_kernel(%arg0: i32, %arg1: memref<8x256xbf16, #tpu.memory_space<vmem>>, %arg2: memref<256x512xbf16, #tpu.memory_space<vmem>>, %arg3: memref<8x1xf32, #tpu.memory_space<vmem>>, %arg4: memref<8x512xf32, #tpu.memory_space<vmem>>) attributes {dimension_semantics = [#tpu.dimension_semantics<parallel>], iteration_bounds = array<i64: 2>, scalar_prefetch = 0 : i64, scratch_operands = 0 : i64, tpu.core_type = #tpu.core_type<tc>, window_params = [{pipeline_mode = #tpu.pipeline_mode<synchronous>, transform_indices = @transform_0, window_bounds = array<i64: 8, 256>}, {transform_indices = @transform_1, window_bounds = array<i64: 256, 512>}, {pipeline_mode = #tpu.pipeline_mode<synchronous>, transform_indices = @transform_2, window_bounds = array<i64: 8, 1>}, {transform_indices = @transform_3, window_bounds = array<i64: 8, 512>}]} {
    %c0 = arith.constant 0 : index
    %c0_0 = arith.constant 0 : index
    %0 = vector.load %arg1[%c0, %c0_0] : memref<8x256xbf16, #tpu.memory_space<vmem>>, vector<8x256xbf16>
    %c0_1 = arith.constant 0 : index
    %c0_2 = arith.constant 0 : index
    %1 = vector.load %arg2[%c0_1, %c0_2] : memref<256x512xbf16, #tpu.memory_space<vmem>>, vector<256x512xbf16>
    %cst = arith.constant dense<0.000000e+00> : vector<8x512xf32>
    %2 = tpu.matmul %0, %1, %cst {dimension_numbers = #tpu.dot_dimension_numbers<[1], [0], [0], [1], [0, 0, 1, 1], [], []>} : vector<8x256xbf16>, vector<256x512xbf16>, vector<8x512xf32> -> vector<8x512xf32>
    %c0_3 = arith.constant 0 : index
    %c0_4 = arith.constant 0 : index
    %3 = vector.load %arg3[%c0_3, %c0_4] : memref<8x1xf32, #tpu.memory_space<vmem>>, vector<8x1xf32>
    %4 = vector.broadcast %3 : vector<8x1xf32> to vector<8x512xf32>
    %5 = arith.addf %2, %4 : vector<8x512xf32>
    %cst_5 = arith.constant 1.000000e-01 : f32
    %6 = vector.broadcast %cst_5 : f32 to vector<8x512xf32>
    %7 = arith.mulf %6, %5 : vector<8x512xf32>
    %8 = arith.maximumf %5, %7 : vector<8x512xf32>
    %c0_6 = arith.constant 0 : index
    %c0_7 = arith.constant 0 : index
    %9 = vector.load %arg4[%c0_6, %c0_7] : memref<8x512xf32, #tpu.memory_space<vmem>>, vector<8x512xf32>
    tpu.vector_store %arg4[%c0_6, %c0_7], %8 {strides = array<i32>} : memref<8x512xf32, #tpu.memory_space<vmem>>, vector<8x512xf32>,
    return
  }
  func.func @transform_0(%arg0: i32) -> (i32, i32) {
    %c0_i32 = arith.constant 0 : i32
    %c0_i32_0 = arith.constant 0 : i32
    %c0_i32_1 = arith.constant 0 : i32
    return %c0_i32, %c0_i32_0 : i32, i32
  }
  func.func @transform_1(%arg0: i32) -> (i32, i32) {
    %c0_i32 = arith.constant 0 : i32
    %c0_i32_0 = arith.constant 0 : i32
    return %c0_i32, %arg0 : i32, i32
  }
  func.func @transform_2(%arg0: i32) -> (i32, i32) {
    %c0_i32 = arith.constant 0 : i32
    %c0_i32_0 = arith.constant 0 : i32
    %c0_i32_1 = arith.constant 0 : i32
    return %c0_i32, %c0_i32_0 : i32, i32
  }
  func.func @transform_3(%arg0: i32) -> (i32, i32) {
    %c0_i32 = arith.constant 0 : i32
    %c0_i32_0 = arith.constant 0 : i32
    return %c0_i32, %arg0 : i32, i32
  }
}

module attributes {stable_mosaic.version = 11 : i64} {
  func.func @_gemm_bias_lrelu_kernel(%arg0: i32, %arg1: memref<16x512xbf16, #tpu.memory_space<vmem>>, %arg2: memref<512x128xbf16, #tpu.memory_space<vmem>>, %arg3: memref<16x1xf32, #tpu.memory_space<vmem>>, %arg4: memref<16x128xf32, #tpu.memory_space<vmem>>) attributes {dimension_semantics = [#tpu.dimension_semantics<parallel>], iteration_bounds = array<i64: 1>, scalar_prefetch = 0 : i64, scratch_operands = 0 : i64, tpu.core_type = #tpu.core_type<tc>, window_params = [{pipeline_mode = #tpu.pipeline_mode<synchronous>, transform_indices = @transform_0, window_bounds = array<i64: 16, 512>}, {transform_indices = @transform_1, window_bounds = array<i64: 512, 128>}, {pipeline_mode = #tpu.pipeline_mode<synchronous>, transform_indices = @transform_2, window_bounds = array<i64: 16, 1>}, {transform_indices = @transform_3, window_bounds = array<i64: 16, 128>}]} {
    %c0 = arith.constant 0 : index
    %c0_0 = arith.constant 0 : index
    %0 = vector.load %arg1[%c0, %c0_0] : memref<16x512xbf16, #tpu.memory_space<vmem>>, vector<16x512xbf16>
    %c0_1 = arith.constant 0 : index
    %c0_2 = arith.constant 0 : index
    %1 = vector.load %arg2[%c0_1, %c0_2] : memref<512x128xbf16, #tpu.memory_space<vmem>>, vector<512x128xbf16>
    %cst = arith.constant dense<0.000000e+00> : vector<16x128xf32>
    %2 = tpu.matmul %0, %1, %cst {dimension_numbers = #tpu.dot_dimension_numbers<[1], [0], [0], [1], [0, 0, 1, 1], [], []>} : vector<16x512xbf16>, vector<512x128xbf16>, vector<16x128xf32> -> vector<16x128xf32>
    %c0_3 = arith.constant 0 : index
    %c0_4 = arith.constant 0 : index
    %3 = vector.load %arg3[%c0_3, %c0_4] : memref<16x1xf32, #tpu.memory_space<vmem>>, vector<16x1xf32>
    %4 = vector.broadcast %3 : vector<16x1xf32> to vector<16x128xf32>
    %5 = arith.addf %2, %4 : vector<16x128xf32>
    %cst_5 = arith.constant 1.000000e-01 : f32
    %6 = vector.broadcast %cst_5 : f32 to vector<16x128xf32>
    %7 = arith.mulf %6, %5 : vector<16x128xf32>
    %8 = arith.maximumf %5, %7 : vector<16x128xf32>
    %c0_6 = arith.constant 0 : index
    %c0_7 = arith.constant 0 : index
    %9 = vector.load %arg4[%c0_6, %c0_7] : memref<16x128xf32, #tpu.memory_space<vmem>>, vector<16x128xf32>
    tpu.vector_store %arg4[%c0_6, %c0_7], %8 {strides = array<i32>} : memref<16x128xf32, #tpu.memory_space<vmem>>, vector<16x128xf32>,
    return
  }
  func.func @transform_0(%arg0: i32) -> (i32, i32) {
    %c0_i32 = arith.constant 0 : i32
    %c0_i32_0 = arith.constant 0 : i32
    %c0_i32_1 = arith.constant 0 : i32
    return %c0_i32, %c0_i32_0 : i32, i32
  }
  func.func @transform_1(%arg0: i32) -> (i32, i32) {
    %c0_i32 = arith.constant 0 : i32
    %c0_i32_0 = arith.constant 0 : i32
    return %c0_i32, %arg0 : i32, i32
  }
  func.func @transform_2(%arg0: i32) -> (i32, i32) {
    %c0_i32 = arith.constant 0 : i32
    %c0_i32_0 = arith.constant 0 : i32
    %c0_i32_1 = arith.constant 0 : i32
    return %c0_i32, %c0_i32_0 : i32, i32
  }
  func.func @transform_3(%arg0: i32) -> (i32, i32) {
    %c0_i32 = arith.constant 0 : i32
    %c0_i32_0 = arith.constant 0 : i32
    return %c0_i32, %arg0 : i32, i32
  }
}

module attributes {stable_mosaic.version = 11 : i64} {
  func.func @_tail_kernel(%arg0: memref<16x1024xf32, #tpu.memory_space<vmem>>, %arg1: memref<1024x32xf32, #tpu.memory_space<vmem>>, %arg2: memref<1x32xf32, #tpu.memory_space<vmem>>, %arg3: memref<32x4xf32, #tpu.memory_space<vmem>>, %arg4: memref<32x4xf32, #tpu.memory_space<vmem>>, %arg5: memref<32x32xf32, #tpu.memory_space<vmem>>, %arg6: memref<1x4xf32, #tpu.memory_space<vmem>>, %arg7: memref<1x4xf32, #tpu.memory_space<vmem>>, %arg8: memref<1x32xf32, #tpu.memory_space<vmem>>, %arg9: memref<1x1xf32, #tpu.memory_space<vmem>>, %arg10: memref<16x16xf32, #tpu.memory_space<vmem>>, %arg11: memref<32x512xf32, #tpu.memory_space<vmem>>, %arg12: memref<1x64xf32, #tpu.memory_space<vmem>>, %arg13: memref<16x512xf32, #tpu.memory_space<vmem>>, %arg14: memref<2x16xf32, #tpu.memory_space<vmem>>, %arg15: memref<512x64xf32, #tpu.memory_space<vmem>>, %arg16: memref<64x8xf32, #tpu.memory_space<vmem>>, %arg17: memref<1x8xf32, #tpu.memory_space<vmem>>, %arg18: memref<2x8xf32, #tpu.memory_space<vmem>>) attributes {dimension_semantics = [], scalar_prefetch = 0 : i64, scratch_operands = 0 : i64, tpu.core_type = #tpu.core_type<tc>} {
    %c0 = arith.constant 0 : index
    %c0_0 = arith.constant 0 : index
    %0 = vector.load %arg0[%c0, %c0_0] : memref<16x1024xf32, #tpu.memory_space<vmem>>, vector<16x1024xf32>
    %c0_1 = arith.constant 0 : index
    %c0_2 = arith.constant 0 : index
    %1 = vector.load %arg1[%c0_1, %c0_2] : memref<1024x32xf32, #tpu.memory_space<vmem>>, vector<1024x32xf32>
    %cst = arith.constant dense<0.000000e+00> : vector<16x32xf32>
    %2 = tpu.matmul %0, %1, %cst {dimension_numbers = #tpu.dot_dimension_numbers<[1], [0], [0], [1], [0, 0, 1, 1], [], []>} : vector<16x1024xf32>, vector<1024x32xf32>, vector<16x32xf32> -> vector<16x32xf32>
    %c0_3 = arith.constant 0 : index
    %c0_4 = arith.constant 0 : index
    %3 = vector.load %arg2[%c0_3, %c0_4] : memref<1x32xf32, #tpu.memory_space<vmem>>, vector<1x32xf32>
    %4 = vector.broadcast %3 : vector<1x32xf32> to vector<16x32xf32>
    %5 = arith.addf %2, %4 : vector<16x32xf32>
    %cst_5 = arith.constant 1.000000e-01 : f32
    %6 = vector.broadcast %cst_5 : f32 to vector<16x32xf32>
    %7 = arith.mulf %6, %5 : vector<16x32xf32>
    %8 = arith.maximumf %5, %7 : vector<16x32xf32>
    %c0_6 = arith.constant 0 : index
    %c0_7 = arith.constant 0 : index
    %9 = vector.load %arg3[%c0_6, %c0_7] : memref<32x4xf32, #tpu.memory_space<vmem>>, vector<32x4xf32>
    %cst_8 = arith.constant dense<0.000000e+00> : vector<16x4xf32>
    %10 = tpu.matmul %8, %9, %cst_8 {dimension_numbers = #tpu.dot_dimension_numbers<[1], [0], [0], [1], [0, 0, 1, 1], [], []>} : vector<16x32xf32>, vector<32x4xf32>, vector<16x4xf32> -> vector<16x4xf32>
    %c0_9 = arith.constant 0 : index
    %c0_10 = arith.constant 0 : index
    %11 = vector.load %arg6[%c0_9, %c0_10] : memref<1x4xf32, #tpu.memory_space<vmem>>, vector<1x4xf32>
    %12 = vector.broadcast %11 : vector<1x4xf32> to vector<16x4xf32>
    %13 = arith.addf %10, %12 : vector<16x4xf32>
    %c0_11 = arith.constant 0 : index
    %c0_12 = arith.constant 0 : index
    %14 = vector.load %arg4[%c0_11, %c0_12] : memref<32x4xf32, #tpu.memory_space<vmem>>, vector<32x4xf32>
    %cst_13 = arith.constant dense<0.000000e+00> : vector<16x4xf32>
    %15 = tpu.matmul %8, %14, %cst_13 {dimension_numbers = #tpu.dot_dimension_numbers<[1], [0], [0], [1], [0, 0, 1, 1], [], []>} : vector<16x32xf32>, vector<32x4xf32>, vector<16x4xf32> -> vector<16x4xf32>
    %c0_14 = arith.constant 0 : index
    %c0_15 = arith.constant 0 : index
    %16 = vector.load %arg7[%c0_14, %c0_15] : memref<1x4xf32, #tpu.memory_space<vmem>>, vector<1x4xf32>
    %17 = vector.broadcast %16 : vector<1x4xf32> to vector<16x4xf32>
    %18 = arith.addf %15, %17 : vector<16x4xf32>
    %c0_16 = arith.constant 0 : index
    %c0_17 = arith.constant 0 : index
    %19 = vector.load %arg5[%c0_16, %c0_17] : memref<32x32xf32, #tpu.memory_space<vmem>>, vector<32x32xf32>
    %cst_18 = arith.constant dense<0.000000e+00> : vector<16x32xf32>
    %20 = tpu.matmul %8, %19, %cst_18 {dimension_numbers = #tpu.dot_dimension_numbers<[1], [0], [0], [1], [0, 0, 1, 1], [], []>} : vector<16x32xf32>, vector<32x32xf32>, vector<16x32xf32> -> vector<16x32xf32>
    %c0_19 = arith.constant 0 : index
    %c0_20 = arith.constant 0 : index
    %21 = vector.load %arg8[%c0_19, %c0_20] : memref<1x32xf32, #tpu.memory_space<vmem>>, vector<1x32xf32>
    %22 = vector.broadcast %21 : vector<1x32xf32> to vector<16x32xf32>
    %23 = arith.addf %20, %22 : vector<16x32xf32>
    %cst_21 = arith.constant dense<0.000000e+00> : vector<16x16xf32>
    %24 = tpu.matmul %13, %18, %cst_21 {dimension_numbers = #tpu.dot_dimension_numbers<[1], [1], [0], [0], [0, 0, 1, 0], [], []>} : vector<16x4xf32>, vector<16x4xf32>, vector<16x16xf32> -> vector<16x16xf32>
    %c0_22 = arith.constant 0 : index
    %c0_23 = arith.constant 0 : index
    %25 = vector.load %arg10[%c0_22, %c0_23] : memref<16x16xf32, #tpu.memory_space<vmem>>, vector<16x16xf32>
    %26 = arith.addf %24, %25 : vector<16x16xf32>
    %cst_24 = arith.constant dense<0xFF800000> : vector<16xf32>
    %27 = vector.multi_reduction <maximumf>, %26, %cst_24 [1] : vector<16x16xf32> to vector<16xf32>
    %28 = vector.shape_cast %27 : vector<16xf32> to vector<16x1xf32>
    %29 = vector.broadcast %28 : vector<16x1xf32> to vector<16x16xf32>
    %30 = arith.subf %26, %29 : vector<16x16xf32>
    %31 = math.exp %30 : vector<16x16xf32>
    %cst_25 = arith.constant dense<0.000000e+00> : vector<16xf32>
    %32 = vector.multi_reduction <add>, %31, %cst_25 [1] : vector<16x16xf32> to vector<16xf32>
    %33 = vector.shape_cast %32 : vector<16xf32> to vector<16x1xf32>
    %34 = tpu.reciprocal %33 {approx = true} : vector<16x1xf32> -> vector<16x1xf32>
    %35 = vector.broadcast %34 : vector<16x1xf32> to vector<16x16xf32>
    %36 = arith.mulf %31, %35 : vector<16x16xf32>
    %cst_26 = arith.constant dense<0.000000e+00> : vector<16x32xf32>
    %37 = tpu.matmul %36, %23, %cst_26 {dimension_numbers = #tpu.dot_dimension_numbers<[1], [0], [0], [1], [0, 0, 1, 1], [], []>} : vector<16x16xf32>, vector<16x32xf32>, vector<16x32xf32> -> vector<16x32xf32>
    %c0_27 = arith.constant 0 : index
    %c0_28 = arith.constant 0 : index
    %38 = vector.load %arg9[%c0_27, %c0_28] : memref<1x1xf32, #tpu.memory_space<vmem>>, vector<1x1xf32>
    %39 = vector.extract %38[0, 0] : f32 from vector<1x1xf32>
    %40 = vector.broadcast %39 : f32 to vector<16x32xf32>
    %41 = arith.mulf %40, %37 : vector<16x32xf32>
    %42 = arith.addf %41, %8 : vector<16x32xf32>
    %c0_29 = arith.constant 0 : index
    %c0_30 = arith.constant 0 : index
    %43 = vector.load %arg11[%c0_29, %c0_30] : memref<32x512xf32, #tpu.memory_space<vmem>>, vector<32x512xf32>
    %cst_31 = arith.constant dense<0.000000e+00> : vector<16x512xf32>
    %44 = tpu.matmul %42, %43, %cst_31 {dimension_numbers = #tpu.dot_dimension_numbers<[1], [0], [0], [1], [0, 0, 1, 1], [], []>} : vector<16x32xf32>, vector<32x512xf32>, vector<16x512xf32> -> vector<16x512xf32>
    %c0_32 = arith.constant 0 : index
    %c0_33 = arith.constant 0 : index
    %45 = vector.load %arg13[%c0_32, %c0_33] : memref<16x512xf32, #tpu.memory_space<vmem>>, vector<16x512xf32>
    %46 = arith.mulf %44, %45 : vector<16x512xf32>
    %c0_34 = arith.constant 0 : index
    %c0_35 = arith.constant 0 : index
    %47 = vector.load %arg14[%c0_34, %c0_35] : memref<2x16xf32, #tpu.memory_space<vmem>>, vector<2x16xf32>
    %cst_36 = arith.constant dense<0.000000e+00> : vector<2x512xf32>
    %48 = tpu.matmul %47, %46, %cst_36 {dimension_numbers = #tpu.dot_dimension_numbers<[1], [0], [0], [1], [0, 0, 1, 1], [], []>} : vector<2x16xf32>, vector<16x512xf32>, vector<2x512xf32> -> vector<2x512xf32>
    %c0_37 = arith.constant 0 : index
    %c0_38 = arith.constant 0 : index
    %49 = vector.load %arg15[%c0_37, %c0_38] : memref<512x64xf32, #tpu.memory_space<vmem>>, vector<512x64xf32>
    %cst_39 = arith.constant dense<0.000000e+00> : vector<2x64xf32>
    %50 = tpu.matmul %48, %49, %cst_39 {dimension_numbers = #tpu.dot_dimension_numbers<[1], [0], [0], [1], [0, 0, 1, 1], [], []>} : vector<2x512xf32>, vector<512x64xf32>, vector<2x64xf32> -> vector<2x64xf32>
    %c0_40 = arith.constant 0 : index
    %c0_41 = arith.constant 0 : index
    %51 = vector.load %arg12[%c0_40, %c0_41] : memref<1x64xf32, #tpu.memory_space<vmem>>, vector<1x64xf32>
    %52 = vector.broadcast %51 : vector<1x64xf32> to vector<2x64xf32>
    %53 = arith.addf %50, %52 : vector<2x64xf32>
    %cst_42 = arith.constant 1.000000e-01 : f32
    %54 = vector.broadcast %cst_42 : f32 to vector<2x64xf32>
    %55 = arith.mulf %54, %53 : vector<2x64xf32>
    %56 = arith.maximumf %53, %55 : vector<2x64xf32>
    %c0_43 = arith.constant 0 : index
    %c0_44 = arith.constant 0 : index
    %57 = vector.load %arg16[%c0_43, %c0_44] : memref<64x8xf32, #tpu.memory_space<vmem>>, vector<64x8xf32>
    %cst_45 = arith.constant dense<0.000000e+00> : vector<2x8xf32>
    %58 = tpu.matmul %56, %57, %cst_45 {dimension_numbers = #tpu.dot_dimension_numbers<[1], [0], [0], [1], [0, 0, 1, 1], [], []>} : vector<2x64xf32>, vector<64x8xf32>, vector<2x8xf32> -> vector<2x8xf32>
    %c0_46 = arith.constant 0 : index
    %c0_47 = arith.constant 0 : index
    %59 = vector.load %arg17[%c0_46, %c0_47] : memref<1x8xf32, #tpu.memory_space<vmem>>, vector<1x8xf32>
    %60 = vector.broadcast %59 : vector<1x8xf32> to vector<2x8xf32>
    %61 = arith.addf %58, %60 : vector<2x8xf32>
    %62 = math.tanh %61 : vector<2x8xf32>
    %c0_48 = arith.constant 0 : index
    %c0_49 = arith.constant 0 : index
    %63 = vector.load %arg18[%c0_48, %c0_49] : memref<2x8xf32, #tpu.memory_space<vmem>>, vector<2x8xf32>
    tpu.vector_store %arg18[%c0_48, %c0_49], %62 {strides = array<i32>} : memref<2x8xf32, #tpu.memory_space<vmem>>, vector<2x8xf32>,
    return
  }
}

</mosaic_0001>

<bundles_post_ra>
// kernel: encoder_forward.4
= control target key start
LH: loop header
LB: loop body
LE: loop exit
PB: predicated region body
PF: predicated region fallthrough
CT: control target
= control target key end

     0   :  { %s2318_s12 = smov 0   ;;  %s2320_s13 = smov 0   ;;  %s2869_s0 = inlined_call_operand.vmem [shape: bf16[4,64], index: 0, kind: input, shape index: {}]   ;;  %s2870_s1 = inlined_call_operand.vmem [shape: bf16[64,8192], index: 1, kind: input, shape index: {}]   ;;  %s2871_s2 = inlined_call_operand.vmem [shape: f32[4,1], index: 2, kind: input, shape index: {}]   ;;  %s2872_s3 = inlined_call_operand.vmem [shape: f32[4,8192], index: 3, kind: output, shape index: {}]  }
   0x1   :  { %s2322_s14 = smov 0  }
   0x2 LB: > { %s2089_s15 = sadd.s32 4294967295, %s2295_s14   ;;  %s2335_s16 = sadd.s32 1, %s2295_s14   ;;  %s2295_s14 = sphi %s2322_s14, %s2875_s14   ;;  %s2291_s13 = sphi %s2320_s13, %s2874_s13   ;;  %s2287_s12 = sphi %s2318_s12, %s2873_s12  }
   0x3   : > { %s38_s17 = ssub.s32 %s2295_s14, %s2335_s16  ;;  %s41_s18 = sadd.s32 1, %s2291_s13 }
   0x4   : > { %p39_p0 = scmp.eq.s32.totalorder %s38_s17, 0  ;;  %p48_p1 = scmp.ne.s32.totalorder %s2291_s13, %s2287_s12 }
   0x5   : > { %p49_p2 = scmp.eq.s32.totalorder %s2295_s14, 0  ;;  %p2092_p4 = scmp.ge.s32.totalorder %s2295_s14, 2 }
   0x6   : > { %s2344_s19 = scalar_select %p39_p0, %s2291_s13, %s41_s18  }
   0x7   : > { %p50_p3 = por %p49_p2, %p48_p1  ;;  %127 = sbr.rel (%p2092_p4) target bundleno = 80 (0x50), region = 24 }
   0xc   : > { %130 = sbr.rel (!%p50_p3) target bundleno = 80 (0x50), region = 28  ;;  %s132_s20 = sand.u32 (%p50_p3), 1, %s2291_s13  }
   0xd   : > { %s2246_s21 = sshll.u32 (%p50_p3), %s2295_s14, 7  ;;  %s2093_s22 = sshll.u32 (%p50_p3), %s132_s20, 10 }
   0xe   : > { %s2352_s25 = scalar_lea.vmem (%p50_p3), %s2870_s1, %s2246_s21  ;;  %s2357_s26 = scalar_lea.vmem (%p50_p3), [#allocation2], %s2093_s22 }
   0xf   : > { %v150_v0 = vld [vmem:[%s2352_s25] sm:$0xff] (%p50_p3)  ;;  %v152_v1 = vld [vmem:[%s2352_s25 + $0x8] sm:$0xff] (%p50_p3)  ;;  %v154_v2 = vld [vmem:[%s2352_s25 + $0x10] sm:$0xff] (%p50_p3) }
  0x10   : > { %151 = vst [vmem:[%s2357_s26] sm:$0xff] (%p50_p3), %v150_v0  ;;  %153 = vst [vmem:[%s2357_s26 + $0x8] sm:$0xff] (%p50_p3), %v152_v1  ;;  %v156_v3 = vld [vmem:[%s2352_s25 + $0x18] sm:$0xff] (%p50_p3)  ;;  %v158_v4 = vld [vmem:[%s2352_s25 + $0x20] sm:$0xff] (%p50_p3) }
  0x11   : > { %155 = vst [vmem:[%s2357_s26 + $0x10] sm:$0xff] %v154_v2  ;;  %v160_v5 = vld [vmem:[%s2352_s25 + $0x28] sm:$0xff]  ;;  %157 = vst [vmem:[%s2357_s26 + $0x18] sm:$0xff] %v156_v3  ;;  %v162_v6 = vld [vmem:[%s2352_s25 + $0x30] sm:$0xff] }
  0x12   : > { %159 = vst [vmem:[%s2357_s26 + $0x20] sm:$0xff] %v158_v4  ;;  %161 = vst [vmem:[%s2357_s26 + $0x28] sm:$0xff] %v160_v5  ;;  %v164_v7 = vld [vmem:[%s2352_s25 + $0x38] sm:$0xff]  ;;  %v166_v8 = vld [vmem:[%s2352_s25 + $0x40] sm:$0xff] }
  0x13   : > { %163 = vst [vmem:[%s2357_s26 + $0x30] sm:$0xff] %v162_v6  ;;  %165 = vst [vmem:[%s2357_s26 + $0x38] sm:$0xff] %v164_v7  ;;  %v168_v9 = vld [vmem:[%s2352_s25 + $0x48] sm:$0xff]  ;;  %v170_v10 = vld [vmem:[%s2352_s25 + $0x50] sm:$0xff] }
  0x14   : > { %167 = vst [vmem:[%s2357_s26 + $0x40] sm:$0xff] %v166_v8  ;;  %v172_v11 = vld [vmem:[%s2352_s25 + $0x58] sm:$0xff]  ;;  %169 = vst [vmem:[%s2357_s26 + $0x48] sm:$0xff] %v168_v9  ;;  %v174_v12 = vld [vmem:[%s2352_s25 + $0x60] sm:$0xff] }
  0x15   : > { %171 = vst [vmem:[%s2357_s26 + $0x50] sm:$0xff] %v170_v10  ;;  %173 = vst [vmem:[%s2357_s26 + $0x58] sm:$0xff] %v172_v11  ;;  %v176_v13 = vld [vmem:[%s2352_s25 + $0x68] sm:$0xff]  ;;  %v178_v14 = vld [vmem:[%s2352_s25 + $0x70] sm:$0xff] }
  0x16   : > { %175 = vst [vmem:[%s2357_s26 + $0x60] sm:$0xff] %v174_v12  ;;  %177 = vst [vmem:[%s2357_s26 + $0x68] sm:$0xff] %v176_v13  ;;  %v180_v15 = vld [vmem:[%s2352_s25 + $0x78] sm:$0xff]  ;;  %v182_v16 = vld [vmem:[%s2352_s25 + $0x100] sm:$0xff] }
  0x17   : > { %179 = vst [vmem:[%s2357_s26 + $0x70] sm:$0xff] %v178_v14  ;;  %v184_v17 = vld [vmem:[%s2352_s25 + $0x108] sm:$0xff]  ;;  %181 = vst [vmem:[%s2357_s26 + $0x78] sm:$0xff] %v180_v15  ;;  %v186_v18 = vld [vmem:[%s2352_s25 + $0x110] sm:$0xff] }
  0x18   : > { %183 = vst [vmem:[%s2357_s26 + $0x80] sm:$0xff] %v182_v16  ;;  %185 = vst [vmem:[%s2357_s26 + $0x88] sm:$0xff] %v184_v17  ;;  %v188_v19 = vld [vmem:[%s2352_s25 + $0x118] sm:$0xff]  ;;  %v190_v20 = vld [vmem:[%s2352_s25 + $0x120] sm:$0xff] }
  0x19   : > { %187 = vst [vmem:[%s2357_s26 + $0x90] sm:$0xff] %v186_v18  ;;  %189 = vst [vmem:[%s2357_s26 + $0x98] sm:$0xff] %v188_v19  ;;  %v192_v21 = vld [vmem:[%s2352_s25 + $0x128] sm:$0xff]  ;;  %v194_v22 = vld [vmem:[%s2352_s25 + $0x130] sm:$0xff] }
  0x1a   : > { %191 = vst [vmem:[%s2357_s26 + $0xa0] sm:$0xff] %v190_v20  ;;  %v196_v23 = vld [vmem:[%s2352_s25 + $0x138] sm:$0xff]  ;;  %193 = vst [vmem:[%s2357_s26 + $0xa8] sm:$0xff] %v192_v21  ;;  %v198_v24 = vld [vmem:[%s2352_s25 + $0x140] sm:$0xff] }
  0x1b   : > { %195 = vst [vmem:[%s2357_s26 + $0xb0] sm:$0xff] %v194_v22  ;;  %197 = vst [vmem:[%s2357_s26 + $0xb8] sm:$0xff] %v196_v23  ;;  %v200_v25 = vld [vmem:[%s2352_s25 + $0x148] sm:$0xff]  ;;  %v202_v26 = vld [vmem:[%s2352_s25 + $0x150] sm:$0xff] }
  0x1c   : > { %199 = vst [vmem:[%s2357_s26 + $0xc0] sm:$0xff] %v198_v24  ;;  %201 = vst [vmem:[%s2357_s26 + $0xc8] sm:$0xff] %v200_v25  ;;  %v204_v27 = vld [vmem:[%s2352_s25 + $0x158] sm:$0xff]  ;;  %v206_v28 = vld [vmem:[%s2352_s25 + $0x160] sm:$0xff] }
  0x1d   : > { %203 = vst [vmem:[%s2357_s26 + $0xd0] sm:$0xff] %v202_v26  ;;  %v208_v29 = vld [vmem:[%s2352_s25 + $0x168] sm:$0xff]  ;;  %205 = vst [vmem:[%s2357_s26 + $0xd8] sm:$0xff] %v204_v27  ;;  %v210_v30 = vld [vmem:[%s2352_s25 + $0x170] sm:$0xff] }
  0x1e   : > { %207 = vst [vmem:[%s2357_s26 + $0xe0] sm:$0xff] %v206_v28  ;;  %209 = vst [vmem:[%s2357_s26 + $0xe8] sm:$0xff] %v208_v29  ;;  %v212_v31 = vld [vmem:[%s2352_s25 + $0x178] sm:$0xff]  ;;  %v214_v32 = vld [vmem:[%s2352_s25 + $0x200] sm:$0xff] }
  0x1f   : > { %211 = vst [vmem:[%s2357_s26 + $0xf0] sm:$0xff] %v210_v30  ;;  %213 = vst [vmem:[%s2357_s26 + $0xf8] sm:$0xff] %v212_v31  ;;  %v216_v33 = vld [vmem:[%s2352_s25 + $0x208] sm:$0xff]  ;;  %v218_v34 = vld [vmem:[%s2352_s25 + $0x210] sm:$0xff] }
  0x20   : > { %215 = vst [vmem:[%s2357_s26 + $0x100] sm:$0xff] %v214_v32  ;;  %v220_v35 = vld [vmem:[%s2352_s25 + $0x218] sm:$0xff]  ;;  %217 = vst [vmem:[%s2357_s26 + $0x108] sm:$0xff] %v216_v33  ;;  %v222_v36 = vld [vmem:[%s2352_s25 + $0x220] sm:$0xff] }
  0x21   : > { %219 = vst [vmem:[%s2357_s26 + $0x110] sm:$0xff] %v218_v34  ;;  %221 = vst [vmem:[%s2357_s26 + $0x118] sm:$0xff] %v220_v35  ;;  %v224_v37 = vld [vmem:[%s2352_s25 + $0x228] sm:$0xff]  ;;  %v226_v38 = vld [vmem:[%s2352_s25 + $0x230] sm:$0xff] }
  0x22   : > { %223 = vst [vmem:[%s2357_s26 + $0x120] sm:$0xff] %v222_v36  ;;  %225 = vst [vmem:[%s2357_s26 + $0x128] sm:$0xff] %v224_v37  ;;  %v228_v39 = vld [vmem:[%s2352_s25 + $0x238] sm:$0xff]  ;;  %v230_v40 = vld [vmem:[%s2352_s25 + $0x240] sm:$0xff] }
  0x23   : > { %227 = vst [vmem:[%s2357_s26 + $0x130] sm:$0xff] %v226_v38  ;;  %v232_v41 = vld [vmem:[%s2352_s25 + $0x248] sm:$0xff]  ;;  %229 = vst [vmem:[%s2357_s26 + $0x138] sm:$0xff] %v228_v39  ;;  %v234_v42 = vld [vmem:[%s2352_s25 + $0x250] sm:$0xff] }
  0x24   : > { %231 = vst [vmem:[%s2357_s26 + $0x140] sm:$0xff] %v230_v40  ;;  %233 = vst [vmem:[%s2357_s26 + $0x148] sm:$0xff] %v232_v41  ;;  %v236_v43 = vld [vmem:[%s2352_s25 + $0x258] sm:$0xff]  ;;  %v238_v44 = vld [vmem:[%s2352_s25 + $0x260] sm:$0xff] }
  0x25   : > { %235 = vst [vmem:[%s2357_s26 + $0x150] sm:$0xff] %v234_v42  ;;  %237 = vst [vmem:[%s2357_s26 + $0x158] sm:$0xff] %v236_v43  ;;  %v240_v45 = vld [vmem:[%s2352_s25 + $0x268] sm:$0xff]  ;;  %v242_v46 = vld [vmem:[%s2352_s25 + $0x270] sm:$0xff] }
  0x26   : > { %239 = vst [vmem:[%s2357_s26 + $0x160] sm:$0xff] %v238_v44  ;;  %v244_v47 = vld [vmem:[%s2352_s25 + $0x278] sm:$0xff]  ;;  %241 = vst [vmem:[%s2357_s26 + $0x168] sm:$0xff] %v240_v45  ;;  %v246_v48 = vld [vmem:[%s2352_s25 + $0x300] sm:$0xff] }
  0x27   : > { %243 = vst [vmem:[%s2357_s26 + $0x170] sm:$0xff] %v242_v46  ;;  %245 = vst [vmem:[%s2357_s26 + $0x178] sm:$0xff] %v244_v47  ;;  %v248_v49 = vld [vmem:[%s2352_s25 + $0x308] sm:$0xff]  ;;  %v250_v50 = vld [vmem:[%s2352_s25 + $0x310] sm:$0xff] }
  0x28   : > { %247 = vst [vmem:[%s2357_s26 + $0x180] sm:$0xff] %v246_v48  ;;  %249 = vst [vmem:[%s2357_s26 + $0x188] sm:$0xff] %v248_v49  ;;  %v252_v51 = vld [vmem:[%s2352_s25 + $0x318] sm:$0xff]  ;;  %v254_v52 = vld [vmem:[%s2352_s25 + $0x320] sm:$0xff] }
  0x29   : > { %251 = vst [vmem:[%s2357_s26 + $0x190] sm:$0xff] %v250_v50  ;;  %v256_v53 = vld [vmem:[%s2352_s25 + $0x328] sm:$0xff]  ;;  %253 = vst [vmem:[%s2357_s26 + $0x198] sm:$0xff] %v252_v51  ;;  %v258_v54 = vld [vmem:[%s2352_s25 + $0x330] sm:$0xff] }
  0x2a   : > { %255 = vst [vmem:[%s2357_s26 + $0x1a0] sm:$0xff] %v254_v52  ;;  %257 = vst [vmem:[%s2357_s26 + $0x1a8] sm:$0xff] %v256_v53  ;;  %v260_v55 = vld [vmem:[%s2352_s25 + $0x338] sm:$0xff]  ;;  %v262_v56 = vld [vmem:[%s2352_s25 + $0x340] sm:$0xff] }
  0x2b   : > { %259 = vst [vmem:[%s2357_s26 + $0x1b0] sm:$0xff] %v258_v54  ;;  %261 = vst [vmem:[%s2357_s26 + $0x1b8] sm:$0xff] %v260_v55  ;;  %v264_v57 = vld [vmem:[%s2352_s25 + $0x348] sm:$0xff]  ;;  %v266_v58 = vld [vmem:[%s2352_s25 + $0x350] sm:$0xff] }
  0x2c   : > { %263 = vst [vmem:[%s2357_s26 + $0x1c0] sm:$0xff] %v262_v56  ;;  %v268_v59 = vld [vmem:[%s2352_s25 + $0x358] sm:$0xff]  ;;  %265 = vst [vmem:[%s2357_s26 + $0x1c8] sm:$0xff] %v264_v57  ;;  %v270_v60 = vld [vmem:[%s2352_s25 + $0x360] sm:$0xff] }
  0x2d   : > { %267 = vst [vmem:[%s2357_s26 + $0x1d0] sm:$0xff] %v266_v58  ;;  %269 = vst [vmem:[%s2357_s26 + $0x1d8] sm:$0xff] %v268_v59  ;;  %v272_v61 = vld [vmem:[%s2352_s25 + $0x368] sm:$0xff]  ;;  %v274_v62 = vld [vmem:[%s2352_s25 + $0x370] sm:$0xff] }
  0x2e   : > { %271 = vst [vmem:[%s2357_s26 + $0x1e0] sm:$0xff] %v270_v60  ;;  %273 = vst [vmem:[%s2357_s26 + $0x1e8] sm:$0xff] %v272_v61  ;;  %v276_v63 = vld [vmem:[%s2352_s25 + $0x378] sm:$0xff]  ;;  %v278_v0 = vld [vmem:[%s2352_s25 + $0x400] sm:$0xff] }
  0x2f   : > { %275 = vst [vmem:[%s2357_s26 + $0x1f0] sm:$0xff] %v274_v62  ;;  %v280_v1 = vld [vmem:[%s2352_s25 + $0x408] sm:$0xff]  ;;  %277 = vst [vmem:[%s2357_s26 + $0x1f8] sm:$0xff] %v276_v63  ;;  %v282_v2 = vld [vmem:[%s2352_s25 + $0x410] sm:$0xff] }
  0x30   : > { %279 = vst [vmem:[%s2357_s26 + $0x200] sm:$0xff] %v278_v0  ;;  %281 = vst [vmem:[%s2357_s26 + $0x208] sm:$0xff] %v280_v1  ;;  %v284_v3 = vld [vmem:[%s2352_s25 + $0x418] sm:$0xff]  ;;  %v286_v4 = vld [vmem:[%s2352_s25 + $0x420] sm:$0xff] }
  0x31   : > { %283 = vst [vmem:[%s2357_s26 + $0x210] sm:$0xff] %v282_v2  ;;  %285 = vst [vmem:[%s2357_s26 + $0x218] sm:$0xff] %v284_v3  ;;  %v288_v5 = vld [vmem:[%s2352_s25 + $0x428] sm:$0xff]  ;;  %v290_v6 = vld [vmem:[%s2352_s25 + $0x430] sm:$0xff] }
  0x32   : > { %287 = vst [vmem:[%s2357_s26 + $0x220] sm:$0xff] %v286_v4  ;;  %v292_v7 = vld [vmem:[%s2352_s25 + $0x438] sm:$0xff]  ;;  %289 = vst [vmem:[%s2357_s26 + $0x228] sm:$0xff] %v288_v5  ;;  %v294_v8 = vld [vmem:[%s2352_s25 + $0x440] sm:$0xff] }
  0x33   : > { %291 = vst [vmem:[%s2357_s26 + $0x230] sm:$0xff] %v290_v6  ;;  %293 = vst [vmem:[%s2357_s26 + $0x238] sm:$0xff] %v292_v7  ;;  %v296_v9 = vld [vmem:[%s2352_s25 + $0x448] sm:$0xff]  ;;  %v298_v10 = vld [vmem:[%s2352_s25 + $0x450] sm:$0xff] }
  0x34   : > { %295 = vst [vmem:[%s2357_s26 + $0x240] sm:$0xff] %v294_v8  ;;  %297 = vst [vmem:[%s2357_s26 + $0x248] sm:$0xff] %v296_v9  ;;  %v300_v11 = vld [vmem:[%s2352_s25 + $0x458] sm:$0xff]  ;;  %v302_v12 = vld [vmem:[%s2352_s25 + $0x460] sm:$0xff] }
  0x35   : > { %299 = vst [vmem:[%s2357_s26 + $0x250] sm:$0xff] %v298_v10  ;;  %v304_v13 = vld [vmem:[%s2352_s25 + $0x468] sm:$0xff]  ;;  %301 = vst [vmem:[%s2357_s26 + $0x258] sm:$0xff] %v300_v11  ;;  %v306_v14 = vld [vmem:[%s2352_s25 + $0x470] sm:$0xff] }
  0x36   : > { %303 = vst [vmem:[%s2357_s26 + $0x260] sm:$0xff] %v302_v12  ;;  %305 = vst [vmem:[%s2357_s26 + $0x268] sm:$0xff] %v304_v13  ;;  %v308_v15 = vld [vmem:[%s2352_s25 + $0x478] sm:$0xff]  ;;  %v310_v16 = vld [vmem:[%s2352_s25 + $0x500] sm:$0xff] }
  0x37   : > { %307 = vst [vmem:[%s2357_s26 + $0x270] sm:$0xff] %v306_v14  ;;  %309 = vst [vmem:[%s2357_s26 + $0x278] sm:$0xff] %v308_v15  ;;  %v312_v17 = vld [vmem:[%s2352_s25 + $0x508] sm:$0xff]  ;;  %v314_v18 = vld [vmem:[%s2352_s25 + $0x510] sm:$0xff] }
  0x38   : > { %311 = vst [vmem:[%s2357_s26 + $0x280] sm:$0xff] %v310_v16  ;;  %v316_v19 = vld [vmem:[%s2352_s25 + $0x518] sm:$0xff]  ;;  %313 = vst [vmem:[%s2357_s26 + $0x288] sm:$0xff] %v312_v17  ;;  %v318_v20 = vld [vmem:[%s2352_s25 + $0x520] sm:$0xff] }
  0x39   : > { %315 = vst [vmem:[%s2357_s26 + $0x290] sm:$0xff] %v314_v18  ;;  %317 = vst [vmem:[%s2357_s26 + $0x298] sm:$0xff] %v316_v19  ;;  %v320_v21 = vld [vmem:[%s2352_s25 + $0x528] sm:$0xff]  ;;  %v322_v22 = vld [vmem:[%s2352_s25 + $0x530] sm:$0xff] }
  0x3a   : > { %319 = vst [vmem:[%s2357_s26 + $0x2a0] sm:$0xff] %v318_v20  ;;  %321 = vst [vmem:[%s2357_s26 + $0x2a8] sm:$0xff] %v320_v21  ;;  %v324_v23 = vld [vmem:[%s2352_s25 + $0x538] sm:$0xff]  ;;  %v326_v24 = vld [vmem:[%s2352_s25 + $0x540] sm:$0xff] }
  0x3b   : > { %323 = vst [vmem:[%s2357_s26 + $0x2b0] sm:$0xff] %v322_v22  ;;  %v328_v25 = vld [vmem:[%s2352_s25 + $0x548] sm:$0xff]  ;;  %325 = vst [vmem:[%s2357_s26 + $0x2b8] sm:$0xff] %v324_v23  ;;  %v330_v26 = vld [vmem:[%s2352_s25 + $0x550] sm:$0xff] }
  0x3c   : > { %327 = vst [vmem:[%s2357_s26 + $0x2c0] sm:$0xff] %v326_v24  ;;  %329 = vst [vmem:[%s2357_s26 + $0x2c8] sm:$0xff] %v328_v25  ;;  %v332_v27 = vld [vmem:[%s2352_s25 + $0x558] sm:$0xff]  ;;  %v334_v28 = vld [vmem:[%s2352_s25 + $0x560] sm:$0xff] }
  0x3d   : > { %331 = vst [vmem:[%s2357_s26 + $0x2d0] sm:$0xff] %v330_v26  ;;  %333 = vst [vmem:[%s2357_s26 + $0x2d8] sm:$0xff] %v332_v27  ;;  %v336_v29 = vld [vmem:[%s2352_s25 + $0x568] sm:$0xff]  ;;  %v338_v30 = vld [vmem:[%s2352_s25 + $0x570] sm:$0xff] }
  0x3e   : > { %335 = vst [vmem:[%s2357_s26 + $0x2e0] sm:$0xff] %v334_v28  ;;  %v340_v31 = vld [vmem:[%s2352_s25 + $0x578] sm:$0xff]  ;;  %337 = vst [vmem:[%s2357_s26 + $0x2e8] sm:$0xff] %v336_v29  ;;  %v342_v32 = vld [vmem:[%s2352_s25 + $0x600] sm:$0xff] }
  0x3f   : > { %339 = vst [vmem:[%s2357_s26 + $0x2f0] sm:$0xff] %v338_v30  ;;  %341 = vst [vmem:[%s2357_s26 + $0x2f8] sm:$0xff] %v340_v31  ;;  %v344_v33 = vld [vmem:[%s2352_s25 + $0x608] sm:$0xff]  ;;  %v346_v34 = vld [vmem:[%s2352_s25 + $0x610] sm:$0xff] }
  0x40   : > { %343 = vst [vmem:[%s2357_s26 + $0x300] sm:$0xff] %v342_v32  ;;  %345 = vst [vmem:[%s2357_s26 + $0x308] sm:$0xff] %v344_v33  ;;  %v348_v35 = vld [vmem:[%s2352_s25 + $0x618] sm:$0xff]  ;;  %v350_v36 = vld [vmem:[%s2352_s25 + $0x620] sm:$0xff] }
  0x41   : > { %347 = vst [vmem:[%s2357_s26 + $0x310] sm:$0xff] %v346_v34  ;;  %v352_v37 = vld [vmem:[%s2352_s25 + $0x628] sm:$0xff]  ;;  %349 = vst [vmem:[%s2357_s26 + $0x318] sm:$0xff] %v348_v35  ;;  %v354_v38 = vld [vmem:[%s2352_s25 + $0x630] sm:$0xff] }
  0x42   : > { %351 = vst [vmem:[%s2357_s26 + $0x320] sm:$0xff] %v350_v36  ;;  %353 = vst [vmem:[%s2357_s26 + $0x328] sm:$0xff] %v352_v37  ;;  %v356_v39 = vld [vmem:[%s2352_s25 + $0x638] sm:$0xff]  ;;  %v358_v40 = vld [vmem:[%s2352_s25 + $0x640] sm:$0xff] }
  0x43   : > { %355 = vst [vmem:[%s2357_s26 + $0x330] sm:$0xff] %v354_v38  ;;  %357 = vst [vmem:[%s2357_s26 + $0x338] sm:$0xff] %v356_v39  ;;  %v360_v41 = vld [vmem:[%s2352_s25 + $0x648] sm:$0xff]  ;;  %v362_v42 = vld [vmem:[%s2352_s25 + $0x650] sm:$0xff] }
  0x44   : > { %359 = vst [vmem:[%s2357_s26 + $0x340] sm:$0xff] %v358_v40  ;;  %v364_v43 = vld [vmem:[%s2352_s25 + $0x658] sm:$0xff]  ;;  %361 = vst [vmem:[%s2357_s26 + $0x348] sm:$0xff] %v360_v41  ;;  %v366_v44 = vld [vmem:[%s2352_s25 + $0x660] sm:$0xff] }
  0x45   : > { %363 = vst [vmem:[%s2357_s26 + $0x350] sm:$0xff] %v362_v42  ;;  %365 = vst [vmem:[%s2357_s26 + $0x358] sm:$0xff] %v364_v43  ;;  %v368_v45 = vld [vmem:[%s2352_s25 + $0x668] sm:$0xff]  ;;  %v370_v46 = vld [vmem:[%s2352_s25 + $0x670] sm:$0xff] }
  0x46   : > { %367 = vst [vmem:[%s2357_s26 + $0x360] sm:$0xff] %v366_v44  ;;  %369 = vst [vmem:[%s2357_s26 + $0x368] sm:$0xff] %v368_v45  ;;  %v372_v47 = vld [vmem:[%s2352_s25 + $0x678] sm:$0xff]  ;;  %v374_v48 = vld [vmem:[%s2352_s25 + $0x700] sm:$0xff] }
  0x47   : > { %371 = vst [vmem:[%s2357_s26 + $0x370] sm:$0xff] %v370_v46  ;;  %v376_v49 = vld [vmem:[%s2352_s25 + $0x708] sm:$0xff]  ;;  %373 = vst [vmem:[%s2357_s26 + $0x378] sm:$0xff] %v372_v47  ;;  %v378_v50 = vld [vmem:[%s2352_s25 + $0x710] sm:$0xff] }
  0x48   : > { %375 = vst [vmem:[%s2357_s26 + $0x380] sm:$0xff] %v374_v48  ;;  %377 = vst [vmem:[%s2357_s26 + $0x388] sm:$0xff] %v376_v49  ;;  %v380_v51 = vld [vmem:[%s2352_s25 + $0x718] sm:$0xff]  ;;  %v382_v52 = vld [vmem:[%s2352_s25 + $0x720] sm:$0xff] }
  0x49   : > { %379 = vst [vmem:[%s2357_s26 + $0x390] sm:$0xff] %v378_v50  ;;  %381 = vst [vmem:[%s2357_s26 + $0x398] sm:$0xff] %v380_v51  ;;  %v384_v53 = vld [vmem:[%s2352_s25 + $0x728] sm:$0xff]  ;;  %v386_v54 = vld [vmem:[%s2352_s25 + $0x730] sm:$0xff] }
  0x4a   : > { %383 = vst [vmem:[%s2357_s26 + $0x3a0] sm:$0xff] %v382_v52  ;;  %v388_v55 = vld [vmem:[%s2352_s25 + $0x738] sm:$0xff]  ;;  %385 = vst [vmem:[%s2357_s26 + $0x3a8] sm:$0xff] %v384_v53  ;;  %v390_v56 = vld [vmem:[%s2352_s25 + $0x740] sm:$0xff] }
  0x4b   : > { %387 = vst [vmem:[%s2357_s26 + $0x3b0] sm:$0xff] %v386_v54  ;;  %389 = vst [vmem:[%s2357_s26 + $0x3b8] sm:$0xff] %v388_v55  ;;  %v392_v57 = vld [vmem:[%s2352_s25 + $0x748] sm:$0xff]  ;;  %v394_v58 = vld [vmem:[%s2352_s25 + $0x750] sm:$0xff] }
  0x4c   : > { %391 = vst [vmem:[%s2357_s26 + $0x3c0] sm:$0xff] %v390_v56  ;;  %393 = vst [vmem:[%s2357_s26 + $0x3c8] sm:$0xff] %v392_v57  ;;  %v396_v59 = vld [vmem:[%s2352_s25 + $0x758] sm:$0xff]  ;;  %v398_v60 = vld [vmem:[%s2352_s25 + $0x760] sm:$0xff] }
  0x4d   : > { %395 = vst [vmem:[%s2357_s26 + $0x3d0] sm:$0xff] %v394_v58  ;;  %v400_v61 = vld [vmem:[%s2352_s25 + $0x768] sm:$0xff]  ;;  %397 = vst [vmem:[%s2357_s26 + $0x3d8] sm:$0xff] %v396_v59  ;;  %v402_v62 = vld [vmem:[%s2352_s25 + $0x770] sm:$0xff] }
  0x4e   : > { %399 = vst [vmem:[%s2357_s26 + $0x3e0] sm:$0xff] %v398_v60  ;;  %401 = vst [vmem:[%s2357_s26 + $0x3e8] sm:$0xff] %v400_v61  ;;  %v404_v63 = vld [vmem:[%s2352_s25 + $0x778] sm:$0xff] }
  0x4f   : > { %403 = vst [vmem:[%s2357_s26 + $0x3f0] sm:$0xff] %v402_v62  ;;  %405 = vst [vmem:[%s2357_s26 + $0x3f8] sm:$0xff] %v404_v63 }
  0x50 PF: > { %p2096_p5 = scmp.ge.s32.totalorder %s2295_s14, 1  ;;  %p410_p6 = scmp.lt.s32.totalorder %s2295_s14, 3 }
  0x52   : > { %p411_p7 = pnand %p2096_p5, %p410_p6 }
  0x53   : > { %s417_s27 = sand.u32 (!%p411_p7), 1, %s2287_s12   ;;  %s2098_s7 = sshll.u32 (!%p411_p7), %s2089_s15, 5 }
  0x54   : > { %414 = sbr.rel (%p411_p7) target bundleno = 426 (0x1aa), region = 51  ;;  %s2097_s28 = sshll.u32 (!%p411_p7), %s417_s27, 10 }
  0x55   : > { %s2621_s4 = scalar_lea.vmem (!%p411_p7), [#allocation2], %s2097_s28  ;;  %p442_p8 = scmp.lt.s32.totalorder (!%p411_p7), %s2098_s7, 63 }
  0x59   : > { %v2297_v0 = vmov 0   ;;  %v577_v1 = vld [vmem:[%s2871_s2] sm:$0xf]  ;;  %v546_v4 = vld [vmem:[%s2621_s4 + $0x308] sm:$0xff]  ;;  %v547_v32 = vld [vmem:[%s2621_s4 + $0x310] sm:$0xff]  ;;  %vm1223_vm0 = vcmask 523264  }
  0x5a   : > { %1259 = vmatprep.mubr.bf16.mxu0 %v2297_v0  ;;  %1300 = vmatprep.mubr.bf16.mxu1 %v2297_v0  ;;  %v545_v2 = vld [vmem:[%s2621_s4 + $0x300] sm:$0xff]  ;;  %v562_v6 = vld [vmem:[%s2621_s4 + $0x388] sm:$0xff]  ;;  %v563_v33 = vld [vmem:[%s2621_s4 + $0x390] sm:$0xff]  ;;  %s2877_s7 = smov (!%p442_p8, %s2098_s7), 63 }
  0x5b   : > { %2272 = vset.pattern.permute.xlu0 %v2297_v0  ;;  %v561_v3 = vld [vmem:[%s2621_s4 + $0x380] sm:$0xff]  ;;  %v2199_v10 = vcombine.high %v546_v4, %v562_v6  ;;  %v2198_v11 = vcombine.low %v546_v4, %v562_v6  ;;  %v514_v13 = vld [vmem:[%s2621_s4 + $0x208] sm:$0xff]  ;;  %v548_v34 = vld [vmem:[%s2621_s4 + $0x318] sm:$0xff]  ;;  %v2201_v38 = vcombine.high %v547_v32, %v563_v33  ;;  %v2200_v45 = vcombine.low %v547_v32, %v563_v33  ;;  %s2099_s8 = sshll.u32 %s2877_s7, 2 }
  0x5c   : > { %580 = vperm.xlu0 %2272, %v577_v1   ;;  %v2197_v5 = vcombine.high %v545_v2, %v561_v3  ;;  %v2196_v7 = vcombine.low %v545_v2, %v561_v3  ;;  %v513_v8 = vld [vmem:[%s2621_s4 + $0x200] sm:$0xff]  ;;  %v530_v14 = vld [vmem:[%s2621_s4 + $0x288] sm:$0xff]  ;;  %v564_v35 = vld [vmem:[%s2621_s4 + $0x398] sm:$0xff]  ;;  %s2813_s11 = scalar_lea.vmem %s2872_s3, %s2099_s8 }
  0x5d   : > { %v529_v9 = vld [vmem:[%s2621_s4 + $0x280] sm:$0xff]  ;;  %v2167_v16 = vcombine.high %v514_v13, %v530_v14  ;;  %v482_v18 = vld [vmem:[%s2621_s4 + $0x108] sm:$0xff]  ;;  %1276 = vmatprep.subr.bf16.mxu1 %v2199_v10  ;;  %v2166_v21 = vcombine.low %v514_v13, %v530_v14  ;;  %v2203_v39 = vcombine.high %v548_v34, %v564_v35  ;;  %v515_v40 = vld [vmem:[%s2621_s4 + $0x210] sm:$0xff]  ;;  %v2202_v46 = vcombine.low %v548_v34, %v564_v35 }
  0x5e   : > { %v2165_v12 = vcombine.high %v513_v8, %v529_v9  ;;  %v481_v15 = vld [vmem:[%s2621_s4 + $0x100] sm:$0xff]  ;;  %1235 = vmatprep.subr.bf16.mxu0 %v2197_v5  ;;  %v498_v19 = vld [vmem:[%s2621_s4 + $0x188] sm:$0xff]  ;;  %v2164_v20 = vcombine.low %v513_v8, %v529_v9  ;;  %1277 = vmatpush1.bf16.msra.mxu1 %v2198_v11  ;;  %v531_v41 = vld [vmem:[%s2621_s4 + $0x290] sm:$0xff] }
  0x5f   : > { %v497_v17 = vld [vmem:[%s2621_s4 + $0x180] sm:$0xff]  ;;  %1236 = vmatpush1.bf16.msra.mxu0 %v2196_v7  ;;  %1278 = vmatprep.subr.bf16.mxu1 %v2167_v16  ;;  %v2135_v23 = vcombine.high %v482_v18, %v498_v19  ;;  %v450_v26 = vld [vmem:[%s2621_s4 + $0x8] sm:$0xff]  ;;  %v2134_v29 = vcombine.low %v482_v18, %v498_v19  ;;  %v516_v42 = vld [vmem:[%s2621_s4 + $0x218] sm:$0xff]  ;;  %v2169_v47 = vcombine.high %v515_v40, %v531_v41 }
  0x60   : > { %1237 = vmatprep.subr.bf16.mxu0 %v2165_v12  ;;  %v2133_v22 = vcombine.high %v481_v15, %v497_v17  ;;  %v449_v24 = vld [vmem:[%s2621_s4] sm:$0xff]  ;;  %v466_v27 = vld [vmem:[%s2621_s4 + $0x88] sm:$0xff]  ;;  %v2132_v28 = vcombine.low %v481_v15, %v497_v17  ;;  %v532_v43 = vld [vmem:[%s2621_s4 + $0x298] sm:$0xff]  ;;  %v2168_v53 = vcombine.low %v515_v40, %v531_v41 }
  0x61   : > { %v465_v25 = vld [vmem:[%s2621_s4 + $0x80] sm:$0xff]  ;;  %v2103_v31 = vcombine.high %v450_v26, %v466_v27  ;;  %v2102_v37 = vcombine.low %v450_v26, %v466_v27  ;;  %v2171_v48 = vcombine.high %v516_v42, %v532_v43  ;;  %v483_v49 = vld [vmem:[%s2621_s4 + $0x110] sm:$0xff]  ;;  %v484_v51 = vld [vmem:[%s2621_s4 + $0x118] sm:$0xff]  ;;  %v2170_v54 = vcombine.low %v516_v42, %v532_v43 }
  0x62   : > { %1279 = vmatpush1.bf16.msra.mxu1 %v2166_v21  ;;  %v2101_v30 = vcombine.high %v449_v24, %v465_v25  ;;  %v2100_v36 = vcombine.low %v449_v24, %v465_v25  ;;  %v2650_v44 = vld [vmem:[%s2869_s0] sm:$0x3]  ;;  %v499_v50 = vld [vmem:[%s2621_s4 + $0x190] sm:$0xff]  ;;  %v500_v52 = vld [vmem:[%s2621_s4 + $0x198] sm:$0xff] }
  0x63   : > { %1238 = vmatpush1.bf16.msra.mxu0 %v2164_v20  ;;  %1280 = vmatprep.subr.bf16.mxu1 %v2135_v23  ;;  %v2137_v55 = vcombine.high %v483_v49, %v499_v50  ;;  %v2139_v56 = vcombine.high %v484_v51, %v500_v52  ;;  %v451_v57 = vld [vmem:[%s2621_s4 + $0x10] sm:$0xff]  ;;  %v452_v59 = vld [vmem:[%s2621_s4 + $0x18] sm:$0xff]  ;;  %v2136_v61 = vcombine.low %v483_v49, %v499_v50  ;;  %v549_v2 = vld [vmem:[%s2621_s4 + $0x320] sm:$0xff] }
  0x64   : > { %1239 = vmatprep.subr.bf16.mxu0 %v2133_v22  ;;  %v467_v58 = vld [vmem:[%s2621_s4 + $0x90] sm:$0xff]  ;;  %v468_v60 = vld [vmem:[%s2621_s4 + $0x98] sm:$0xff]  ;;  %v2138_v62 = vcombine.low %v484_v51, %v500_v52  ;;  %v565_v3 = vld [vmem:[%s2621_s4 + $0x3a0] sm:$0xff] }
  0x65   : > { %v2105_v63 = vcombine.high %v451_v57, %v467_v58  ;;  %v2107_v1 = vcombine.high %v452_v59, %v468_v60  ;;  %v550_v4 = vld [vmem:[%s2621_s4 + $0x328] sm:$0xff]  ;;  %v2104_v6 = vcombine.low %v451_v57, %v467_v58  ;;  %v2106_v7 = vcombine.low %v452_v59, %v468_v60  ;;  %v517_v10 = vld [vmem:[%s2621_s4 + $0x220] sm:$0xff]  ;;  %v551_v34 = vld [vmem:[%s2621_s4 + $0x330] sm:$0xff] }
  0x66   : > { %1281 = vmatpush1.bf16.msra.mxu1 %v2134_v29  ;;  %v566_v5 = vld [vmem:[%s2621_s4 + $0x3a8] sm:$0xff]  ;;  %v2205_v8 = vcombine.high %v549_v2, %v565_v3  ;;  %v533_v11 = vld [vmem:[%s2621_s4 + $0x2a0] sm:$0xff]  ;;  %v2204_v14 = vcombine.low %v549_v2, %v565_v3  ;;  %v567_v35 = vld [vmem:[%s2621_s4 + $0x3b0] sm:$0xff] }
  0x67   : > { %1240 = vmatpush1.bf16.msra.mxu0 %v2132_v28  ;;  %1282 = vmatprep.subr.bf16.mxu1 %v2103_v31  ;;  %v2207_v9 = vcombine.high %v550_v4, %v566_v5  ;;  %v518_v12 = vld [vmem:[%s2621_s4 + $0x228] sm:$0xff]  ;;  %v2206_v15 = vcombine.low %v550_v4, %v566_v5  ;;  %v2173_v16 = vcombine.high %v517_v10, %v533_v11  ;;  %v485_v18 = vld [vmem:[%s2621_s4 + $0x120] sm:$0xff]  ;;  %v519_v42 = vld [vmem:[%s2621_s4 + $0x230] sm:$0xff] }
  0x68   : > { %1241 = vmatprep.subr.bf16.mxu0 %v2101_v30  ;;  %v534_v13 = vld [vmem:[%s2621_s4 + $0x2a8] sm:$0xff]  ;;  %v501_v19 = vld [vmem:[%s2621_s4 + $0x1a0] sm:$0xff]  ;;  %v2172_v22 = vcombine.low %v517_v10, %v533_v11  ;;  %v2209_v40 = vcombine.high %v551_v34, %v567_v35  ;;  %v535_v43 = vld [vmem:[%s2621_s4 + $0x2b0] sm:$0xff] }
  0x69   : > { %v2175_v17 = vcombine.high %v518_v12, %v534_v13  ;;  %v486_v20 = vld [vmem:[%s2621_s4 + $0x128] sm:$0xff]  ;;  %v2174_v23 = vcombine.low %v518_v12, %v534_v13  ;;  %v2141_v24 = vcombine.high %v485_v18, %v501_v19  ;;  %v453_v26 = vld [vmem:[%s2621_s4 + $0x20] sm:$0xff]  ;;  %v2140_v30 = vcombine.low %v485_v18, %v501_v19  ;;  %v487_v51 = vld [vmem:[%s2621_s4 + $0x130] sm:$0xff] }
  0x6a   : > { %1283 = vmatpush1.bf16.msra.mxu1 %v2102_v37  ;;  %v502_v21 = vld [vmem:[%s2621_s4 + $0x1a8] sm:$0xff]  ;;  %v469_v27 = vld [vmem:[%s2621_s4 + $0xa0] sm:$0xff]  ;;  %v568_v37 = vld [vmem:[%s2621_s4 + $0x3b8] sm:$0xff]  ;;  %v2177_v49 = vcombine.high %v519_v42, %v535_v43 }
  0x6b   : > { %1242 = vmatpush1.bf16.msra.mxu0 %v2100_v36  ;;  %1358 = vmatprep.subr.bf16.mxu1 %v2203_v39  ;;  %v2143_v25 = vcombine.high %v486_v20, %v502_v21  ;;  %v454_v28 = vld [vmem:[%s2621_s4 + $0x28] sm:$0xff]  ;;  %v2142_v31 = vcombine.low %v486_v20, %v502_v21  ;;  %v2109_v32 = vcombine.high %v453_v26, %v469_v27  ;;  %v552_v36 = vld [vmem:[%s2621_s4 + $0x338] sm:$0xff]  ;;  %v503_v52 = vld [vmem:[%s2621_s4 + $0x1b0] sm:$0xff] }
  0x6c   : > { %1317 = vmatprep.subr.bf16.mxu0 %v2201_v38  ;;  %v470_v29 = vld [vmem:[%s2621_s4 + $0xa8] sm:$0xff]  ;;  %v2108_v38 = vcombine.low %v453_v26, %v469_v27  ;;  %v2211_v41 = vcombine.high %v552_v36, %v568_v37  ;;  %v2145_v57 = vcombine.high %v487_v51, %v503_v52  ;;  %v455_v59 = vld [vmem:[%s2621_s4 + $0x30] sm:$0xff]  ;;  %v553_v4 = vld [vmem:[%s2621_s4 + $0x340] sm:$0xff] }
  0x6d   : > { %2229 = vmatmul.mubr.msk.bf16.vlgmr.msra.gmra.mxu1 %vm1223_vm0, %v2650_v44  ;;  %v2111_v33 = vcombine.high %v454_v28, %v470_v29  ;;  %v2110_v39 = vcombine.low %v454_v28, %v470_v29  ;;  %v471_v60 = vld [vmem:[%s2621_s4 + $0xb0] sm:$0xff]  ;;  %v569_v5 = vld [vmem:[%s2621_s4 + $0x3c0] sm:$0xff] }
  0x6e   : > { %2228 = vmatmul.mubr.msk.bf16.vlgmr.msra.gmra.mxu0 %vm1223_vm0, %v2650_v44  ;;  %1359 = vmatpush1.bf16.msra.mxu1 %v2202_v46  ;;  %v536_v46 = vld [vmem:[%s2621_s4 + $0x2b8] sm:$0xff]  ;;  %v2113_v2 = vcombine.high %v455_v59, %v471_v60  ;;  %v2213_v10 = vcombine.high %v553_v4, %v569_v5  ;;  %v521_v12 = vld [vmem:[%s2621_s4 + $0x240] sm:$0xff] }
  0x6f   : > { %1318 = vmatpush1.bf16.msra.mxu0 %v2200_v45  ;;  %1360 = vmatprep.subr.bf16.mxu1 %v2171_v48  ;;  %v520_v45 = vld [vmem:[%s2621_s4 + $0x238] sm:$0xff]  ;;  %v2210_v48 = vcombine.low %v552_v36, %v568_v37  ;;  %v537_v13 = vld [vmem:[%s2621_s4 + $0x2c0] sm:$0xff]  ;;  %v555_v36 = vld [vmem:[%s2621_s4 + $0x350] sm:$0xff] }
  0x70   : > { %1319 = vmatprep.subr.bf16.mxu0 %v2169_v47  ;;  %1341 = vmatprep.mubr.bf16.mxu0 %v2297_v0  ;;  %v2208_v47 = vcombine.low %v551_v34, %v567_v35  ;;  %v2179_v50 = vcombine.high %v520_v45, %v536_v46  ;;  %v2181_v18 = vcombine.high %v521_v12, %v537_v13  ;;  %v489_v20 = vld [vmem:[%s2621_s4 + $0x140] sm:$0xff]  ;;  %v571_v37 = vld [vmem:[%s2621_s4 + $0x3d0] sm:$0xff] }
  0x71   : > { %1382 = vmatprep.mubr.bf16.mxu1 %v2297_v0  ;;  %v505_v21 = vld [vmem:[%s2621_s4 + $0x1c0] sm:$0xff] }
  0x72   : > { %1361 = vmatpush1.bf16.msra.mxu1 %v2170_v54  ;;  %v504_v54 = vld [vmem:[%s2621_s4 + $0x1b8] sm:$0xff]  ;;  %v2149_v26 = vcombine.high %v489_v20, %v505_v21  ;;  %v457_v28 = vld [vmem:[%s2621_s4 + $0x40] sm:$0xff] }
  0x73   : > { %1320 = vmatpush1.bf16.msra.mxu0 %v2168_v53  ;;  %1362 = vmatprep.subr.bf16.mxu1 %v2139_v56  ;;  %v488_v53 = vld [vmem:[%s2621_s4 + $0x138] sm:$0xff]  ;;  %v2178_v56 = vcombine.low %v520_v45, %v536_v46  ;;  %v473_v29 = vld [vmem:[%s2621_s4 + $0xc0] sm:$0xff]  ;;  %v523_v45 = vld [vmem:[%s2621_s4 + $0x250] sm:$0xff] }
  0x74   : > { %1321 = vmatprep.subr.bf16.mxu0 %v2137_v55  ;;  %v2176_v55 = vcombine.low %v519_v42, %v535_v43  ;;  %v2147_v58 = vcombine.high %v488_v53, %v504_v54  ;;  %v2117_v34 = vcombine.high %v457_v28, %v473_v29  ;;  %v2217_v42 = vcombine.high %v555_v36, %v571_v37  ;;  %v539_v46 = vld [vmem:[%s2621_s4 + $0x2d0] sm:$0xff] }
  0x76   : > { %1363 = vmatpush1.bf16.msra.mxu1 %v2138_v62  ;;  %v472_v62 = vld [vmem:[%s2621_s4 + $0xb8] sm:$0xff] }
  0x77   : > { %1322 = vmatpush1.bf16.msra.mxu0 %v2136_v61  ;;  %1364 = vmatprep.subr.bf16.mxu1 %v2107_v1  ;;  %v456_v61 = vld [vmem:[%s2621_s4 + $0x38] sm:$0xff]  ;;  %v2146_v1 = vcombine.low %v488_v53, %v504_v54  ;;  %v491_v53 = vld [vmem:[%s2621_s4 + $0x150] sm:$0xff] }
  0x78   : > { %1323 = vmatprep.subr.bf16.mxu0 %v2105_v63  ;;  %v2144_v63 = vcombine.low %v487_v51, %v503_v52  ;;  %v2115_v3 = vcombine.high %v456_v61, %v472_v62  ;;  %v2185_v51 = vcombine.high %v523_v45, %v539_v46  ;;  %v507_v54 = vld [vmem:[%s2621_s4 + $0x1d0] sm:$0xff] }
  0x7a   : > { %1365 = vmatpush1.bf16.msra.mxu1 %v2106_v7  ;;  %v570_v7 = vld [vmem:[%s2621_s4 + $0x3c8] sm:$0xff] }
  0x7b   : > { %1324 = vmatpush1.bf16.msra.mxu0 %v2104_v6  ;;  %1440 = vmatprep.subr.bf16.mxu1 %v2207_v9  ;;  %v554_v6 = vld [vmem:[%s2621_s4 + $0x348] sm:$0xff]  ;;  %v2114_v9 = vcombine.low %v456_v61, %v472_v62  ;;  %v459_v61 = vld [vmem:[%s2621_s4 + $0x50] sm:$0xff] }
  0x7c   : > { %1399 = vmatprep.subr.bf16.mxu0 %v2205_v8  ;;  %v2112_v8 = vcombine.low %v455_v59, %v471_v60  ;;  %v2215_v11 = vcombine.high %v554_v6, %v570_v7  ;;  %v2153_v59 = vcombine.high %v491_v53, %v507_v54  ;;  %v475_v62 = vld [vmem:[%s2621_s4 + $0xd0] sm:$0xff] }
  0x7d   : > { %2231 = vmatmul.mubr.msk.bf16.vlgmr.msra.gmra.mxu1 %vm1223_vm0, %v2650_v44 }
  0x7e   : > { %2230 = vmatmul.mubr.msk.bf16.vlgmr.msra.gmra.mxu0 %vm1223_vm0, %v2650_v44  ;;  %1441 = vmatpush1.bf16.msra.mxu1 %v2206_v15  ;;  %v538_v15 = vld [vmem:[%s2621_s4 + $0x2c8] sm:$0xff] }
  0x7f   : > { %1400 = vmatpush1.bf16.msra.mxu0 %v2204_v14  ;;  %1442 = vmatprep.subr.bf16.mxu1 %v2175_v17  ;;  %v522_v14 = vld [vmem:[%s2621_s4 + $0x248] sm:$0xff]  ;;  %v2214_v17 = vcombine.low %v554_v6, %v570_v7  ;;  %v557_v6 = vld [vmem:[%s2621_s4 + $0x360] sm:$0xff] }
  0x80   : > { %1401 = vmatprep.subr.bf16.mxu0 %v2173_v16  ;;  %1423 = vmatprep.mubr.bf16.mxu0 %v2297_v0  ;;  %v2212_v16 = vcombine.low %v553_v4, %v569_v5  ;;  %v2183_v19 = vcombine.high %v522_v14, %v538_v15  ;;  %v2121_v4 = vcombine.high %v459_v61, %v475_v62  ;;  %v573_v7 = vld [vmem:[%s2621_s4 + $0x3e0] sm:$0xff] }
  0x81   : > { %1464 = vmatprep.mubr.bf16.mxu1 %v2297_v0 }
  0x82   : > { %1443 = vmatpush1.bf16.msra.mxu1 %v2174_v23  ;;  %v506_v23 = vld [vmem:[%s2621_s4 + $0x1c8] sm:$0xff] }
  0x83   : > { %1402 = vmatpush1.bf16.msra.mxu0 %v2172_v22  ;;  %1444 = vmatprep.subr.bf16.mxu1 %v2143_v25  ;;  %v490_v22 = vld [vmem:[%s2621_s4 + $0x148] sm:$0xff]  ;;  %v2182_v25 = vcombine.low %v522_v14, %v538_v15  ;;  %v525_v14 = vld [vmem:[%s2621_s4 + $0x260] sm:$0xff] }
  0x84   : > { %1403 = vmatprep.subr.bf16.mxu0 %v2141_v24  ;;  %v2180_v24 = vcombine.low %v521_v12, %v537_v13  ;;  %v2151_v27 = vcombine.high %v490_v22, %v506_v23  ;;  %v2221_v12 = vcombine.high %v557_v6, %v573_v7  ;;  %v541_v15 = vld [vmem:[%s2621_s4 + $0x2e0] sm:$0xff] }
  0x86   : > { %1445 = vmatpush1.bf16.msra.mxu1 %v2142_v31  ;;  %v474_v31 = vld [vmem:[%s2621_s4 + $0xc8] sm:$0xff] }
  0x87   : > { %1404 = vmatpush1.bf16.msra.mxu0 %v2140_v30  ;;  %1446 = vmatprep.subr.bf16.mxu1 %v2111_v33  ;;  %v458_v30 = vld [vmem:[%s2621_s4 + $0x48] sm:$0xff]  ;;  %v2150_v33 = vcombine.low %v490_v22, %v506_v23  ;;  %v493_v22 = vld [vmem:[%s2621_s4 + $0x160] sm:$0xff] }
  0x88   : > { %1405 = vmatprep.subr.bf16.mxu0 %v2109_v32  ;;  %v2148_v32 = vcombine.low %v489_v20, %v505_v21  ;;  %v2119_v35 = vcombine.high %v458_v30, %v474_v31  ;;  %v2189_v20 = vcombine.high %v525_v14, %v541_v15  ;;  %v509_v23 = vld [vmem:[%s2621_s4 + $0x1e0] sm:$0xff] }
  0x8a   : > { %1447 = vmatpush1.bf16.msra.mxu1 %v2110_v39  ;;  %v572_v39 = vld [vmem:[%s2621_s4 + $0x3d8] sm:$0xff] }
  0x8b   : > { %1406 = vmatpush1.bf16.msra.mxu0 %v2108_v38  ;;  %1522 = vmatprep.subr.bf16.mxu1 %v2211_v41  ;;  %v556_v38 = vld [vmem:[%s2621_s4 + $0x358] sm:$0xff]  ;;  %v2118_v41 = vcombine.low %v458_v30, %v474_v31  ;;  %v461_v30 = vld [vmem:[%s2621_s4 + $0x60] sm:$0xff] }
  0x8c   : > { %1481 = vmatprep.subr.bf16.mxu0 %v2209_v40  ;;  %v2116_v40 = vcombine.low %v457_v28, %v473_v29  ;;  %v2219_v43 = vcombine.high %v556_v38, %v572_v39  ;;  %v2157_v28 = vcombine.high %v493_v22, %v509_v23  ;;  %v477_v31 = vld [vmem:[%s2621_s4 + $0xe0] sm:$0xff] }
  0x8d   : > { %2233 = vmatmul.mubr.msk.bf16.vlgmr.msra.gmra.mxu1 %vm1223_vm0, %v2650_v44 }
  0x8e   : > { %2232 = vmatmul.mubr.msk.bf16.vlgmr.msra.gmra.mxu0 %vm1223_vm0, %v2650_v44  ;;  %1523 = vmatpush1.bf16.msra.mxu1 %v2210_v48  ;;  %v540_v48 = vld [vmem:[%s2621_s4 + $0x2d8] sm:$0xff] }
  0x8f   : > { %1482 = vmatpush1.bf16.msra.mxu0 %v2208_v47  ;;  %1524 = vmatprep.subr.bf16.mxu1 %v2179_v50  ;;  %v524_v47 = vld [vmem:[%s2621_s4 + $0x258] sm:$0xff]  ;;  %v2218_v50 = vcombine.low %v556_v38, %v572_v39  ;;  %v559_v38 = vld [vmem:[%s2621_s4 + $0x370] sm:$0xff] }
  0x90   : > { %1483 = vmatprep.subr.bf16.mxu0 %v2177_v49  ;;  %1505 = vmatprep.mubr.bf16.mxu0 %v2297_v0  ;;  %v2216_v49 = vcombine.low %v555_v36, %v571_v37  ;;  %v2187_v52 = vcombine.high %v524_v47, %v540_v48  ;;  %v2125_v36 = vcombine.high %v461_v30, %v477_v31  ;;  %v575_v39 = vld [vmem:[%s2621_s4 + $0x3f0] sm:$0xff] }
  0x91   : > { %1546 = vmatprep.mubr.bf16.mxu1 %v2297_v0 }
  0x92   : > { %1525 = vmatpush1.bf16.msra.mxu1 %v2178_v56  ;;  %v508_v56 = vld [vmem:[%s2621_s4 + $0x1d8] sm:$0xff] }
  0x93   : > { %1484 = vmatpush1.bf16.msra.mxu0 %v2176_v55  ;;  %1526 = vmatprep.subr.bf16.mxu1 %v2147_v58  ;;  %v492_v55 = vld [vmem:[%s2621_s4 + $0x158] sm:$0xff]  ;;  %v2186_v58 = vcombine.low %v524_v47, %v540_v48  ;;  %v527_v47 = vld [vmem:[%s2621_s4 + $0x270] sm:$0xff] }
  0x94   : > { %1485 = vmatprep.subr.bf16.mxu0 %v2145_v57  ;;  %v2184_v57 = vcombine.low %v523_v45, %v539_v46  ;;  %v2155_v60 = vcombine.high %v492_v55, %v508_v56  ;;  %v2225_v45 = vcombine.high %v559_v38, %v575_v39  ;;  %v543_v48 = vld [vmem:[%s2621_s4 + $0x2f0] sm:$0xff] }
  0x96   : > { %1527 = vmatpush1.bf16.msra.mxu1 %v2146_v1  ;;  %v476_v1 = vld [vmem:[%s2621_s4 + $0xd8] sm:$0xff] }
  0x97   : > { %1486 = vmatpush1.bf16.msra.mxu0 %v2144_v63  ;;  %1528 = vmatprep.subr.bf16.mxu1 %v2115_v3  ;;  %v460_v63 = vld [vmem:[%s2621_s4 + $0x58] sm:$0xff]  ;;  %v2154_v3 = vcombine.low %v492_v55, %v508_v56  ;;  %v495_v55 = vld [vmem:[%s2621_s4 + $0x170] sm:$0xff] }
  0x98   : > { %1487 = vmatprep.subr.bf16.mxu0 %v2113_v2  ;;  %v2152_v2 = vcombine.low %v491_v53, %v507_v54  ;;  %v2123_v5 = vcombine.high %v460_v63, %v476_v1  ;;  %v2193_v53 = vcombine.high %v527_v47, %v543_v48  ;;  %v511_v56 = vld [vmem:[%s2621_s4 + $0x1f0] sm:$0xff] }
  0x9a   : > { %1529 = vmatpush1.bf16.msra.mxu1 %v2114_v9  ;;  %v574_v9 = vld [vmem:[%s2621_s4 + $0x3e8] sm:$0xff] }
  0x9b   : > { %1488 = vmatpush1.bf16.msra.mxu0 %v2112_v8  ;;  %1604 = vmatprep.subr.bf16.mxu1 %v2215_v11  ;;  %v558_v8 = vld [vmem:[%s2621_s4 + $0x368] sm:$0xff]  ;;  %v2122_v11 = vcombine.low %v460_v63, %v476_v1  ;;  %v463_v63 = vld [vmem:[%s2621_s4 + $0x70] sm:$0xff] }
  0x9c   : > { %1563 = vmatprep.subr.bf16.mxu0 %v2213_v10  ;;  %v2120_v10 = vcombine.low %v459_v61, %v475_v62  ;;  %v2223_v13 = vcombine.high %v558_v8, %v574_v9  ;;  %v2161_v61 = vcombine.high %v495_v55, %v511_v56  ;;  %v479_v1 = vld [vmem:[%s2621_s4 + $0xf0] sm:$0xff] }
  0x9d   : > { %2235 = vmatmul.mubr.msk.bf16.vlgmr.msra.gmra.mxu1 %vm1223_vm0, %v2650_v44 }
  0x9e   : > { %2234 = vmatmul.mubr.msk.bf16.vlgmr.msra.gmra.mxu0 %vm1223_vm0, %v2650_v44  ;;  %1605 = vmatpush1.bf16.msra.mxu1 %v2214_v17  ;;  %v542_v17 = vld [vmem:[%s2621_s4 + $0x2e8] sm:$0xff] }
  0x9f   : > { %1564 = vmatpush1.bf16.msra.mxu0 %v2212_v16  ;;  %1606 = vmatprep.subr.bf16.mxu1 %v2183_v19  ;;  %v526_v16 = vld [vmem:[%s2621_s4 + $0x268] sm:$0xff]  ;;  %v2222_v19 = vcombine.low %v558_v8, %v574_v9  ;;  %v2128_v8 = vcombine.low %v463_v63, %v479_v1 }
  0xa0   : > { %1565 = vmatprep.subr.bf16.mxu0 %v2181_v18  ;;  %1587 = vmatprep.mubr.bf16.mxu0 %v2297_v0  ;;  %v2220_v18 = vcombine.low %v557_v6, %v573_v7  ;;  %v2191_v21 = vcombine.high %v526_v16, %v542_v17  ;;  %v2129_v6 = vcombine.high %v463_v63, %v479_v1 }
  0xa1   : > { %1628 = vmatprep.mubr.bf16.mxu1 %v2297_v0 }
  0xa2   : > { %1607 = vmatpush1.bf16.msra.mxu1 %v2182_v25  ;;  %v510_v25 = vld [vmem:[%s2621_s4 + $0x1e8] sm:$0xff] }
  0xa3   : > { %1566 = vmatpush1.bf16.msra.mxu0 %v2180_v24  ;;  %1608 = vmatprep.subr.bf16.mxu1 %v2151_v27  ;;  %v494_v24 = vld [vmem:[%s2621_s4 + $0x168] sm:$0xff]  ;;  %v2190_v27 = vcombine.low %v526_v16, %v542_v17 }
  0xa4   : > { %1567 = vmatprep.subr.bf16.mxu0 %v2149_v26  ;;  %v2188_v26 = vcombine.low %v525_v14, %v541_v15  ;;  %v2159_v29 = vcombine.high %v494_v24, %v510_v25 }
  0xa6   : > { %1609 = vmatpush1.bf16.msra.mxu1 %v2150_v33  ;;  %v478_v33 = vld [vmem:[%s2621_s4 + $0xe8] sm:$0xff] }
  0xa7   : > { %1568 = vmatpush1.bf16.msra.mxu0 %v2148_v32  ;;  %1610 = vmatprep.subr.bf16.mxu1 %v2119_v35  ;;  %v462_v32 = vld [vmem:[%s2621_s4 + $0x68] sm:$0xff]  ;;  %v2158_v35 = vcombine.low %v494_v24, %v510_v25 }
  0xa8   : > { %1569 = vmatprep.subr.bf16.mxu0 %v2117_v34  ;;  %v2156_v34 = vcombine.low %v493_v22, %v509_v23  ;;  %v2127_v37 = vcombine.high %v462_v32, %v478_v33 }
  0xaa   : > { %1611 = vmatpush1.bf16.msra.mxu1 %v2118_v41  ;;  %v576_v41 = vld [vmem:[%s2621_s4 + $0x3f8] sm:$0xff] }
  0xab   : > { %1570 = vmatpush1.bf16.msra.mxu0 %v2116_v40  ;;  %1686 = vmatprep.subr.bf16.mxu1 %v2219_v43  ;;  %v560_v40 = vld [vmem:[%s2621_s4 + $0x378] sm:$0xff]  ;;  %v2126_v43 = vcombine.low %v462_v32, %v478_v33 }
  0xac   : > { %1645 = vmatprep.subr.bf16.mxu0 %v2217_v42  ;;  %v2124_v42 = vcombine.low %v461_v30, %v477_v31  ;;  %v2227_v46 = vcombine.high %v560_v40, %v576_v41 }
  0xad   : > { %2237 = vmatmul.mubr.msk.bf16.vlgmr.msra.gmra.mxu1 %vm1223_vm0, %v2650_v44 }
  0xae   : > { %2236 = vmatmul.mubr.msk.bf16.vlgmr.msra.gmra.mxu0 %vm1223_vm0, %v2650_v44  ;;  %1687 = vmatpush1.bf16.msra.mxu1 %v2218_v50  ;;  %v544_v50 = vld [vmem:[%s2621_s4 + $0x2f8] sm:$0xff] }
  0xaf   : > { %1646 = vmatpush1.bf16.msra.mxu0 %v2216_v49  ;;  %1688 = vmatprep.subr.bf16.mxu1 %v2187_v52  ;;  %v528_v49 = vld [vmem:[%s2621_s4 + $0x278] sm:$0xff]  ;;  %v2226_v52 = vcombine.low %v560_v40, %v576_v41 }
  0xb0   : > { %1647 = vmatprep.subr.bf16.mxu0 %v2185_v51  ;;  %1669 = vmatprep.mubr.bf16.mxu0 %v2297_v0  ;;  %v2224_v51 = vcombine.low %v559_v38, %v575_v39  ;;  %v2195_v54 = vcombine.high %v528_v49, %v544_v50 }
  0xb1   : > { %1710 = vmatprep.mubr.bf16.mxu1 %v2297_v0 }
  0xb2   : > { %1689 = vmatpush1.bf16.msra.mxu1 %v2186_v58  ;;  %v512_v58 = vld [vmem:[%s2621_s4 + $0x1f8] sm:$0xff] }
  0xb3   : > { %1648 = vmatpush1.bf16.msra.mxu0 %v2184_v57  ;;  %1690 = vmatprep.subr.bf16.mxu1 %v2155_v60  ;;  %v496_v57 = vld [vmem:[%s2621_s4 + $0x178] sm:$0xff]  ;;  %v2194_v60 = vcombine.low %v528_v49, %v544_v50 }
  0xb4   : > { %1649 = vmatprep.subr.bf16.mxu0 %v2153_v59  ;;  %v2192_v59 = vcombine.low %v527_v47, %v543_v48  ;;  %v2163_v62 = vcombine.high %v496_v57, %v512_v58 }
  0xb6   : > { %1691 = vmatpush1.bf16.msra.mxu1 %v2154_v3  ;;  %v480_v3 = vld [vmem:[%s2621_s4 + $0xf8] sm:$0xff] }
  0xb7   : > { %1650 = vmatpush1.bf16.msra.mxu0 %v2152_v2  ;;  %1692 = vmatprep.subr.bf16.mxu1 %v2123_v5  ;;  %v464_v2 = vld [vmem:[%s2621_s4 + $0x78] sm:$0xff]  ;;  %v2162_v5 = vcombine.low %v496_v57, %v512_v58 }
  0xb8   : > { %1651 = vmatprep.subr.bf16.mxu0 %v2121_v4  ;;  %v2160_v4 = vcombine.low %v495_v55, %v511_v56  ;;  %v2131_v7 = vcombine.high %v464_v2, %v480_v3  ;;  %v2130_v9 = vcombine.low %v464_v2, %v480_v3 }
  0xba   : > { %1693 = vmatpush1.bf16.msra.mxu1 %v2122_v11 }
  0xbb   : > { %1652 = vmatpush1.bf16.msra.mxu0 %v2120_v10  ;;  %1768 = vmatprep.subr.bf16.mxu1 %v2223_v13 }
  0xbc   : > { %1727 = vmatprep.subr.bf16.mxu0 %v2221_v12 }
  0xbd   : > { %2239 = vmatmul.mubr.msk.bf16.vlgmr.msra.gmra.mxu1 %vm1223_vm0, %v2650_v44 }
  0xbe   : > { %2238 = vmatmul.mubr.msk.bf16.vlgmr.msra.gmra.mxu0 %vm1223_vm0, %v2650_v44  ;;  %1769 = vmatpush1.bf16.msra.mxu1 %v2222_v19 }
  0xbf   : > { %1728 = vmatpush1.bf16.msra.mxu0 %v2220_v18  ;;  %1770 = vmatprep.subr.bf16.mxu1 %v2191_v21 }
  0xc0   : > { %1729 = vmatprep.subr.bf16.mxu0 %v2189_v20  ;;  %1751 = vmatprep.mubr.bf16.mxu0 %v2297_v0 }
  0xc1   : > { %1792 = vmatprep.mubr.bf16.mxu1 %v2297_v0 }
  0xc2   : > { %1771 = vmatpush1.bf16.msra.mxu1 %v2190_v27 }
  0xc3   : > { %1730 = vmatpush1.bf16.msra.mxu0 %v2188_v26  ;;  %1772 = vmatprep.subr.bf16.mxu1 %v2159_v29 }
  0xc4   : > { %1731 = vmatprep.subr.bf16.mxu0 %v2157_v28 }
  0xc6   : > { %1773 = vmatpush1.bf16.msra.mxu1 %v2158_v35 }
  0xc7   : > { %1732 = vmatpush1.bf16.msra.mxu0 %v2156_v34  ;;  %1774 = vmatprep.subr.bf16.mxu1 %v2127_v37 }
  0xc8   : > { %1733 = vmatprep.subr.bf16.mxu0 %v2125_v36 }
  0xca   : > { %1775 = vmatpush1.bf16.msra.mxu1 %v2126_v43 }
  0xcb   : > { %1734 = vmatpush1.bf16.msra.mxu0 %v2124_v42  ;;  %1850 = vmatprep.subr.bf16.mxu1 %v2227_v46 }
  0xcc   : > { %1809 = vmatprep.subr.bf16.mxu0 %v2225_v45 }
  0xcd   : > { %2241 = vmatmul.mubr.msk.bf16.vlgmr.msra.gmra.mxu1 %vm1223_vm0, %v2650_v44 }
  0xce   : > { %2240 = vmatmul.mubr.msk.bf16.vlgmr.msra.gmra.mxu0 %vm1223_vm0, %v2650_v44  ;;  %1851 = vmatpush1.bf16.msra.mxu1 %v2226_v52 }
  0xcf   : > { %1810 = vmatpush1.bf16.msra.mxu0 %v2224_v51  ;;  %1852 = vmatprep.subr.bf16.mxu1 %v2195_v54 }
  0xd0   : > { %1811 = vmatprep.subr.bf16.mxu0 %v2193_v53  ;;  %1833 = vmatprep.mubr.bf16.mxu0 %v2297_v0 }
  0xd1   : > { %1874 = vmatprep.mubr.bf16.mxu1 %v2297_v0 }
  0xd2   : > { %1853 = vmatpush1.bf16.msra.mxu1 %v2194_v60 }
  0xd3   : > { %1812 = vmatpush1.bf16.msra.mxu0 %v2192_v59  ;;  %1854 = vmatprep.subr.bf16.mxu1 %v2163_v62 }
  0xd4   : > { %1813 = vmatprep.subr.bf16.mxu0 %v2161_v61 }
  0xd6   : > { %1855 = vmatpush1.bf16.msra.mxu1 %v2162_v5 }
  0xd7   : > { %1814 = vmatpush1.bf16.msra.mxu0 %v2160_v4  ;;  %1856 = vmatprep.subr.bf16.mxu1 %v2131_v7  ;;  %v2804_v0 = vpop.permute.xlu0 %580 }
  0xd8   : > { %1815 = vmatprep.subr.bf16.mxu0 %v2129_v6 }
  0xda   : > { %1857 = vmatpush1.bf16.msra.mxu1 %v2130_v9 }
  0xdb   : > { %1816 = vmatpush1.bf16.msra.mxu0 %v2128_v8 }
  0xdd   : > { %2243 = vmatmul.mubr.msk.bf16.vlgmr.msra.gmra.mxu1 %vm1223_vm0, %v2650_v44 }
  0xde   : > { %2242 = vmatmul.mubr.msk.bf16.vlgmr.msra.gmra.mxu0 %vm1223_vm0, %v2650_v44 }
 0x12d   : > { %v1302_v12 = vpop.f32.mrf.mxu1 }
 0x12e   : > { %v1261_v10 = vpop.f32.mrf.mxu0  ;;  %v1303_v13 = vadd.f32 %v1302_v12, %v2804_v0 }
 0x12f   : > { %v1262_v11 = vadd.f32 %v1261_v10, %v2804_v0  ;;  %v1304_v17 = vpop.f32.mrf.mxu1 }
 0x130   : > { %v1263_v14 = vpop.f32.mrf.mxu0  ;;  %v1885_v18 = vmul.f32 0.1, %v1303_v13  ;;  %v1305_v44 = vadd.f32 %v1304_v17, %v2804_v0 }
 0x131   : > { %v1883_v15 = vmul.f32 0.1, %v1262_v11  ;;  %v1264_v16 = vadd.f32 %v1263_v14, %v2804_v0  ;;  %v1306_v21 = vpop.f32.mrf.mxu1 }
 0x132   : > { %v1265_v19 = vpop.f32.mrf.mxu0  ;;  %v1886_v22 = vmul.f32 0.1, %v1305_v44  ;;  %v1917_v27 = vmax.f32 %v1303_v13, %v1885_v18 }
 0x133   : > { %v1884_v20 = vmul.f32 0.1, %v1264_v16  ;;  %v1915_v24 = vmax.f32 %v1262_v11, %v1883_v15  ;;  %v1307_v26 = vpop.f32.mrf.mxu1 }
 0x134   : > { %v1266_v23 = vpop.f32.mrf.mxu0  ;;  %v1918_v28 = vmax.f32 %v1305_v44, %v1886_v22 }
 0x135   : > { %v1916_v25 = vmax.f32 %v1264_v16, %v1884_v20 }
 0x136   : > { %v1980_v30 = vcombine.low %v1917_v27, %v1918_v28 }
 0x137   : > { %v1979_v29 = vcombine.low %v1915_v24, %v1916_v25 }
 0x138   : > { %2012 = vst [vmem:[%s2813_s11 + $0x8] sm:$0xff] %v1980_v30 }
 0x139   : > { %2011 = vst [vmem:[%s2813_s11] sm:$0xff] %v1979_v29 }
 0x13d   : > { %v1384_v33 = vpop.f32.mrf.mxu1 }
 0x13e   : > { %v1343_v31 = vpop.f32.mrf.mxu0  ;;  %v1385_v34 = vadd.f32 %v1384_v33, %v2804_v0 }
 0x13f   : > { %v1344_v32 = vadd.f32 %v1343_v31, %v2804_v0  ;;  %v1386_v38 = vpop.f32.mrf.mxu1 }
 0x140   : > { %v1345_v35 = vpop.f32.mrf.mxu0  ;;  %v1889_v39 = vmul.f32 0.1, %v1385_v34  ;;  %v1387_v40 = vadd.f32 %v1386_v38, %v2804_v0 }
 0x141   : > { %v1887_v36 = vmul.f32 0.1, %v1344_v32  ;;  %v1346_v37 = vadd.f32 %v1345_v35, %v2804_v0  ;;  %v1388_v43 = vpop.f32.mrf.mxu1 }
 0x142   : > { %v1347_v41 = vpop.f32.mrf.mxu0  ;;  %v1890_v45 = vmul.f32 0.1, %v1387_v40  ;;  %v1921_v50 = vmax.f32 %v1385_v34, %v1889_v39 }
 0x143   : > { %v1888_v42 = vmul.f32 0.1, %v1346_v37  ;;  %v1919_v47 = vmax.f32 %v1344_v32, %v1887_v36  ;;  %v1389_v49 = vpop.f32.mrf.mxu1 }
 0x144   : > { %v1348_v46 = vpop.f32.mrf.mxu0  ;;  %v1922_v51 = vmax.f32 %v1387_v40, %v1890_v45 }
 0x145   : > { %v1920_v48 = vmax.f32 %v1346_v37, %v1888_v42 }
 0x146   : > { %v1982_v53 = vcombine.low %v1921_v50, %v1922_v51 }
 0x147   : > { %v1981_v52 = vcombine.low %v1919_v47, %v1920_v48 }
 0x148   : > { %2014 = vst [vmem:[%s2813_s11 + $0x18] sm:$0xff] %v1982_v53 }
 0x149   : > { %2013 = vst [vmem:[%s2813_s11 + $0x10] sm:$0xff] %v1981_v52 }
 0x14d   : > { %v1466_v56 = vpop.f32.mrf.mxu1 }
 0x14e   : > { %v1425_v54 = vpop.f32.mrf.mxu0  ;;  %v1467_v57 = vadd.f32 %v1466_v56, %v2804_v0 }
 0x14f   : > { %v1426_v55 = vadd.f32 %v1425_v54, %v2804_v0  ;;  %v1468_v61 = vpop.f32.mrf.mxu1 }
 0x150   : > { %v1427_v58 = vpop.f32.mrf.mxu0  ;;  %v1893_v62 = vmul.f32 0.1, %v1467_v57  ;;  %v1469_v63 = vadd.f32 %v1468_v61, %v2804_v0 }
 0x151   : > { %v1891_v59 = vmul.f32 0.1, %v1426_v55  ;;  %v1428_v60 = vadd.f32 %v1427_v58, %v2804_v0  ;;  %v1470_v3 = vpop.f32.mrf.mxu1 }
 0x152   : > { %v1429_v1 = vpop.f32.mrf.mxu0  ;;  %v1894_v4 = vmul.f32 0.1, %v1469_v63  ;;  %v1925_v9 = vmax.f32 %v1467_v57, %v1893_v62 }
 0x153   : > { %v1892_v2 = vmul.f32 0.1, %v1428_v60  ;;  %v1923_v6 = vmax.f32 %v1426_v55, %v1891_v59  ;;  %v1471_v8 = vpop.f32.mrf.mxu1 }
 0x154   : > { %v1430_v5 = vpop.f32.mrf.mxu0  ;;  %v1926_v10 = vmax.f32 %v1469_v63, %v1894_v4 }
 0x155   : > { %v1924_v7 = vmax.f32 %v1428_v60, %v1892_v2 }
 0x156   : > { %v1984_v12 = vcombine.low %v1925_v9, %v1926_v10 }
 0x157   : > { %v1983_v11 = vcombine.low %v1923_v6, %v1924_v7 }
 0x158   : > { %2016 = vst [vmem:[%s2813_s11 + $0x28] sm:$0xff] %v1984_v12 }
 0x159   : > { %2015 = vst [vmem:[%s2813_s11 + $0x20] sm:$0xff] %v1983_v11 }
 0x15d   : > { %v1548_v15 = vpop.f32.mrf.mxu1 }
 0x15e   : > { %v1507_v13 = vpop.f32.mrf.mxu0  ;;  %v1549_v16 = vadd.f32 %v1548_v15, %v2804_v0 }
 0x15f   : > { %v1508_v14 = vadd.f32 %v1507_v13, %v2804_v0  ;;  %v1550_v19 = vpop.f32.mrf.mxu1 }
 0x160   : > { %v1509_v17 = vpop.f32.mrf.mxu0  ;;  %v1897_v20 = vmul.f32 0.1, %v1549_v16  ;;  %v1551_v21 = vadd.f32 %v1550_v19, %v2804_v0 }
 0x161   : > { %v1895_v18 = vmul.f32 0.1, %v1508_v14  ;;  %v1510_v44 = vadd.f32 %v1509_v17, %v2804_v0  ;;  %v1552_v24 = vpop.f32.mrf.mxu1 }
 0x162   : > { %v1511_v22 = vpop.f32.mrf.mxu0  ;;  %v1898_v25 = vmul.f32 0.1, %v1551_v21  ;;  %v1929_v30 = vmax.f32 %v1549_v16, %v1897_v20 }
 0x163   : > { %v1896_v23 = vmul.f32 0.1, %v1510_v44  ;;  %v1927_v27 = vmax.f32 %v1508_v14, %v1895_v18  ;;  %v1553_v29 = vpop.f32.mrf.mxu1 }
 0x164   : > { %v1512_v26 = vpop.f32.mrf.mxu0  ;;  %v1930_v31 = vmax.f32 %v1551_v21, %v1898_v25 }
 0x165   : > { %v1928_v28 = vmax.f32 %v1510_v44, %v1896_v23 }
 0x166   : > { %v1986_v33 = vcombine.low %v1929_v30, %v1930_v31 }
 0x167   : > { %v1985_v32 = vcombine.low %v1927_v27, %v1928_v28 }
 0x168   : > { %2018 = vst [vmem:[%s2813_s11 + $0x38] sm:$0xff] %v1986_v33 }
 0x169   : > { %2017 = vst [vmem:[%s2813_s11 + $0x30] sm:$0xff] %v1985_v32 }
 0x16d   : > { %v1630_v36 = vpop.f32.mrf.mxu1 }
 0x16e   : > { %v1589_v34 = vpop.f32.mrf.mxu0  ;;  %v1631_v37 = vadd.f32 %v1630_v36, %v2804_v0 }
 0x16f   : > { %v1590_v35 = vadd.f32 %v1589_v34, %v2804_v0  ;;  %v1632_v41 = vpop.f32.mrf.mxu1 }
 0x170   : > { %v1591_v38 = vpop.f32.mrf.mxu0  ;;  %v1901_v42 = vmul.f32 0.1, %v1631_v37  ;;  %v1633_v43 = vadd.f32 %v1632_v41, %v2804_v0 }
 0x171   : > { %v1899_v39 = vmul.f32 0.1, %v1590_v35  ;;  %v1592_v40 = vadd.f32 %v1591_v38, %v2804_v0  ;;  %v1634_v47 = vpop.f32.mrf.mxu1 }
 0x172   : > { %v1593_v45 = vpop.f32.mrf.mxu0  ;;  %v1902_v48 = vmul.f32 0.1, %v1633_v43  ;;  %v1933_v53 = vmax.f32 %v1631_v37, %v1901_v42 }
 0x173   : > { %v1900_v46 = vmul.f32 0.1, %v1592_v40  ;;  %v1931_v50 = vmax.f32 %v1590_v35, %v1899_v39  ;;  %v1635_v52 = vpop.f32.mrf.mxu1 }
 0x174   : > { %v1594_v49 = vpop.f32.mrf.mxu0  ;;  %v1934_v54 = vmax.f32 %v1633_v43, %v1902_v48 }
 0x175   : > { %v1932_v51 = vmax.f32 %v1592_v40, %v1900_v46 }
 0x176   : > { %v1988_v56 = vcombine.low %v1933_v53, %v1934_v54 }
 0x177   : > { %v1987_v55 = vcombine.low %v1931_v50, %v1932_v51 }
 0x178   : > { %2020 = vst [vmem:[%s2813_s11 + $0x48] sm:$0xff] %v1988_v56 }
 0x179   : > { %2019 = vst [vmem:[%s2813_s11 + $0x40] sm:$0xff] %v1987_v55 }
 0x17d   : > { %v1712_v59 = vpop.f32.mrf.mxu1 }
 0x17e   : > { %v1671_v57 = vpop.f32.mrf.mxu0  ;;  %v1713_v60 = vadd.f32 %v1712_v59, %v2804_v0 }
 0x17f   : > { %v1672_v58 = vadd.f32 %v1671_v57, %v2804_v0  ;;  %v1714_v1 = vpop.f32.mrf.mxu1 }
 0x180   : > { %v1673_v61 = vpop.f32.mrf.mxu0  ;;  %v1905_v2 = vmul.f32 0.1, %v1713_v60  ;;  %v1715_v3 = vadd.f32 %v1714_v1, %v2804_v0 }
 0x181   : > { %v1903_v62 = vmul.f32 0.1, %v1672_v58  ;;  %v1674_v63 = vadd.f32 %v1673_v61, %v2804_v0  ;;  %v1716_v6 = vpop.f32.mrf.mxu1 }
 0x182   : > { %v1675_v4 = vpop.f32.mrf.mxu0  ;;  %v1906_v7 = vmul.f32 0.1, %v1715_v3  ;;  %v1937_v12 = vmax.f32 %v1713_v60, %v1905_v2 }
 0x183   : > { %v1904_v5 = vmul.f32 0.1, %v1674_v63  ;;  %v1935_v9 = vmax.f32 %v1672_v58, %v1903_v62  ;;  %v1717_v11 = vpop.f32.mrf.mxu1 }
 0x184   : > { %v1676_v8 = vpop.f32.mrf.mxu0  ;;  %v1938_v13 = vmax.f32 %v1715_v3, %v1906_v7 }
 0x185   : > { %v1936_v10 = vmax.f32 %v1674_v63, %v1904_v5 }
 0x186   : > { %v1990_v15 = vcombine.low %v1937_v12, %v1938_v13 }
 0x187   : > { %v1989_v14 = vcombine.low %v1935_v9, %v1936_v10 }
 0x188   : > { %2022 = vst [vmem:[%s2813_s11 + $0x58] sm:$0xff] %v1990_v15 }
 0x189   : > { %2021 = vst [vmem:[%s2813_s11 + $0x50] sm:$0xff] %v1989_v14 }
 0x18d   : > { %v1794_v18 = vpop.f32.mrf.mxu1 }
 0x18e   : > { %v1753_v16 = vpop.f32.mrf.mxu0  ;;  %v1795_v44 = vadd.f32 %v1794_v18, %v2804_v0 }
 0x18f   : > { %v1754_v17 = vadd.f32 %v1753_v16, %v2804_v0  ;;  %v1796_v22 = vpop.f32.mrf.mxu1 }
 0x190   : > { %v1755_v19 = vpop.f32.mrf.mxu0  ;;  %v1909_v23 = vmul.f32 0.1, %v1795_v44  ;;  %v1797_v24 = vadd.f32 %v1796_v22, %v2804_v0 }
 0x191   : > { %v1907_v20 = vmul.f32 0.1, %v1754_v17  ;;  %v1756_v21 = vadd.f32 %v1755_v19, %v2804_v0  ;;  %v1798_v27 = vpop.f32.mrf.mxu1 }
 0x192   : > { %v1757_v25 = vpop.f32.mrf.mxu0  ;;  %v1910_v28 = vmul.f32 0.1, %v1797_v24  ;;  %v1941_v33 = vmax.f32 %v1795_v44, %v1909_v23 }
 0x193   : > { %v1908_v26 = vmul.f32 0.1, %v1756_v21  ;;  %v1939_v30 = vmax.f32 %v1754_v17, %v1907_v20  ;;  %v1799_v32 = vpop.f32.mrf.mxu1 }
 0x194   : > { %v1758_v29 = vpop.f32.mrf.mxu0  ;;  %v1942_v34 = vmax.f32 %v1797_v24, %v1910_v28 }
 0x195   : > { %v1940_v31 = vmax.f32 %v1756_v21, %v1908_v26 }
 0x196   : > { %v1992_v36 = vcombine.low %v1941_v33, %v1942_v34 }
 0x197   : > { %v1991_v35 = vcombine.low %v1939_v30, %v1940_v31 }
 0x198   : > { %2024 = vst [vmem:[%s2813_s11 + $0x68] sm:$0xff] %v1992_v36 }
 0x199   : > { %2023 = vst [vmem:[%s2813_s11 + $0x60] sm:$0xff] %v1991_v35 }
 0x19d   : > { %v1876_v39 = vpop.f32.mrf.mxu1 }
 0x19e   : > { %v1835_v37 = vpop.f32.mrf.mxu0  ;;  %v1877_v40 = vadd.f32 %v1876_v39, %v2804_v0 }
 0x19f   : > { %v1836_v38 = vadd.f32 %v1835_v37, %v2804_v0  ;;  %v1878_v45 = vpop.f32.mrf.mxu1 }
 0x1a0   : > { %v1837_v41 = vpop.f32.mrf.mxu0  ;;  %v1913_v46 = vmul.f32 0.1, %v1877_v40  ;;  %v1879_v47 = vadd.f32 %v1878_v45, %v2804_v0 }
 0x1a1   : > { %v1911_v42 = vmul.f32 0.1, %v1836_v38  ;;  %v1838_v43 = vadd.f32 %v1837_v41, %v2804_v0  ;;  %v1880_v50 = vpop.f32.mrf.mxu1 }
 0x1a2   : > { %v1839_v48 = vpop.f32.mrf.mxu0  ;;  %v1914_v51 = vmul.f32 0.1, %v1879_v47  ;;  %v1945_v56 = vmax.f32 %v1877_v40, %v1913_v46 }
 0x1a3   : > { %v1912_v49 = vmul.f32 0.1, %v1838_v43  ;;  %v1943_v53 = vmax.f32 %v1836_v38, %v1911_v42  ;;  %v1881_v55 = vpop.f32.mrf.mxu1 }
 0x1a4   : > { %v1840_v52 = vpop.f32.mrf.mxu0  ;;  %v1946_v57 = vmax.f32 %v1879_v47, %v1914_v51 }
 0x1a5   : > { %v1944_v54 = vmax.f32 %v1838_v43, %v1912_v49 }
 0x1a6   : > { %v1994_v59 = vcombine.low %v1945_v56, %v1946_v57 }
 0x1a7   : > { %v1993_v58 = vcombine.low %v1943_v53, %v1944_v54 }
 0x1a8   : > { %2026 = vst [vmem:[%s2813_s11 + $0x78] sm:$0xff] %v1994_v59 }
 0x1a9   : > { %2025 = vst [vmem:[%s2813_s11 + $0x70] sm:$0xff] %v1993_v58 }
 0x1aa PF: > { %p10_p9 = scmp.ge.s32.totalorder %s2335_s16, 4   ;;  %s2873_s12 = smov %s2291_s13 }
 0x1ab   : > { %s2874_s13 = smov %s2344_s19  ;;  %s2875_s14 = smov %s2335_s16 }
 0x1ac   :  { %12 = sbr.rel (!%p10_p9) target bundleno = 2 (0x2), region = 90 }

// kernel: encoder_forward.5
= control target key start
LH: loop header
LB: loop body
LE: loop exit
PB: predicated region body
PF: predicated region fallthrough
CT: control target
= control target key end

     0   :  { %s1122_s12 = smov 0   ;;  %s1124_s13 = smov 0   ;;  %s1384_s0 = inlined_call_operand.vmem [shape: bf16[8,256], index: 0, kind: input, shape index: {}]   ;;  %s1385_s1 = inlined_call_operand.vmem [shape: bf16[256,1024], index: 1, kind: input, shape index: {}]   ;;  %s1386_s2 = inlined_call_operand.vmem [shape: f32[8,1], index: 2, kind: input, shape index: {}]   ;;  %s1387_s3 = inlined_call_operand.vmem [shape: f32[8,1024], index: 3, kind: output, shape index: {}]  }
   0x1   :  { %s1126_s14 = smov 0  }
   0x2 LB: > { %s873_s15 = sadd.s32 4294967295, %s1099_s14   ;;  %s1139_s16 = sadd.s32 1, %s1099_s14   ;;  %s1099_s14 = sphi %s1126_s14, %s1390_s14   ;;  %s1095_s13 = sphi %s1124_s13, %s1389_s13   ;;  %s1091_s12 = sphi %s1122_s12, %s1388_s12  }
   0x3   : > { %s38_s17 = ssub.s32 %s1099_s14, %s1139_s16  ;;  %s41_s18 = sadd.s32 1, %s1095_s13 }
   0x4   : > { %p39_p0 = scmp.eq.s32.totalorder %s38_s17, 0  ;;  %p48_p1 = scmp.ne.s32.totalorder %s1095_s13, %s1091_s12 }
   0x5   : > { %p49_p2 = scmp.eq.s32.totalorder %s1099_s14, 0  ;;  %p876_p4 = scmp.ge.s32.totalorder %s1099_s14, 2 }
   0x6   : > { %s1148_s19 = scalar_select %p39_p0, %s1095_s13, %s41_s18  }
   0x7   : > { %p50_p3 = por %p49_p2, %p48_p1  ;;  %127 = sbr.rel (%p876_p4) target bundleno = 48 (0x30), region = 24 }
   0xc   : > { %130 = sbr.rel (!%p50_p3) target bundleno = 48 (0x30), region = 28  ;;  %s132_s20 = sand.u32 (%p50_p3), 1, %s1095_s13  }
   0xd   : > { %s952_s21 = sshll.u32 (%p50_p3), %s1099_s14, 4  ;;  %s877_s22 = sshll.u32 (%p50_p3), %s132_s20, 9 }
   0xe   : > { %s1156_s25 = scalar_lea.vmem (%p50_p3), %s1385_s1, %s952_s21  ;;  %s1161_s26 = scalar_lea.vmem (%p50_p3), [#allocation2], %s877_s22 }
   0xf   : > { %v150_v0 = vld [vmem:[%s1156_s25] sm:$0xff] (%p50_p3)  ;;  %v152_v1 = vld [vmem:[%s1156_s25 + $0x8] sm:$0xff] (%p50_p3) }
  0x10   : > { %v154_v2 = vld [vmem:[%s1156_s25 + $0x20] sm:$0xff] (%p50_p3)  ;;  %151 = vst [vmem:[%s1161_s26] sm:$0xff] (%p50_p3), %v150_v0  ;;  %153 = vst [vmem:[%s1161_s26 + $0x8] sm:$0xff] (%p50_p3), %v152_v1  ;;  %v156_v3 = vld [vmem:[%s1156_s25 + $0x28] sm:$0xff] (%p50_p3) }
  0x11   : > { %155 = vst [vmem:[%s1161_s26 + $0x10] sm:$0xff] %v154_v2  ;;  %v158_v4 = vld [vmem:[%s1156_s25 + $0x40] sm:$0xff]  ;;  %v160_v5 = vld [vmem:[%s1156_s25 + $0x48] sm:$0xff]  ;;  %157 = vst [vmem:[%s1161_s26 + $0x18] sm:$0xff] %v156_v3 }
  0x12   : > { %159 = vst [vmem:[%s1161_s26 + $0x20] sm:$0xff] %v158_v4  ;;  %161 = vst [vmem:[%s1161_s26 + $0x28] sm:$0xff] %v160_v5  ;;  %v162_v6 = vld [vmem:[%s1156_s25 + $0x60] sm:$0xff]  ;;  %v164_v7 = vld [vmem:[%s1156_s25 + $0x68] sm:$0xff] }
  0x13   : > { %v166_v8 = vld [vmem:[%s1156_s25 + $0x80] sm:$0xff]  ;;  %163 = vst [vmem:[%s1161_s26 + $0x30] sm:$0xff] %v162_v6  ;;  %165 = vst [vmem:[%s1161_s26 + $0x38] sm:$0xff] %v164_v7  ;;  %v168_v9 = vld [vmem:[%s1156_s25 + $0x88] sm:$0xff] }
  0x14   : > { %167 = vst [vmem:[%s1161_s26 + $0x40] sm:$0xff] %v166_v8  ;;  %v170_v10 = vld [vmem:[%s1156_s25 + $0xa0] sm:$0xff]  ;;  %v172_v11 = vld [vmem:[%s1156_s25 + $0xa8] sm:$0xff]  ;;  %169 = vst [vmem:[%s1161_s26 + $0x48] sm:$0xff] %v168_v9 }
  0x15   : > { %171 = vst [vmem:[%s1161_s26 + $0x50] sm:$0xff] %v170_v10  ;;  %173 = vst [vmem:[%s1161_s26 + $0x58] sm:$0xff] %v172_v11  ;;  %v174_v12 = vld [vmem:[%s1156_s25 + $0xc0] sm:$0xff]  ;;  %v176_v13 = vld [vmem:[%s1156_s25 + $0xc8] sm:$0xff] }
  0x16   : > { %v178_v14 = vld [vmem:[%s1156_s25 + $0xe0] sm:$0xff]  ;;  %175 = vst [vmem:[%s1161_s26 + $0x60] sm:$0xff] %v174_v12  ;;  %177 = vst [vmem:[%s1161_s26 + $0x68] sm:$0xff] %v176_v13  ;;  %v180_v15 = vld [vmem:[%s1156_s25 + $0xe8] sm:$0xff] }
  0x17   : > { %179 = vst [vmem:[%s1161_s26 + $0x70] sm:$0xff] %v178_v14  ;;  %v182_v16 = vld [vmem:[%s1156_s25 + $0x100] sm:$0xff]  ;;  %v184_v17 = vld [vmem:[%s1156_s25 + $0x108] sm:$0xff]  ;;  %181 = vst [vmem:[%s1161_s26 + $0x78] sm:$0xff] %v180_v15 }
  0x18   : > { %183 = vst [vmem:[%s1161_s26 + $0x80] sm:$0xff] %v182_v16  ;;  %185 = vst [vmem:[%s1161_s26 + $0x88] sm:$0xff] %v184_v17  ;;  %v186_v18 = vld [vmem:[%s1156_s25 + $0x120] sm:$0xff]  ;;  %v188_v19 = vld [vmem:[%s1156_s25 + $0x128] sm:$0xff] }
  0x19   : > { %v190_v20 = vld [vmem:[%s1156_s25 + $0x140] sm:$0xff]  ;;  %187 = vst [vmem:[%s1161_s26 + $0x90] sm:$0xff] %v186_v18  ;;  %189 = vst [vmem:[%s1161_s26 + $0x98] sm:$0xff] %v188_v19  ;;  %v192_v21 = vld [vmem:[%s1156_s25 + $0x148] sm:$0xff] }
  0x1a   : > { %191 = vst [vmem:[%s1161_s26 + $0xa0] sm:$0xff] %v190_v20  ;;  %v194_v22 = vld [vmem:[%s1156_s25 + $0x160] sm:$0xff]  ;;  %v196_v23 = vld [vmem:[%s1156_s25 + $0x168] sm:$0xff]  ;;  %193 = vst [vmem:[%s1161_s26 + $0xa8] sm:$0xff] %v192_v21 }
  0x1b   : > { %195 = vst [vmem:[%s1161_s26 + $0xb0] sm:$0xff] %v194_v22  ;;  %197 = vst [vmem:[%s1161_s26 + $0xb8] sm:$0xff] %v196_v23  ;;  %v198_v24 = vld [vmem:[%s1156_s25 + $0x180] sm:$0xff]  ;;  %v200_v25 = vld [vmem:[%s1156_s25 + $0x188] sm:$0xff] }
  0x1c   : > { %v202_v26 = vld [vmem:[%s1156_s25 + $0x1a0] sm:$0xff]  ;;  %199 = vst [vmem:[%s1161_s26 + $0xc0] sm:$0xff] %v198_v24  ;;  %201 = vst [vmem:[%s1161_s26 + $0xc8] sm:$0xff] %v200_v25  ;;  %v204_v27 = vld [vmem:[%s1156_s25 + $0x1a8] sm:$0xff] }
  0x1d   : > { %203 = vst [vmem:[%s1161_s26 + $0xd0] sm:$0xff] %v202_v26  ;;  %v206_v28 = vld [vmem:[%s1156_s25 + $0x1c0] sm:$0xff]  ;;  %v208_v29 = vld [vmem:[%s1156_s25 + $0x1c8] sm:$0xff]  ;;  %205 = vst [vmem:[%s1161_s26 + $0xd8] sm:$0xff] %v204_v27 }
  0x1e   : > { %207 = vst [vmem:[%s1161_s26 + $0xe0] sm:$0xff] %v206_v28  ;;  %209 = vst [vmem:[%s1161_s26 + $0xe8] sm:$0xff] %v208_v29  ;;  %v210_v30 = vld [vmem:[%s1156_s25 + $0x1e0] sm:$0xff]  ;;  %v212_v31 = vld [vmem:[%s1156_s25 + $0x1e8] sm:$0xff] }
  0x1f   : > { %v214_v32 = vld [vmem:[%s1156_s25 + $0x200] sm:$0xff]  ;;  %211 = vst [vmem:[%s1161_s26 + $0xf0] sm:$0xff] %v210_v30  ;;  %213 = vst [vmem:[%s1161_s26 + $0xf8] sm:$0xff] %v212_v31  ;;  %v216_v33 = vld [vmem:[%s1156_s25 + $0x208] sm:$0xff] }
  0x20   : > { %215 = vst [vmem:[%s1161_s26 + $0x100] sm:$0xff] %v214_v32  ;;  %v218_v34 = vld [vmem:[%s1156_s25 + $0x220] sm:$0xff]  ;;  %v220_v35 = vld [vmem:[%s1156_s25 + $0x228] sm:$0xff]  ;;  %217 = vst [vmem:[%s1161_s26 + $0x108] sm:$0xff] %v216_v33 }
  0x21   : > { %219 = vst [vmem:[%s1161_s26 + $0x110] sm:$0xff] %v218_v34  ;;  %221 = vst [vmem:[%s1161_s26 + $0x118] sm:$0xff] %v220_v35  ;;  %v222_v36 = vld [vmem:[%s1156_s25 + $0x240] sm:$0xff]  ;;  %v224_v37 = vld [vmem:[%s1156_s25 + $0x248] sm:$0xff] }
  0x22   : > { %v226_v38 = vld [vmem:[%s1156_s25 + $0x260] sm:$0xff]  ;;  %223 = vst [vmem:[%s1161_s26 + $0x120] sm:$0xff] %v222_v36  ;;  %225 = vst [vmem:[%s1161_s26 + $0x128] sm:$0xff] %v224_v37  ;;  %v228_v39 = vld [vmem:[%s1156_s25 + $0x268] sm:$0xff] }
  0x23   : > { %227 = vst [vmem:[%s1161_s26 + $0x130] sm:$0xff] %v226_v38  ;;  %v230_v40 = vld [vmem:[%s1156_s25 + $0x280] sm:$0xff]  ;;  %v232_v41 = vld [vmem:[%s1156_s25 + $0x288] sm:$0xff]  ;;  %229 = vst [vmem:[%s1161_s26 + $0x138] sm:$0xff] %v228_v39 }
  0x24   : > { %231 = vst [vmem:[%s1161_s26 + $0x140] sm:$0xff] %v230_v40  ;;  %233 = vst [vmem:[%s1161_s26 + $0x148] sm:$0xff] %v232_v41  ;;  %v234_v42 = vld [vmem:[%s1156_s25 + $0x2a0] sm:$0xff]  ;;  %v236_v43 = vld [vmem:[%s1156_s25 + $0x2a8] sm:$0xff] }
  0x25   : > { %v238_v44 = vld [vmem:[%s1156_s25 + $0x2c0] sm:$0xff]  ;;  %235 = vst [vmem:[%s1161_s26 + $0x150] sm:$0xff] %v234_v42  ;;  %237 = vst [vmem:[%s1161_s26 + $0x158] sm:$0xff] %v236_v43  ;;  %v240_v45 = vld [vmem:[%s1156_s25 + $0x2c8] sm:$0xff] }
  0x26   : > { %239 = vst [vmem:[%s1161_s26 + $0x160] sm:$0xff] %v238_v44  ;;  %v242_v46 = vld [vmem:[%s1156_s25 + $0x2e0] sm:$0xff]  ;;  %v244_v47 = vld [vmem:[%s1156_s25 + $0x2e8] sm:$0xff]  ;;  %241 = vst [vmem:[%s1161_s26 + $0x168] sm:$0xff] %v240_v45 }
  0x27   : > { %243 = vst [vmem:[%s1161_s26 + $0x170] sm:$0xff] %v242_v46  ;;  %245 = vst [vmem:[%s1161_s26 + $0x178] sm:$0xff] %v244_v47  ;;  %v246_v48 = vld [vmem:[%s1156_s25 + $0x300] sm:$0xff]  ;;  %v248_v49 = vld [vmem:[%s1156_s25 + $0x308] sm:$0xff] }
  0x28   : > { %v250_v50 = vld [vmem:[%s1156_s25 + $0x320] sm:$0xff]  ;;  %247 = vst [vmem:[%s1161_s26 + $0x180] sm:$0xff] %v246_v48  ;;  %249 = vst [vmem:[%s1161_s26 + $0x188] sm:$0xff] %v248_v49  ;;  %v252_v51 = vld [vmem:[%s1156_s25 + $0x328] sm:$0xff] }
  0x29   : > { %251 = vst [vmem:[%s1161_s26 + $0x190] sm:$0xff] %v250_v50  ;;  %v254_v52 = vld [vmem:[%s1156_s25 + $0x340] sm:$0xff]  ;;  %v256_v53 = vld [vmem:[%s1156_s25 + $0x348] sm:$0xff]  ;;  %253 = vst [vmem:[%s1161_s26 + $0x198] sm:$0xff] %v252_v51 }
  0x2a   : > { %255 = vst [vmem:[%s1161_s26 + $0x1a0] sm:$0xff] %v254_v52  ;;  %257 = vst [vmem:[%s1161_s26 + $0x1a8] sm:$0xff] %v256_v53  ;;  %v258_v54 = vld [vmem:[%s1156_s25 + $0x360] sm:$0xff]  ;;  %v260_v55 = vld [vmem:[%s1156_s25 + $0x368] sm:$0xff] }
  0x2b   : > { %v262_v56 = vld [vmem:[%s1156_s25 + $0x380] sm:$0xff]  ;;  %259 = vst [vmem:[%s1161_s26 + $0x1b0] sm:$0xff] %v258_v54  ;;  %261 = vst [vmem:[%s1161_s26 + $0x1b8] sm:$0xff] %v260_v55  ;;  %v264_v57 = vld [vmem:[%s1156_s25 + $0x388] sm:$0xff] }
  0x2c   : > { %263 = vst [vmem:[%s1161_s26 + $0x1c0] sm:$0xff] %v262_v56  ;;  %v266_v58 = vld [vmem:[%s1156_s25 + $0x3a0] sm:$0xff]  ;;  %v268_v59 = vld [vmem:[%s1156_s25 + $0x3a8] sm:$0xff]  ;;  %265 = vst [vmem:[%s1161_s26 + $0x1c8] sm:$0xff] %v264_v57 }
  0x2d   : > { %267 = vst [vmem:[%s1161_s26 + $0x1d0] sm:$0xff] %v266_v58  ;;  %269 = vst [vmem:[%s1161_s26 + $0x1d8] sm:$0xff] %v268_v59  ;;  %v270_v60 = vld [vmem:[%s1156_s25 + $0x3c0] sm:$0xff]  ;;  %v272_v61 = vld [vmem:[%s1156_s25 + $0x3c8] sm:$0xff] }
  0x2e   : > { %v274_v62 = vld [vmem:[%s1156_s25 + $0x3e0] sm:$0xff]  ;;  %271 = vst [vmem:[%s1161_s26 + $0x1e0] sm:$0xff] %v270_v60  ;;  %273 = vst [vmem:[%s1161_s26 + $0x1e8] sm:$0xff] %v272_v61  ;;  %v276_v63 = vld [vmem:[%s1156_s25 + $0x3e8] sm:$0xff] }
  0x2f   : > { %275 = vst [vmem:[%s1161_s26 + $0x1f0] sm:$0xff] %v274_v62  ;;  %277 = vst [vmem:[%s1161_s26 + $0x1f8] sm:$0xff] %v276_v63 }
  0x30 PF: > { %p880_p5 = scmp.ge.s32.totalorder %s1099_s14, 1  ;;  %p282_p6 = scmp.lt.s32.totalorder %s1099_s14, 3 }
  0x32   : > { %p283_p7 = pnand %p880_p5, %p282_p6 }
  0x33   : > { %s289_s27 = sand.u32 (!%p283_p7), 1, %s1091_s12   ;;  %s882_s7 = sshll.u32 (!%p283_p7), %s873_s15, 2 }
  0x34   : > { %286 = sbr.rel (%p283_p7) target bundleno = 327 (0x147), region = 51  ;;  %s881_s5 = sshll.u32 (!%p283_p7), %s289_s27, 9 }
  0x35   : > { %s1301_s6 = scalar_lea.vmem (!%p283_p7), [#allocation2], %s881_s5  ;;  %p314_p8 = scmp.lt.s32.totalorder (!%p283_p7), %s882_s7, 7 }
  0x39   : > { %v1294_v0 = vld [vmem:[%s1384_s0] sm:$0xff]  ;;  %v1101_v3 = vmov 0   ;;  %v981_v5 = vld [vmem:[%s1301_s6 + $0xec] ss:$16 sps:$4 sm:$0xff]   ;;  %v984_v7 = vld [vmem:[%s1301_s6 + $0xe8] ss:$16 sps:$4 sm:$0xff]  }
  0x3a   : > { %v384_v1 = vld [vmem:[%s1386_s2] sm:$0xff]  ;;  %v885_v2 = vcombine.high %v1294_v0, %v1294_v0  ;;  %978 = vset.pattern.permute.xlu0 %v1101_v3  ;;  %758 = vmatprep.subr.bf16.mxu1 %v981_v5  ;;  %v987_v9 = vld [vmem:[%s1301_s6 + $0xcc] ss:$16 sps:$4 sm:$0xff]   ;;  %v990_v11 = vld [vmem:[%s1301_s6 + $0xc8] ss:$16 sps:$4 sm:$0xff]   ;;  %v884_v5 = vcombine.low %v1294_v0, %v1294_v0  ;;  %s1392_s7 = smov (!%p314_p8, %s882_s7), 7 }
  0x3b   : > { %387 = vperm.xlu0 %978, %v384_v1   ;;  %v979_v4 = vld [vmem:[%s1301_s6 + $0xe4] ss:$16 sps:$4 sm:$0xff]   ;;  %v983_v6 = vld [vmem:[%s1301_s6 + $0xe0] ss:$16 sps:$4 sm:$0xff]   ;;  %759 = vmatpush1.bf16.msra.mxu1 %v984_v7  ;;  %v993_v13 = vld [vmem:[%s1301_s6 + $0xac] ss:$16 sps:$4 sm:$0xff]  }
  0x3c   : > { %749 = vmatprep.mubr.bf16.mxu0 %v885_v2  ;;  %790 = vmatprep.mubr.bf16.mxu1 %v885_v2  ;;  %v985_v8 = vld [vmem:[%s1301_s6 + $0xc4] ss:$16 sps:$4 sm:$0xff]   ;;  %v989_v10 = vld [vmem:[%s1301_s6 + $0xc0] ss:$16 sps:$4 sm:$0xff]   ;;  %v996_v15 = vld [vmem:[%s1301_s6 + $0xa8] ss:$16 sps:$4 sm:$0xff]  }
  0x3d   : > { %717 = vmatprep.subr.bf16.mxu0 %v979_v4  ;;  %760 = vmatprep.subr.bf16.mxu1 %v987_v9  ;;  %v991_v12 = vld [vmem:[%s1301_s6 + $0xa4] ss:$16 sps:$4 sm:$0xff]   ;;  %v995_v14 = vld [vmem:[%s1301_s6 + $0xa0] ss:$16 sps:$4 sm:$0xff]   ;;  %v999_v17 = vld [vmem:[%s1301_s6 + $0x8c] ss:$16 sps:$4 sm:$0xff]  }
  0x3e   : > { %718 = vmatpush1.bf16.msra.mxu0 %v983_v6  ;;  %v997_v16 = vld [vmem:[%s1301_s6 + $0x84] ss:$16 sps:$4 sm:$0xff]   ;;  %v1001_v18 = vld [vmem:[%s1301_s6 + $0x80] ss:$16 sps:$4 sm:$0xff]   ;;  %v1002_v19 = vld [vmem:[%s1301_s6 + $0x88] ss:$16 sps:$4 sm:$0xff]  }
  0x3f   : > { %719 = vmatprep.subr.bf16.mxu0 %v985_v8  ;;  %761 = vmatpush1.bf16.msra.mxu1 %v990_v11  ;;  %v1003_v20 = vld [vmem:[%s1301_s6 + $0x64] ss:$16 sps:$4 sm:$0xff]   ;;  %v1005_v21 = vld [vmem:[%s1301_s6 + $0x6c] ss:$16 sps:$4 sm:$0xff]   ;;  %v1007_v22 = vld [vmem:[%s1301_s6 + $0x60] ss:$16 sps:$4 sm:$0xff]  }
  0x40   : > { %762 = vmatprep.subr.bf16.mxu1 %v993_v13  ;;  %v1008_v23 = vld [vmem:[%s1301_s6 + $0x68] ss:$16 sps:$4 sm:$0xff]   ;;  %v1009_v24 = vld [vmem:[%s1301_s6 + $0x44] ss:$16 sps:$4 sm:$0xff]   ;;  %v1011_v25 = vld [vmem:[%s1301_s6 + $0x4c] ss:$16 sps:$4 sm:$0xff]  }
  0x41   : > { %v1013_v26 = vld [vmem:[%s1301_s6 + $0x40] ss:$16 sps:$4 sm:$0xff]   ;;  %v1014_v27 = vld [vmem:[%s1301_s6 + $0x48] ss:$16 sps:$4 sm:$0xff]   ;;  %v1015_v28 = vld [vmem:[%s1301_s6 + $0x24] ss:$16 sps:$4 sm:$0xff]  }
  0x42   : > { %720 = vmatpush1.bf16.msra.mxu0 %v989_v10  ;;  %v1017_v29 = vld [vmem:[%s1301_s6 + $0x2c] ss:$16 sps:$4 sm:$0xff]   ;;  %v1019_v30 = vld [vmem:[%s1301_s6 + $0x20] ss:$16 sps:$4 sm:$0xff]   ;;  %v1020_v31 = vld [vmem:[%s1301_s6 + $0x28] ss:$16 sps:$4 sm:$0xff]  }
  0x43   : > { %721 = vmatprep.subr.bf16.mxu0 %v991_v12  ;;  %763 = vmatpush1.bf16.msra.mxu1 %v996_v15  ;;  %v1021_v32 = vld [vmem:[%s1301_s6 + $0x4] ss:$16 sps:$4 sm:$0xff]   ;;  %v1023_v33 = vld [vmem:[%s1301_s6 + $0xc] ss:$16 sps:$4 sm:$0xff]   ;;  %v1025_v34 = vld [vmem:[%s1301_s6] ss:$16 sps:$4 sm:$0xff]  }
  0x44   : > { %764 = vmatprep.subr.bf16.mxu1 %v999_v17  ;;  %v1026_v35 = vld [vmem:[%s1301_s6 + $0x8] ss:$16 sps:$4 sm:$0xff]   ;;  %v1027_v36 = vld [vmem:[%s1301_s6 + $0x1e4] ss:$16 sps:$4 sm:$0xff]   ;;  %v1029_v37 = vld [vmem:[%s1301_s6 + $0x1ec] ss:$16 sps:$4 sm:$0xff]  }
  0x45   : > { %v1031_v38 = vld [vmem:[%s1301_s6 + $0x1e0] ss:$16 sps:$4 sm:$0xff]   ;;  %v1032_v39 = vld [vmem:[%s1301_s6 + $0x1e8] ss:$16 sps:$4 sm:$0xff]   ;;  %v1033_v40 = vld [vmem:[%s1301_s6 + $0x1c4] ss:$16 sps:$4 sm:$0xff]  }
  0x46   : > { %722 = vmatpush1.bf16.msra.mxu0 %v995_v14  ;;  %v1035_v41 = vld [vmem:[%s1301_s6 + $0x1cc] ss:$16 sps:$4 sm:$0xff]   ;;  %v1037_v42 = vld [vmem:[%s1301_s6 + $0x1c0] ss:$16 sps:$4 sm:$0xff]   ;;  %v1038_v43 = vld [vmem:[%s1301_s6 + $0x1c8] ss:$16 sps:$4 sm:$0xff]  }
  0x47   : > { %723 = vmatprep.subr.bf16.mxu0 %v997_v16  ;;  %765 = vmatpush1.bf16.msra.mxu1 %v1002_v19  ;;  %v1039_v44 = vld [vmem:[%s1301_s6 + $0x1a4] ss:$16 sps:$4 sm:$0xff]   ;;  %v1041_v45 = vld [vmem:[%s1301_s6 + $0x1ac] ss:$16 sps:$4 sm:$0xff]   ;;  %v1043_v46 = vld [vmem:[%s1301_s6 + $0x1a0] ss:$16 sps:$4 sm:$0xff]  }
  0x48   : > { %766 = vmatprep.subr.bf16.mxu1 %v1005_v21  ;;  %v1044_v47 = vld [vmem:[%s1301_s6 + $0x1a8] ss:$16 sps:$4 sm:$0xff]   ;;  %v1045_v48 = vld [vmem:[%s1301_s6 + $0x184] ss:$16 sps:$4 sm:$0xff]   ;;  %v1047_v49 = vld [vmem:[%s1301_s6 + $0x18c] ss:$16 sps:$4 sm:$0xff]  }
  0x49   : > { %v1049_v50 = vld [vmem:[%s1301_s6 + $0x180] ss:$16 sps:$4 sm:$0xff]   ;;  %v1050_v51 = vld [vmem:[%s1301_s6 + $0x188] ss:$16 sps:$4 sm:$0xff]   ;;  %v1051_v52 = vld [vmem:[%s1301_s6 + $0x164] ss:$16 sps:$4 sm:$0xff]  }
  0x4a   : > { %724 = vmatpush1.bf16.msra.mxu0 %v1001_v18  ;;  %v1053_v53 = vld [vmem:[%s1301_s6 + $0x16c] ss:$16 sps:$4 sm:$0xff]   ;;  %v1055_v54 = vld [vmem:[%s1301_s6 + $0x160] ss:$16 sps:$4 sm:$0xff]   ;;  %v1056_v55 = vld [vmem:[%s1301_s6 + $0x168] ss:$16 sps:$4 sm:$0xff]  }
  0x4b   : > { %725 = vmatprep.subr.bf16.mxu0 %v1003_v20  ;;  %767 = vmatpush1.bf16.msra.mxu1 %v1008_v23  ;;  %v1057_v56 = vld [vmem:[%s1301_s6 + $0x144] ss:$16 sps:$4 sm:$0xff]   ;;  %v1059_v57 = vld [vmem:[%s1301_s6 + $0x14c] ss:$16 sps:$4 sm:$0xff]   ;;  %v1061_v58 = vld [vmem:[%s1301_s6 + $0x140] ss:$16 sps:$4 sm:$0xff]  }
  0x4c   : > { %768 = vmatprep.subr.bf16.mxu1 %v1011_v25  ;;  %v1062_v59 = vld [vmem:[%s1301_s6 + $0x148] ss:$16 sps:$4 sm:$0xff]   ;;  %v1063_v60 = vld [vmem:[%s1301_s6 + $0x124] ss:$16 sps:$4 sm:$0xff]   ;;  %v1065_v61 = vld [vmem:[%s1301_s6 + $0x12c] ss:$16 sps:$4 sm:$0xff]  }
  0x4d   : > { %v1067_v62 = vld [vmem:[%s1301_s6 + $0x120] ss:$16 sps:$4 sm:$0xff]   ;;  %v1068_v63 = vld [vmem:[%s1301_s6 + $0x128] ss:$16 sps:$4 sm:$0xff]   ;;  %v1069_v1 = vld [vmem:[%s1301_s6 + $0x104] ss:$16 sps:$4 sm:$0xff]  }
  0x4e   : > { %726 = vmatpush1.bf16.msra.mxu0 %v1007_v22  ;;  %v1071_v2 = vld [vmem:[%s1301_s6 + $0x10c] ss:$16 sps:$4 sm:$0xff]   ;;  %v1073_v3 = vld [vmem:[%s1301_s6 + $0x100] ss:$16 sps:$4 sm:$0xff]   ;;  %v1074_v4 = vld [vmem:[%s1301_s6 + $0x108] ss:$16 sps:$4 sm:$0xff]  }
  0x4f   : > { %727 = vmatprep.subr.bf16.mxu0 %v1009_v24  ;;  %769 = vmatpush1.bf16.msra.mxu1 %v1014_v27  ;;  %s883_s8 = sshll.u32 %s1392_s7, 3 }
  0x50   : > { %770 = vmatprep.subr.bf16.mxu1 %v1017_v29  ;;  %s317_s11 = scalar_lea.vmem %s1387_s3, %s883_s8 }
  0x52   : > { %728 = vmatpush1.bf16.msra.mxu0 %v1013_v26 }
  0x53   : > { %729 = vmatprep.subr.bf16.mxu0 %v1015_v28  ;;  %771 = vmatpush1.bf16.msra.mxu1 %v1020_v31 }
  0x54   : > { %772 = vmatprep.subr.bf16.mxu1 %v1023_v33 }
  0x56   : > { %730 = vmatpush1.bf16.msra.mxu0 %v1019_v30 }
  0x57   : > { %731 = vmatprep.subr.bf16.mxu0 %v1021_v32  ;;  %773 = vmatpush1.bf16.msra.mxu1 %v1026_v35 }
  0x58   : > { %774 = vmatprep.subr.bf16.mxu1 %v1029_v37 }
  0x5a   : > { %732 = vmatpush1.bf16.msra.mxu0 %v1025_v34 }
  0x5b   : > { %733 = vmatprep.subr.bf16.mxu0 %v1027_v36  ;;  %775 = vmatpush2.bf16.msra.mxu1 %v1032_v39 }
  0x5c   : > { %776 = vmatprep.subr.bf16.mxu1 %v1035_v41 }
  0x5e   : > { %734 = vmatpush2.bf16.msra.mxu0 %v1031_v38 }
  0x5f   : > { %735 = vmatprep.subr.bf16.mxu0 %v1033_v40  ;;  %777 = vmatpush2.bf16.msra.mxu1 %v1038_v43 }
  0x60   : > { %778 = vmatprep.subr.bf16.mxu1 %v1041_v45 }
  0x62   : > { %736 = vmatpush2.bf16.msra.mxu0 %v1037_v42 }
  0x63   : > { %737 = vmatprep.subr.bf16.mxu0 %v1039_v44  ;;  %779 = vmatpush2.bf16.msra.mxu1 %v1044_v47 }
  0x64   : > { %780 = vmatprep.subr.bf16.mxu1 %v1047_v49 }
  0x66   : > { %738 = vmatpush2.bf16.msra.mxu0 %v1043_v46 }
  0x67   : > { %739 = vmatprep.subr.bf16.mxu0 %v1045_v48  ;;  %781 = vmatpush2.bf16.msra.mxu1 %v1050_v51 }
  0x68   : > { %782 = vmatprep.subr.bf16.mxu1 %v1053_v53 }
  0x6a   : > { %740 = vmatpush2.bf16.msra.mxu0 %v1049_v50 }
  0x6b   : > { %741 = vmatprep.subr.bf16.mxu0 %v1051_v52  ;;  %783 = vmatpush2.bf16.msra.mxu1 %v1056_v55 }
  0x6c   : > { %784 = vmatprep.subr.bf16.mxu1 %v1059_v57 }
  0x6e   : > { %742 = vmatpush2.bf16.msra.mxu0 %v1055_v54 }
  0x6f   : > { %743 = vmatprep.subr.bf16.mxu0 %v1057_v56  ;;  %785 = vmatpush2.bf16.msra.mxu1 %v1062_v59 }
  0x70   : > { %786 = vmatprep.subr.bf16.mxu1 %v1065_v61 }
  0x72   : > { %744 = vmatpush2.bf16.msra.mxu0 %v1061_v58 }
  0x73   : > { %745 = vmatprep.subr.bf16.mxu0 %v1063_v60  ;;  %787 = vmatpush2.bf16.msra.mxu1 %v1068_v63 }
  0x74   : > { %788 = vmatprep.subr.bf16.mxu1 %v1071_v2 }
  0x76   : > { %746 = vmatpush2.bf16.msra.mxu0 %v1067_v62 }
  0x77   : > { %747 = vmatprep.subr.bf16.mxu0 %v1069_v1  ;;  %789 = vmatpush2.bf16.msra.mxu1 %v1074_v4 }
  0x7a   : > { %748 = vmatpush2.bf16.msra.mxu0 %v1073_v3  ;;  %791 = vmatmul.mubr.bf16.vlgmr.msra.gmra.mxu1 %v884_v5 }
  0x7d   : > { %750 = vmatmul.mubr.bf16.vlgmr.msra.gmra.mxu0 %v884_v5 }
  0xb6   : > { %v388_v6 = vpop.permute.xlu0 %387 }
 0x13a   : > { %v792_v8 = vpop.f32.mrf.mxu1 }
 0x13b   : > { %v793_v10 = vadd.f32 %v792_v8, %v388_v6 }
 0x13c   : > { %v794_v12 = vpop.f32.mrf.mxu1 }
 0x13d   : > { %v751_v7 = vpop.f32.mrf.mxu0  ;;  %v795_v15 = vadd.f32 %v794_v12, %v388_v6  ;;  %v801_v0 = vmul.f32 0.1, %v793_v10 }
 0x13e   : > { %v752_v9 = vadd.f32 %v751_v7, %v388_v6  ;;  %v796_v17 = vpop.f32.mrf.mxu1 }
 0x13f   : > { %v753_v11 = vpop.f32.mrf.mxu0  ;;  %v802_v20 = vmul.f32 0.1, %v795_v15  ;;  %v805_v24 = vmax.f32 %v793_v10, %v801_v0 }
 0x140   : > { %v799_v13 = vmul.f32 0.1, %v752_v9  ;;  %v754_v14 = vadd.f32 %v753_v11, %v388_v6  ;;  %v797_v22 = vpop.f32.mrf.mxu1 }
 0x141   : > { %v755_v16 = vpop.f32.mrf.mxu0  ;;  %v806_v25 = vmax.f32 %v795_v15, %v802_v20  ;;  %809 = vst [vmem:[%s317_s11 + $0x10] sm:$0xff] %v805_v24 }
 0x142   : > { %v803_v18 = vmax.f32 %v752_v9, %v799_v13  ;;  %v800_v19 = vmul.f32 0.1, %v754_v14 }
 0x143   : > { %v756_v21 = vpop.f32.mrf.mxu0  ;;  %810 = vst [vmem:[%s317_s11 + $0x18] sm:$0xff] %v806_v25 }
 0x144   : > { %807 = vst [vmem:[%s317_s11] sm:$0xff] %v803_v18  ;;  %v804_v23 = vmax.f32 %v754_v14, %v800_v19 }
 0x146   : > { %808 = vst [vmem:[%s317_s11 + $0x8] sm:$0xff] %v804_v23 }
 0x147 PF: > { %p10_p9 = scmp.ge.s32.totalorder %s1139_s16, 4   ;;  %s1388_s12 = smov %s1095_s13 }
 0x148   : > { %s1389_s13 = smov %s1148_s19  ;;  %s1390_s14 = smov %s1139_s16 }
 0x149   :  { %12 = sbr.rel (!%p10_p9) target bundleno = 2 (0x2), region = 90 }

// kernel: encoder_forward.6
= control target key start
LH: loop header
LB: loop body
LE: loop exit
PB: predicated region body
PF: predicated region fallthrough
CT: control target
= control target key end

     0   :  { %v519_v1 = vmov 0   ;;  %s660_s1 = inlined_call_operand.vmem [shape: bf16[512,128], index: 1, kind: input, shape index: {}]   ;;  %s661_s0 = inlined_call_operand.vmem [shape: bf16[16,512], index: 0, kind: input, shape index: {}]   ;;  %s662_s2 = inlined_call_operand.vmem [shape: f32[16,1], index: 2, kind: input, shape index: {}]   ;;  %s663_s3 = inlined_call_operand.vmem [shape: f32[16,128], index: 3, kind: output, shape index: {}]  }
   0x1   :  { %v481_v0 = vld [vmem:[%s660_s1 + $0x78] sm:$0xff]   ;;  %480 = vset.pattern.permute.xlu0 %v519_v1  ;;  %v485_v5 = vld [vmem:[%s660_s1 + $0x70] sm:$0xff]   ;;  %v489_v9 = vld [vmem:[%s660_s1 + $0x68] sm:$0xff]  }
   0x2   :  { %v482_v2 = vld [vmem:[%s660_s1 + $0xf8] sm:$0xff]   ;;  %435 = vmatprep.subr.bf16.mxu0 %v481_v0  ;;  %v486_v6 = vld [vmem:[%s660_s1 + $0xf0] sm:$0xff]   ;;  %v490_v10 = vld [vmem:[%s660_s1 + $0xe8] sm:$0xff]  }
   0x3   :  { %v483_v3 = vld [vmem:[%s660_s1 + $0x38] sm:$0xff]   ;;  %457 = vmatprep.subr.bf16.mxu1 %v482_v2  ;;  %v487_v7 = vld [vmem:[%s660_s1 + $0x30] sm:$0xff]   ;;  %v491_v11 = vld [vmem:[%s660_s1 + $0x28] sm:$0xff]  }
   0x4   :  { %v484_v4 = vld [vmem:[%s660_s1 + $0xb8] sm:$0xff]   ;;  %436 = vmatpush3.bf16.msra.mxu0 %v483_v3  ;;  %v488_v8 = vld [vmem:[%s660_s1 + $0xb0] sm:$0xff]   ;;  %v492_v12 = vld [vmem:[%s660_s1 + $0xa8] sm:$0xff]  }
   0x5   :  { %458 = vmatpush3.bf16.msra.mxu1 %v484_v4  ;;  %437 = vmatprep.subr.bf16.mxu0 %v485_v5  ;;  %v493_v13 = vld [vmem:[%s660_s1 + $0x60] sm:$0xff]   ;;  %v497_v17 = vld [vmem:[%s660_s1 + $0x58] sm:$0xff]   ;;  %v501_v21 = vld [vmem:[%s660_s1 + $0x50] sm:$0xff]  }
   0x6   :  { %459 = vmatprep.subr.bf16.mxu1 %v486_v6  ;;  %v494_v14 = vld [vmem:[%s660_s1 + $0xe0] sm:$0xff]   ;;  %v498_v18 = vld [vmem:[%s660_s1 + $0xd8] sm:$0xff]   ;;  %v502_v22 = vld [vmem:[%s660_s1 + $0xd0] sm:$0xff]  }
   0x7   :  { %v495_v15 = vld [vmem:[%s660_s1 + $0x20] sm:$0xff]   ;;  %v499_v19 = vld [vmem:[%s660_s1 + $0x18] sm:$0xff]   ;;  %v503_v23 = vld [vmem:[%s660_s1 + $0x10] sm:$0xff]  }
   0x8   :  { %438 = vmatpush3.bf16.msra.mxu0 %v487_v7  ;;  %v496_v16 = vld [vmem:[%s660_s1 + $0xa0] sm:$0xff]   ;;  %v500_v20 = vld [vmem:[%s660_s1 + $0x98] sm:$0xff]   ;;  %v504_v24 = vld [vmem:[%s660_s1 + $0x90] sm:$0xff]  }
   0x9   :  { %460 = vmatpush3.bf16.msra.mxu1 %v488_v8  ;;  %439 = vmatprep.subr.bf16.mxu0 %v489_v9  ;;  %v505_v25 = vld [vmem:[%s660_s1 + $0x48] sm:$0xff]   ;;  %v509_v29 = vld [vmem:[%s660_s1 + $0x40] sm:$0xff]  }
   0xa   :  { %461 = vmatprep.subr.bf16.mxu1 %v490_v10  ;;  %v506_v26 = vld [vmem:[%s660_s1 + $0xc8] sm:$0xff]   ;;  %v510_v30 = vld [vmem:[%s660_s1 + $0xc0] sm:$0xff]  }
   0xb   :  { %v507_v27 = vld [vmem:[%s660_s1 + $0x8] sm:$0xff]   ;;  %v511_v31 = vld [vmem:[%s660_s1] sm:$0xff]  }
   0xc   :  { %440 = vmatpush3.bf16.msra.mxu0 %v491_v11  ;;  %v508_v28 = vld [vmem:[%s660_s1 + $0x88] sm:$0xff]   ;;  %v512_v32 = vld [vmem:[%s660_s1 + $0x80] sm:$0xff]  }
   0xd   :  { %462 = vmatpush3.bf16.msra.mxu1 %v492_v12  ;;  %441 = vmatprep.subr.bf16.mxu0 %v493_v13  ;;  %v513_v33 = vld [vmem:[%s661_s0] ss:$16 sps:$4 sm:$0xff]   ;;  %v515_v34 = vld [vmem:[%s661_s0 + $0x4] ss:$16 sps:$4 sm:$0xff]   ;;  %v516_v35 = vld [vmem:[%s661_s0 + $0x8] ss:$16 sps:$4 sm:$0xff]  }
   0xe   :  { %463 = vmatprep.subr.bf16.mxu1 %v494_v14  ;;  %v518_v36 = vld [vmem:[%s661_s0 + $0xc] ss:$16 sps:$4 sm:$0xff]   ;;  %v83_v37 = vld [vmem:[%s662_s2] sm:$0xff]  ;;  %339 = vmatprep.mubr.bf16.mxu0 %v515_v34 }
   0xf   :  { %87 = vperm.xlu0 %480, %v83_v37   ;;  %380 = vmatprep.mubr.bf16.mxu1 %v518_v36  ;;  %v84_v38 = vld [vmem:[%s662_s2 + $0x8] sm:$0xff] }
  0x10   :  { %442 = vmatpush3.bf16.msra.mxu0 %v495_v15 }
  0x11   :  { %464 = vmatpush3.bf16.msra.mxu1 %v496_v16  ;;  %443 = vmatprep.subr.bf16.mxu0 %v497_v17 }
  0x12   :  { %465 = vmatprep.subr.bf16.mxu1 %v498_v18 }
  0x13   :  { %92 = vperm.xlu0 %480, %v84_v38  }
  0x14   :  { %444 = vmatpush3.bf16.msra.mxu0 %v499_v19 }
  0x15   :  { %466 = vmatpush3.bf16.msra.mxu1 %v500_v20  ;;  %445 = vmatprep.subr.bf16.mxu0 %v501_v21 }
  0x16   :  { %467 = vmatprep.subr.bf16.mxu1 %v502_v22 }
  0x18   :  { %446 = vmatpush3.bf16.msra.mxu0 %v503_v23 }
  0x19   :  { %468 = vmatpush3.bf16.msra.mxu1 %v504_v24  ;;  %447 = vmatprep.subr.bf16.mxu0 %v505_v25 }
  0x1a   :  { %469 = vmatprep.subr.bf16.mxu1 %v506_v26 }
  0x1c   :  { %448 = vmatpush3.bf16.msra.mxu0 %v507_v27 }
  0x1d   :  { %470 = vmatpush3.bf16.msra.mxu1 %v508_v28  ;;  %449 = vmatprep.subr.bf16.mxu0 %v509_v29 }
  0x1e   :  { %471 = vmatprep.subr.bf16.mxu1 %v510_v30 }
  0x20   :  { %450 = vmatpush3.bf16.msra.mxu0 %v511_v31 }
  0x21   :  { %472 = vmatpush3.bf16.msra.mxu1 %v512_v32 }
  0x23   :  { %340 = vmatmul.mubr.bf16.vlgmr.msra.gmra.mxu0 %v513_v33 }
  0x24   :  { %381 = vmatmul.mubr.bf16.vlgmr.msra.gmra.mxu1 %v516_v35 }
  0x8a   :  { %v88_v41 = vpop.permute.xlu0 %87 }
  0x8e   :  { %v93_v53 = vpop.permute.xlu0 %92 }
  0xe3   :  { %v451_v39 = vpop.f32.mrf.mxu0 }
  0xe4   :  { %v473_v40 = vpop.f32.mrf.mxu1 }
  0xe5   :  { %v452_v42 = vpop.f32.mrf.mxu0 }
  0xe6   :  { %v453_v43 = vadd.f32 %v452_v42, %v451_v39  ;;  %v474_v44 = vpop.f32.mrf.mxu1 }
  0xe7   :  { %v454_v45 = vpop.f32.mrf.mxu0  ;;  %v475_v47 = vadd.f32 %v474_v44, %v473_v40 }
  0xe8   :  { %v342_v46 = vadd.f32 %v453_v43, %v88_v41  ;;  %v476_v48 = vpop.f32.mrf.mxu1 }
  0xe9   :  { %v455_v49 = vpop.f32.mrf.mxu0 }
  0xea   :  { %v383_v50 = vadd.f32 %v475_v47, %v342_v46  ;;  %v456_v51 = vadd.f32 %v455_v49, %v454_v45  ;;  %v477_v52 = vpop.f32.mrf.mxu1 }
  0xeb   :  { %v478_v56 = vadd.f32 %v477_v52, %v476_v48 }
  0xec   :  { %v389_v54 = vmul.f32 0.1, %v383_v50  ;;  %v345_v55 = vadd.f32 %v456_v51, %v93_v53 }
  0xee   :  { %v391_v57 = vmax.f32 %v383_v50, %v389_v54  ;;  %v386_v58 = vadd.f32 %v478_v56, %v345_v55 }
  0xf0   :  { %393 = vst [vmem:[%s663_s3] sm:$0xff] %v391_v57  ;;  %v390_v59 = vmul.f32 0.1, %v386_v58 }
  0xf2   :  { %v392_v60 = vmax.f32 %v386_v58, %v390_v59 }
  0xf4   :  { %394 = vst [vmem:[%s663_s3 + $0x8] sm:$0xff] %v392_v60 }

// kernel: encoder_forward.7
= control target key start
LH: loop header
LB: loop body
LE: loop exit
PB: predicated region body
PF: predicated region fallthrough
CT: control target
= control target key end

     0   :  { %s2963_s0 = inlined_call_operand.vmem [shape: f32[16,1024], index: 0, kind: input, shape index: {}]   ;;  %s2964_s1 = inlined_call_operand.vmem [shape: f32[1024,32], index: 1, kind: input, shape index: {}]   ;;  %s2965_s2 = inlined_call_operand.vmem [shape: f32[1,32], index: 2, kind: input, shape index: {}]   ;;  %s2966_s3 = inlined_call_operand.vmem [shape: f32[32,4], index: 3, kind: input, shape index: {}]   ;;  %s2967_s4 = inlined_call_operand.vmem [shape: f32[32,4], index: 4, kind: input, shape index: {}]   ;;  %s2968_s5 = inlined_call_operand.vmem [shape: f32[32,32], index: 5, kind: input, shape index: {}]   ;;  %s2969_s6 = inlined_call_operand.vmem [shape: f32[1,4], index: 6, kind: input, shape index: {}]   ;;  %s2970_s7 = inlined_call_operand.vmem [shape: f32[1,4], index: 7, kind: input, shape index: {}]   ;;  %s2971_s8 = inlined_call_operand.vmem [shape: f32[1,32], index: 8, kind: input, shape index: {}]   ;;  %s2972_s9 = inlined_call_operand.<no memory space> [shape: f32[1,1], index: 9, kind: input, shape index: {}]   ;;  %s2973_s10 = inlined_call_operand.vmem [shape: f32[16,16], index: 10, kind: input, shape index: {}]   ;;  %s2974_s11 = inlined_call_operand.vmem [shape: f32[32,512], index: 11, kind: input, shape index: {}]   ;;  %s2975_s12 = inlined_call_operand.vmem [shape: f32[1,64], index: 12, kind: input, shape index: {}]   ;;  %s2976_s13 = inlined_call_operand.vmem [shape: f32[16,512], index: 13, kind: input, shape index: {}]   ;;  %s2977_s14 = inlined_call_operand.vmem [shape: f32[2,16], index: 14, kind: input, shape index: {}]   ;;  %s2978_s15 = inlined_call_operand.vmem [shape: f32[512,64], index: 15, kind: input, shape index: {}]   ;;  %s2979_s16 = inlined_call_operand.vmem [shape: f32[64,8], index: 16, kind: input, shape index: {}]   ;;  %s2980_s17 = inlined_call_operand.vmem [shape: f32[1,8], index: 17, kind: input, shape index: {}]   ;;  %s2981_s18 = inlined_call_operand.hbm [shape: f32[2,8], index: 18, kind: output, shape index: {}]  }
   0x1   :  { %2984 = sst [smem:[#allocation6_spill]] %s2963_s0  ;;  %v23_v0 = vstv %s2972_s9 }
   0x2   :  { %2985 = sst [smem:[#allocation7_spill]] %s2964_s1  ;;  %24 = vst [vmem:[#allocation2] sm:$0x1] %v23_v0 }
   0x3   :  { %2986 = sst [smem:[#allocation8_spill]] %s2965_s2 }
   0x4   :  { %s2987_s0 = sld [smem:[#allocation7_spill]] }
   0x5   :  { %s2988_s9 = sld [smem:[#allocation6_spill]] }
   0xa   :  { %v109_v1 = vld [vmem:[%s2987_s0 + $0xf8] sm:$0xff]  ;;  %v108_v5 = vld [vmem:[%s2987_s0 + $0xf0] sm:$0xff]  ;;  %v107_v9 = vld [vmem:[%s2987_s0 + $0xe8] sm:$0xff] }
   0xb   :  { %v141_v2 = vld [vmem:[%s2987_s0 + $0x1f8] sm:$0xff]  ;;  %1665 = vmatprep.subr.mxu0 %v109_v1  ;;  %v140_v6 = vld [vmem:[%s2987_s0 + $0x1f0] sm:$0xff]  ;;  %v139_v10 = vld [vmem:[%s2987_s0 + $0x1e8] sm:$0xff] }
   0xc   :  { %v93_v3 = vld [vmem:[%s2987_s0 + $0x78] sm:$0xff]  ;;  %1703 = vmatprep.subr.mxu1 %v141_v2  ;;  %v92_v7 = vld [vmem:[%s2987_s0 + $0x70] sm:$0xff]  ;;  %v91_v11 = vld [vmem:[%s2987_s0 + $0x68] sm:$0xff] }
   0xd   :  { %v125_v4 = vld [vmem:[%s2987_s0 + $0x178] sm:$0xff]  ;;  %1666 = vmatpush3.msra.mxu0 %v93_v3  ;;  %v124_v8 = vld [vmem:[%s2987_s0 + $0x170] sm:$0xff]  ;;  %v123_v12 = vld [vmem:[%s2987_s0 + $0x168] sm:$0xff] }
   0xe   :  { %1704 = vmatpush3.msra.mxu1 %v125_v4  ;;  %1667 = vmatprep.subr.mxu0 %v108_v5  ;;  %v106_v13 = vld [vmem:[%s2987_s0 + $0xe0] sm:$0xff]  ;;  %v105_v17 = vld [vmem:[%s2987_s0 + $0xd8] sm:$0xff]  ;;  %v104_v21 = vld [vmem:[%s2987_s0 + $0xd0] sm:$0xff] }
   0xf   :  { %1705 = vmatprep.subr.mxu1 %v140_v6  ;;  %1668 = vmatpush3.msra.mxu0 %v92_v7  ;;  %v138_v14 = vld [vmem:[%s2987_s0 + $0x1e0] sm:$0xff]  ;;  %v137_v18 = vld [vmem:[%s2987_s0 + $0x1d8] sm:$0xff]  ;;  %v136_v22 = vld [vmem:[%s2987_s0 + $0x1d0] sm:$0xff] }
  0x10   :  { %1706 = vmatpush3.msra.mxu1 %v124_v8  ;;  %1669 = vmatprep.subr.mxu0 %v107_v9  ;;  %v90_v15 = vld [vmem:[%s2987_s0 + $0x60] sm:$0xff]  ;;  %v89_v19 = vld [vmem:[%s2987_s0 + $0x58] sm:$0xff]  ;;  %v88_v23 = vld [vmem:[%s2987_s0 + $0x50] sm:$0xff] }
  0x11   :  { %1707 = vmatprep.subr.mxu1 %v139_v10  ;;  %v122_v16 = vld [vmem:[%s2987_s0 + $0x160] sm:$0xff]  ;;  %1670 = vmatpush3.msra.mxu0 %v91_v11  ;;  %v121_v20 = vld [vmem:[%s2987_s0 + $0x158] sm:$0xff]  ;;  %v120_v24 = vld [vmem:[%s2987_s0 + $0x150] sm:$0xff] }
  0x12   :  { %1708 = vmatpush3.msra.mxu1 %v123_v12  ;;  %1671 = vmatprep.subr.mxu0 %v106_v13  ;;  %v103_v25 = vld [vmem:[%s2987_s0 + $0xc8] sm:$0xff]  ;;  %v102_v29 = vld [vmem:[%s2987_s0 + $0xc0] sm:$0xff]  ;;  %v101_v33 = vld [vmem:[%s2987_s0 + $0xb8] sm:$0xff] }
  0x13   :  { %1709 = vmatprep.subr.mxu1 %v138_v14  ;;  %1672 = vmatpush3.msra.mxu0 %v90_v15  ;;  %v135_v26 = vld [vmem:[%s2987_s0 + $0x1c8] sm:$0xff]  ;;  %v134_v30 = vld [vmem:[%s2987_s0 + $0x1c0] sm:$0xff]  ;;  %v133_v34 = vld [vmem:[%s2987_s0 + $0x1b8] sm:$0xff] }
  0x14   :  { %1710 = vmatpush3.msra.mxu1 %v122_v16  ;;  %1673 = vmatprep.subr.mxu0 %v105_v17  ;;  %v87_v27 = vld [vmem:[%s2987_s0 + $0x48] sm:$0xff]  ;;  %v86_v31 = vld [vmem:[%s2987_s0 + $0x40] sm:$0xff]  ;;  %v85_v35 = vld [vmem:[%s2987_s0 + $0x38] sm:$0xff] }
  0x15   :  { %1711 = vmatprep.subr.mxu1 %v137_v18  ;;  %1674 = vmatpush3.msra.mxu0 %v89_v19  ;;  %v119_v28 = vld [vmem:[%s2987_s0 + $0x148] sm:$0xff]  ;;  %v118_v32 = vld [vmem:[%s2987_s0 + $0x140] sm:$0xff]  ;;  %v117_v36 = vld [vmem:[%s2987_s0 + $0x138] sm:$0xff] }
  0x16   :  { %1712 = vmatpush3.msra.mxu1 %v121_v20  ;;  %1675 = vmatprep.subr.mxu0 %v104_v21  ;;  %v100_v37 = vld [vmem:[%s2987_s0 + $0xb0] sm:$0xff]  ;;  %v99_v41 = vld [vmem:[%s2987_s0 + $0xa8] sm:$0xff]  ;;  %v98_v45 = vld [vmem:[%s2987_s0 + $0xa0] sm:$0xff] }
  0x17   :  { %1713 = vmatprep.subr.mxu1 %v136_v22  ;;  %1676 = vmatpush3.msra.mxu0 %v88_v23  ;;  %v132_v38 = vld [vmem:[%s2987_s0 + $0x1b0] sm:$0xff]  ;;  %v131_v42 = vld [vmem:[%s2987_s0 + $0x1a8] sm:$0xff]  ;;  %v130_v46 = vld [vmem:[%s2987_s0 + $0x1a0] sm:$0xff] }
  0x18   :  { %1714 = vmatpush3.msra.mxu1 %v120_v24  ;;  %1677 = vmatprep.subr.mxu0 %v103_v25  ;;  %v84_v39 = vld [vmem:[%s2987_s0 + $0x30] sm:$0xff]  ;;  %v83_v43 = vld [vmem:[%s2987_s0 + $0x28] sm:$0xff]  ;;  %v82_v47 = vld [vmem:[%s2987_s0 + $0x20] sm:$0xff] }
  0x19   :  { %1715 = vmatprep.subr.mxu1 %v135_v26  ;;  %1678 = vmatpush3.msra.mxu0 %v87_v27  ;;  %v116_v40 = vld [vmem:[%s2987_s0 + $0x130] sm:$0xff]  ;;  %v115_v44 = vld [vmem:[%s2987_s0 + $0x128] sm:$0xff]  ;;  %v114_v48 = vld [vmem:[%s2987_s0 + $0x120] sm:$0xff] }
  0x1a   :  { %1716 = vmatpush3.msra.mxu1 %v119_v28  ;;  %1679 = vmatprep.subr.mxu0 %v102_v29  ;;  %v97_v49 = vld [vmem:[%s2987_s0 + $0x98] sm:$0xff]  ;;  %v96_v53 = vld [vmem:[%s2987_s0 + $0x90] sm:$0xff]  ;;  %v95_v57 = vld [vmem:[%s2987_s0 + $0x88] sm:$0xff] }
  0x1b   :  { %1717 = vmatprep.subr.mxu1 %v134_v30  ;;  %1680 = vmatpush3.msra.mxu0 %v86_v31  ;;  %v129_v50 = vld [vmem:[%s2987_s0 + $0x198] sm:$0xff]  ;;  %v128_v54 = vld [vmem:[%s2987_s0 + $0x190] sm:$0xff]  ;;  %v127_v58 = vld [vmem:[%s2987_s0 + $0x188] sm:$0xff] }
  0x1c   :  { %1718 = vmatpush3.msra.mxu1 %v118_v32  ;;  %1681 = vmatprep.subr.mxu0 %v101_v33  ;;  %v81_v51 = vld [vmem:[%s2987_s0 + $0x18] sm:$0xff]  ;;  %v80_v55 = vld [vmem:[%s2987_s0 + $0x10] sm:$0xff]  ;;  %v79_v59 = vld [vmem:[%s2987_s0 + $0x8] sm:$0xff] }
  0x1d   :  { %1719 = vmatprep.subr.mxu1 %v133_v34  ;;  %1682 = vmatpush3.msra.mxu0 %v85_v35  ;;  %v113_v52 = vld [vmem:[%s2987_s0 + $0x118] sm:$0xff]  ;;  %v112_v56 = vld [vmem:[%s2987_s0 + $0x110] sm:$0xff]  ;;  %v111_v60 = vld [vmem:[%s2987_s0 + $0x108] sm:$0xff] }
  0x1e   :  { %1720 = vmatpush3.msra.mxu1 %v117_v36  ;;  %1683 = vmatprep.subr.mxu0 %v100_v37  ;;  %v94_v61 = vld [vmem:[%s2987_s0 + $0x80] sm:$0xff]  ;;  %v63_v0 = vld [vmem:[%s2988_s9 + $0x8] sm:$0xff]  ;;  %v65_v3 = vld [vmem:[%s2988_s9 + $0x18] sm:$0xff] }
  0x1f   :  { %1721 = vmatprep.subr.mxu1 %v132_v38  ;;  %1684 = vmatpush3.msra.mxu0 %v84_v39  ;;  %v126_v62 = vld [vmem:[%s2987_s0 + $0x180] sm:$0xff]  ;;  %v173_v4 = vld [vmem:[%s2987_s0 + $0x2f8] sm:$0xff]  ;;  %v64_v6 = vld [vmem:[%s2988_s9 + $0x10] sm:$0xff] }
  0x20   :  { %1722 = vmatpush3.msra.mxu1 %v116_v40  ;;  %1685 = vmatprep.subr.mxu0 %v99_v41  ;;  %v78_v63 = vld [vmem:[%s2987_s0] sm:$0xff]  ;;  %v205_v5 = vld [vmem:[%s2987_s0 + $0x3f8] sm:$0xff]  ;;  %v172_v9 = vld [vmem:[%s2987_s0 + $0x2f0] sm:$0xff] }
  0x21   :  { %1723 = vmatprep.subr.mxu1 %v131_v42  ;;  %1686 = vmatpush3.msra.mxu0 %v83_v43  ;;  %v110_v1 = vld [vmem:[%s2987_s0 + $0x100] sm:$0xff]  ;;  %v157_v7 = vld [vmem:[%s2987_s0 + $0x278] sm:$0xff]  ;;  %v204_v10 = vld [vmem:[%s2987_s0 + $0x3f0] sm:$0xff] }
  0x22   :  { %1724 = vmatpush3.msra.mxu1 %v115_v44  ;;  %1687 = vmatprep.subr.mxu0 %v98_v45  ;;  %v62_v2 = vld [vmem:[%s2988_s9] sm:$0xff]  ;;  %v189_v8 = vld [vmem:[%s2987_s0 + $0x378] sm:$0xff]  ;;  %v156_v11 = vld [vmem:[%s2987_s0 + $0x270] sm:$0xff] }
  0x23   :  { %1725 = vmatprep.subr.mxu1 %v130_v46  ;;  %1688 = vmatpush3.msra.mxu0 %v82_v47  ;;  %v188_v12 = vld [vmem:[%s2987_s0 + $0x370] sm:$0xff]  ;;  %v171_v13 = vld [vmem:[%s2987_s0 + $0x2e8] sm:$0xff]  ;;  %v170_v17 = vld [vmem:[%s2987_s0 + $0x2e0] sm:$0xff] }
  0x24   :  { %1726 = vmatpush3.msra.mxu1 %v114_v48  ;;  %1689 = vmatprep.subr.mxu0 %v97_v49  ;;  %v203_v14 = vld [vmem:[%s2987_s0 + $0x3e8] sm:$0xff]  ;;  %v202_v18 = vld [vmem:[%s2987_s0 + $0x3e0] sm:$0xff]  ;;  %v169_v21 = vld [vmem:[%s2987_s0 + $0x2d8] sm:$0xff] }
  0x25   :  { %1727 = vmatprep.subr.mxu1 %v129_v50  ;;  %1690 = vmatpush3.msra.mxu0 %v81_v51  ;;  %v155_v15 = vld [vmem:[%s2987_s0 + $0x268] sm:$0xff]  ;;  %v154_v19 = vld [vmem:[%s2987_s0 + $0x260] sm:$0xff]  ;;  %v201_v22 = vld [vmem:[%s2987_s0 + $0x3d8] sm:$0xff] }
  0x26   :  { %1728 = vmatpush3.msra.mxu1 %v113_v52  ;;  %1691 = vmatprep.subr.mxu0 %v96_v53  ;;  %v187_v16 = vld [vmem:[%s2987_s0 + $0x368] sm:$0xff]  ;;  %v186_v20 = vld [vmem:[%s2987_s0 + $0x360] sm:$0xff]  ;;  %v153_v23 = vld [vmem:[%s2987_s0 + $0x258] sm:$0xff] }
  0x27   :  { %1729 = vmatprep.subr.mxu1 %v128_v54  ;;  %1692 = vmatpush3.msra.mxu0 %v80_v55  ;;  %v185_v24 = vld [vmem:[%s2987_s0 + $0x358] sm:$0xff]  ;;  %v168_v25 = vld [vmem:[%s2987_s0 + $0x2d0] sm:$0xff]  ;;  %v167_v29 = vld [vmem:[%s2987_s0 + $0x2c8] sm:$0xff] }
  0x28   :  { %1730 = vmatpush3.msra.mxu1 %v112_v56  ;;  %1693 = vmatprep.subr.mxu0 %v95_v57  ;;  %v200_v26 = vld [vmem:[%s2987_s0 + $0x3d0] sm:$0xff]  ;;  %v199_v30 = vld [vmem:[%s2987_s0 + $0x3c8] sm:$0xff]  ;;  %v166_v33 = vld [vmem:[%s2987_s0 + $0x2c0] sm:$0xff] }
  0x29   :  { %1731 = vmatprep.subr.mxu1 %v127_v58  ;;  %1694 = vmatpush3.msra.mxu0 %v79_v59  ;;  %v152_v27 = vld [vmem:[%s2987_s0 + $0x250] sm:$0xff]  ;;  %v151_v31 = vld [vmem:[%s2987_s0 + $0x248] sm:$0xff]  ;;  %v198_v34 = vld [vmem:[%s2987_s0 + $0x3c0] sm:$0xff] }
  0x2a   :  { %1732 = vmatpush3.msra.mxu1 %v111_v60  ;;  %1695 = vmatprep.subr.mxu0 %v94_v61  ;;  %v184_v28 = vld [vmem:[%s2987_s0 + $0x350] sm:$0xff]  ;;  %v183_v32 = vld [vmem:[%s2987_s0 + $0x348] sm:$0xff]  ;;  %v150_v35 = vld [vmem:[%s2987_s0 + $0x240] sm:$0xff] }
  0x2b   :  { %1733 = vmatprep.subr.mxu1 %v126_v62  ;;  %1696 = vmatpush3.msra.mxu0 %v78_v63  ;;  %v182_v36 = vld [vmem:[%s2987_s0 + $0x340] sm:$0xff]  ;;  %v165_v37 = vld [vmem:[%s2987_s0 + $0x2b8] sm:$0xff] }
  0x2c   :  { %277 = vmatprep.mubr.f32.mxu0 %v63_v0  ;;  %1734 = vmatpush3.msra.mxu1 %v110_v1  ;;  %v197_v38 = vld [vmem:[%s2987_s0 + $0x3b8] sm:$0xff] }
  0x2d   :  { %278 = vmatmul.mubr.f32.vlgmr.msra.gmra.mxu0 %v62_v2  ;;  %352 = vmatprep.mubr.f32.mxu1 %v65_v3 }
  0x2e   :  { %1741 = vmatprep.subr.mxu0 %v173_v4  ;;  %1779 = vmatprep.subr.mxu1 %v205_v5 }
  0x2f   :  { %353 = vmatmul.mubr.f32.vlgmr.msra.gmra.mxu1 %v64_v6  ;;  %1742 = vmatpush3.msra.mxu0 %v157_v7 }
  0x30   :  { %1780 = vmatpush3.msra.mxu1 %v189_v8  ;;  %1743 = vmatprep.subr.mxu0 %v172_v9 }
  0x31   :  { %1781 = vmatprep.subr.mxu1 %v204_v10  ;;  %1744 = vmatpush3.msra.mxu0 %v156_v11 }
  0x32   :  { %1782 = vmatpush3.msra.mxu1 %v188_v12  ;;  %1745 = vmatprep.subr.mxu0 %v171_v13 }
  0x33   :  { %1783 = vmatprep.subr.mxu1 %v203_v14  ;;  %1746 = vmatpush3.msra.mxu0 %v155_v15 }
  0x34   :  { %1784 = vmatpush3.msra.mxu1 %v187_v16  ;;  %1747 = vmatprep.subr.mxu0 %v170_v17 }
  0x35   :  { %1785 = vmatprep.subr.mxu1 %v202_v18  ;;  %1748 = vmatpush3.msra.mxu0 %v154_v19 }
  0x36   :  { %1786 = vmatpush3.msra.mxu1 %v186_v20  ;;  %1749 = vmatprep.subr.mxu0 %v169_v21 }
  0x37   :  { %1787 = vmatprep.subr.mxu1 %v201_v22  ;;  %1750 = vmatpush3.msra.mxu0 %v153_v23 }
  0x38   :  { %1788 = vmatpush3.msra.mxu1 %v185_v24  ;;  %1751 = vmatprep.subr.mxu0 %v168_v25 }
  0x39   :  { %1789 = vmatprep.subr.mxu1 %v200_v26  ;;  %1752 = vmatpush3.msra.mxu0 %v152_v27 }
  0x3a   :  { %1790 = vmatpush3.msra.mxu1 %v184_v28  ;;  %1753 = vmatprep.subr.mxu0 %v167_v29 }
  0x3b   :  { %1791 = vmatprep.subr.mxu1 %v199_v30  ;;  %1754 = vmatpush3.msra.mxu0 %v151_v31 }
  0x3c   :  { %1792 = vmatpush3.msra.mxu1 %v183_v32 }
  0x3d   :  { %25 = vsyncpa [#allocation4], 0  ;;  %1755 = vmatprep.subr.mxu0 %v166_v33  ;;  %1793 = vmatprep.subr.mxu1 %v198_v34  ;;  %v149_v39 = vld [vmem:[%s2987_s0 + $0x238] sm:$0xff]  ;;  %v164_v41 = vld [vmem:[%s2987_s0 + $0x2b0] sm:$0xff]  ;;  %s2989_s19 = sld [smem:[#allocation8_spill]]  ;;  %vm528_vm0 = vcmask 261120  }
  0x3e   :  { %v181_v40 = vld [vmem:[%s2987_s0 + $0x338] sm:$0xff]  ;;  %1756 = vmatpush3.msra.mxu0 %v150_v35  ;;  %1794 = vmatpush3.msra.mxu1 %v182_v36  ;;  %v196_v42 = vld [vmem:[%s2987_s0 + $0x3b0] sm:$0xff]  ;;  %v163_v45 = vld [vmem:[%s2987_s0 + $0x2a8] sm:$0xff]  ;;  %vm784_vm1 = vcmask 31744   ;;  %vm872_vm2 = vcmask 130048   ;;  %vm2026_vm3 = vmmov 0  }
  0x3f   :  { %1757 = vmatprep.subr.mxu0 %v165_v37  ;;  %1795 = vmatprep.subr.mxu1 %v197_v38  ;;  %v148_v43 = vld [vmem:[%s2987_s0 + $0x230] sm:$0xff]  ;;  %v195_v46 = vld [vmem:[%s2987_s0 + $0x3a8] sm:$0xff]  ;;  %v162_v49 = vld [vmem:[%s2987_s0 + $0x2a0] sm:$0xff]  ;;  %vm1549_vm4 = vcmask 523264   ;;  %s2027_s26 = smov [#allocation3]   ;;  %vm1624_vm5 = vcmask 58368  }
  0x40   :  { %v180_v44 = vld [vmem:[%s2987_s0 + $0x330] sm:$0xff]  ;;  %1758 = vmatpush3.msra.mxu0 %v149_v39  ;;  %1796 = vmatpush3.msra.mxu1 %v181_v40  ;;  %v147_v47 = vld [vmem:[%s2987_s0 + $0x228] sm:$0xff]  ;;  %v194_v50 = vld [vmem:[%s2987_s0 + $0x3a0] sm:$0xff] }
  0x41   :  { %1759 = vmatprep.subr.mxu0 %v164_v41  ;;  %1797 = vmatprep.subr.mxu1 %v196_v42  ;;  %v179_v48 = vld [vmem:[%s2987_s0 + $0x328] sm:$0xff]  ;;  %v146_v51 = vld [vmem:[%s2987_s0 + $0x220] sm:$0xff]  ;;  %v161_v53 = vld [vmem:[%s2987_s0 + $0x298] sm:$0xff] }
  0x42   :  { %1760 = vmatpush3.msra.mxu0 %v148_v43  ;;  %1798 = vmatpush3.msra.mxu1 %v180_v44  ;;  %v178_v52 = vld [vmem:[%s2987_s0 + $0x320] sm:$0xff]  ;;  %v193_v54 = vld [vmem:[%s2987_s0 + $0x398] sm:$0xff]  ;;  %v71_v55 = vld [vmem:[%s2988_s9 + $0x48] sm:$0xff] }
  0x43   :  { %1761 = vmatprep.subr.mxu0 %v163_v45  ;;  %1799 = vmatprep.subr.mxu1 %v195_v46  ;;  %v145_v56 = vld [vmem:[%s2987_s0 + $0x218] sm:$0xff]  ;;  %v70_v58 = vld [vmem:[%s2988_s9 + $0x40] sm:$0xff]  ;;  %v160_v59 = vld [vmem:[%s2987_s0 + $0x290] sm:$0xff] }
  0x44   :  { %1762 = vmatpush3.msra.mxu0 %v147_v47  ;;  %1800 = vmatpush3.msra.mxu1 %v179_v48  ;;  %v177_v57 = vld [vmem:[%s2987_s0 + $0x318] sm:$0xff]  ;;  %v192_v60 = vld [vmem:[%s2987_s0 + $0x390] sm:$0xff]  ;;  %v159_v0 = vld [vmem:[%s2987_s0 + $0x288] sm:$0xff] }
  0x45   :  { %1763 = vmatprep.subr.mxu0 %v162_v49  ;;  %1801 = vmatprep.subr.mxu1 %v194_v50  ;;  %v73_v61 = vld [vmem:[%s2988_s9 + $0x58] sm:$0xff]  ;;  %v144_v62 = vld [vmem:[%s2987_s0 + $0x210] sm:$0xff]  ;;  %v191_v2 = vld [vmem:[%s2987_s0 + $0x388] sm:$0xff] }
  0x46   :  { %1764 = vmatpush3.msra.mxu0 %v146_v51  ;;  %1802 = vmatpush3.msra.mxu1 %v178_v52  ;;  %v176_v63 = vld [vmem:[%s2987_s0 + $0x310] sm:$0xff]  ;;  %v143_v3 = vld [vmem:[%s2987_s0 + $0x208] sm:$0xff]  ;;  %v158_v5 = vld [vmem:[%s2987_s0 + $0x280] sm:$0xff] }
  0x47   :  { %1765 = vmatprep.subr.mxu0 %v161_v53  ;;  %1803 = vmatprep.subr.mxu1 %v193_v54  ;;  %v72_v1 = vld [vmem:[%s2988_s9 + $0x50] sm:$0xff]  ;;  %v175_v4 = vld [vmem:[%s2987_s0 + $0x308] sm:$0xff]  ;;  %v190_v6 = vld [vmem:[%s2987_s0 + $0x380] sm:$0xff] }
  0x48   :  { %282 = vmatprep.mubr.f32.mxu0 %v71_v55  ;;  %1766 = vmatpush3.msra.mxu0 %v145_v56  ;;  %v142_v7 = vld [vmem:[%s2987_s0 + $0x200] sm:$0xff]  ;;  %v67_v8 = vld [vmem:[%s2988_s9 + $0x28] sm:$0xff]  ;;  %v69_v10 = vld [vmem:[%s2988_s9 + $0x38] sm:$0xff] }
  0x49   :  { %1804 = vmatpush3.msra.mxu1 %v177_v57  ;;  %283 = vmatmul.mubr.f32.gmra.mxu0 %v70_v58  ;;  %v174_v9 = vld [vmem:[%s2987_s0 + $0x300] sm:$0xff]  ;;  %v68_v12 = vld [vmem:[%s2988_s9 + $0x30] sm:$0xff]  ;;  %v75_v13 = vld [vmem:[%s2988_s9 + $0x68] sm:$0xff] }
  0x4a   :  { %1767 = vmatprep.subr.mxu0 %v160_v59  ;;  %1805 = vmatprep.subr.mxu1 %v192_v60  ;;  %v66_v11 = vld [vmem:[%s2988_s9 + $0x20] sm:$0xff]  ;;  %v77_v14 = vld [vmem:[%s2988_s9 + $0x78] sm:$0xff]  ;;  %v76_v16 = vld [vmem:[%s2988_s9 + $0x70] sm:$0xff] }
  0x4b   :  { %357 = vmatprep.mubr.f32.mxu1 %v73_v61  ;;  %1768 = vmatpush3.msra.mxu0 %v144_v62  ;;  %v74_v15 = vld [vmem:[%s2988_s9 + $0x60] sm:$0xff]  ;;  %v520_v17 = vld [vmem:[%s2966_s3 + $0x18] sm:$0xff]  ;;  %v519_v19 = vld [vmem:[%s2966_s3 + $0x10] sm:$0xff] }
  0x4c   :  { %1806 = vmatpush3.msra.mxu1 %v176_v63  ;;  %1769 = vmatprep.subr.mxu0 %v159_v0  ;;  %v613_v18 = vld [vmem:[%s2967_s4 + $0x18] sm:$0xff]  ;;  %v612_v20 = vld [vmem:[%s2967_s4 + $0x10] sm:$0xff]  ;;  %v518_v21 = vld [vmem:[%s2966_s3 + $0x8] sm:$0xff] }
  0x4d   :  { %358 = vmatmul.mubr.f32.gmra.mxu1 %v72_v1  ;;  %1807 = vmatprep.subr.mxu1 %v191_v2  ;;  %v611_v22 = vld [vmem:[%s2967_s4 + $0x8] sm:$0xff]  ;;  %v517_v23 = vld [vmem:[%s2966_s3] sm:$0xff]  ;;  %v699_v25 = vld [vmem:[%s2968_s5 + $0x18] sm:$0xff] }
  0x4e   :  { %1770 = vmatpush3.msra.mxu0 %v143_v3  ;;  %1808 = vmatpush3.msra.mxu1 %v175_v4  ;;  %v610_v24 = vld [vmem:[%s2967_s4] sm:$0xff]  ;;  %v698_v63 = vld [vmem:[%s2968_s5 + $0x10] sm:$0xff]  ;;  %v697_v0 = vld [vmem:[%s2968_s5 + $0x8] sm:$0xff] }
  0x4f   :  { %1771 = vmatprep.subr.mxu0 %v158_v5  ;;  %1809 = vmatprep.subr.mxu1 %v190_v6  ;;  %v1640_v33 = vld [vmem:[%s2989_s19] ss:$0 sm:$0xff] }
  0x50   :  { %1772 = vmatpush3.msra.mxu0 %v142_v7  ;;  %427 = vmatprep.mubr.f32.mxu0 %v67_v8  ;;  %v696_v1 = vld [vmem:[%s2968_s5] sm:$0xff] }
  0x51   :  { %1810 = vmatpush3.msra.mxu1 %v174_v9  ;;  %502 = vmatprep.mubr.f32.mxu1 %v69_v10  ;;  %v1644_v2 = vld [vmem:[%s2970_s7] ss:$0 sm:$0xff] }
  0x52   :  { %428 = vmatmul.mubr.f32.vlgmr.msra.gmra.mxu0 %v66_v11  ;;  %503 = vmatmul.mubr.f32.vlgmr.msra.gmra.mxu1 %v68_v12  ;;  %v1641_v6 = vld [vmem:[%s2969_s6] ss:$0 sm:$0xff] }
  0x53   :  { %432 = vmatprep.mubr.f32.mxu0 %v75_v13  ;;  %507 = vmatprep.mubr.f32.mxu1 %v77_v14  ;;  %v1647_v11 = vld [vmem:[%s2971_s8] ss:$0 sm:$0xff]  ;;  %s1632_s8 = sshll.u32 %s2027_s26, 4  ;;  %s1633_s8 = int_to_ptr.vmem [resolvable:$true] %s1632_s8 }
  0x54   :  { %1922 = vmatprep.subr.mxu0 %v520_v17  ;;  %1933 = vmatprep.subr.mxu1 %v613_v18  ;;  %p2008_p1 = scmp.lt.s32.totalorder %s1633_s8, %s1633_s8 }
  0x55   :  { %1923 = vmatpush3.msra.mxu0 %v520_v17  ;;  %1934 = vmatpush3.msra.mxu1 %v613_v18  ;;  %v782_v18 = vld [vmem:[%s2973_s10] sm:$0xff] }
  0x56   :  { %433 = vmatmul.mubr.f32.gmra.mxu0 %v74_v15  ;;  %508 = vmatmul.mubr.f32.gmra.mxu1 %v76_v16 }
  0x57   :  { %1924 = vmatprep.subr.mxu0 %v519_v19  ;;  %1935 = vmatprep.subr.mxu1 %v612_v20 }
  0x58   :  { %1925 = vmatpush3.msra.mxu0 %v519_v19  ;;  %1936 = vmatpush3.msra.mxu1 %v612_v20  ;;  %v783_v19 = vld [vmem:[%s2973_s10 + $0x8] sm:$0xff] }
  0x59   :  { %1926 = vmatprep.subr.mxu0 %v518_v21  ;;  %1937 = vmatprep.subr.mxu1 %v611_v22 }
  0x5a   :  { %1927 = vmatpush3.msra.mxu0 %v518_v21  ;;  %1938 = vmatpush3.msra.mxu1 %v611_v22 }
  0x5b   :  { %1928 = vmatprep.subr.mxu0 %v517_v23  ;;  %1939 = vmatprep.subr.mxu1 %v610_v24 }
  0x5c   :  { %1929 = vmatpush3.msra.mxu0 %v517_v23  ;;  %1940 = vmatpush3.msra.mxu1 %v610_v24 }
  0x5d   :  { %1944 = vmatprep.subr.mxu0 %v699_v25 }
  0xed   :  { %v1697_v26 = vpop.f32.mrf.mxu0 }
  0xef   :  { %v1735_v27 = vpop.f32.mrf.mxu1  ;;  %v1698_v28 = vpop.f32.mrf.mxu0 }
  0xf0   :  { %v1699_v31 = vadd.f32 %v1698_v28, %v1697_v26 }
  0xf1   :  { %v1736_v30 = vpop.f32.mrf.mxu1 }
  0xf2   :  { %v280_v36 = vadd.f32 %v1699_v31, %v1640_v33  ;;  %v1737_v37 = vadd.f32 %v1736_v30, %v1735_v27 }
  0xf4   :  { %v355_v43 = vadd.f32 %v1737_v37, %v280_v36  ;;  %v996_v36 = vld [vmem:[%s2974_s11 + $0x68] sm:$0xff]  ;;  %v998_v37 = vld [vmem:[%s2974_s11 + $0x78] sm:$0xff] }
 0x109   :  { %v1700_v29 = vpop.f32.mrf.mxu0 }
 0x10b   :  { %v1701_v34 = vpop.f32.mrf.mxu0 }
 0x10c   :  { %v1702_v38 = vadd.f32 %v1701_v34, %v1700_v29 }
 0x10d   :  { %v1738_v32 = vpop.f32.mrf.mxu1 }
 0x10e   :  { %v285_v44 = vadd.f32 %v1702_v38, %v1640_v33 }
 0x10f   :  { %v1739_v35 = vpop.f32.mrf.mxu1 }
 0x110   :  { %v1740_v45 = vadd.f32 %v1739_v35, %v1738_v32  ;;  %v976_v35 = vld [vmem:[#allocation2] sm:$0x1] }
 0x111   :  { %1988 = vpush %v976_v35 }
 0x112   :  { %v1773_v39 = vpop.f32.mrf.mxu0  ;;  %v1811_v40 = vpop.f32.mrf.mxu1  ;;  %v360_v53 = vadd.f32 %v1740_v45, %v285_v44  ;;  %v995_v44 = vld [vmem:[%s2974_s11 + $0x60] sm:$0xff]  ;;  %v997_v45 = vld [vmem:[%s2974_s11 + $0x70] sm:$0xff] }
 0x114   :  { %v1774_v41 = vpop.f32.mrf.mxu0  ;;  %v1812_v42 = vpop.f32.mrf.mxu1 }
 0x115   :  { %v1775_v46 = vadd.f32 %v1774_v41, %v1773_v39  ;;  %v1813_v50 = vadd.f32 %v1812_v42, %v1811_v40 }
 0x116   :  { %v1776_v47 = vpop.f32.mrf.mxu0  ;;  %v1814_v48 = vpop.f32.mrf.mxu1 }
 0x117   :  { %v430_v49 = vadd.f32 %v1775_v46, %v355_v43  ;;  %v992_v46 = vld [vmem:[%s2974_s11 + $0x48] sm:$0xff] }
 0x118   :  { %v1777_v51 = vpop.f32.mrf.mxu0  ;;  %v1815_v52 = vpop.f32.mrf.mxu1 }
 0x119   :  { %v505_v54 = vadd.f32 %v1813_v50, %v430_v49  ;;  %v1778_v55 = vadd.f32 %v1777_v51, %v1776_v47  ;;  %v1816_v58 = vadd.f32 %v1815_v52, %v1814_v48  ;;  %v994_v47 = vld [vmem:[%s2974_s11 + $0x58] sm:$0xff]  ;;  %v991_v48 = vld [vmem:[%s2974_s11 + $0x40] sm:$0xff]  ;;  %v993_v49 = vld [vmem:[%s2974_s11 + $0x50] sm:$0xff] }
 0x11a   :  { %v988_v50 = vld [vmem:[%s2974_s11 + $0x28] sm:$0xff]  ;;  %v990_v51 = vld [vmem:[%s2974_s11 + $0x38] sm:$0xff]  ;;  %v987_v52 = vld [vmem:[%s2974_s11 + $0x20] sm:$0xff] }
 0x11b   :  { %v513_v56 = vmul.f32 0.1, %v505_v54  ;;  %v435_v57 = vadd.f32 %v1778_v55, %v360_v53  ;;  %v989_v53 = vld [vmem:[%s2974_s11 + $0x30] sm:$0xff]  ;;  %v986_v55 = vld [vmem:[%s2974_s11 + $0x18] sm:$0xff] }
 0x11d   :  { %v2588_v59 = vmax.f32 %v505_v54, %v513_v56  ;;  %v510_v60 = vadd.f32 %v1816_v58, %v435_v57  ;;  %v984_v54 = vld [vmem:[%s2974_s11 + $0x8] sm:$0xff]  ;;  %v983_v56 = vld [vmem:[%s2974_s11] sm:$0xff]  ;;  %v985_v57 = vld [vmem:[%s2974_s11 + $0x10] sm:$0xff]  ;;  %v2025_v58 = vmov 0.0  }
 0x11f   :  { %v514_v61 = vmul.f32 0.1, %v510_v60  ;;  %1930 = vmatprep.mubr.msk.f32.mxu0 %vm528_vm0, %v2588_v59  ;;  %1941 = vmatprep.mubr.msk.f32.mxu1 %vm528_vm0, %v2588_v59 }
 0x121   :  { %v2594_v62 = vmax.f32 %v510_v60, %v514_v61 }
 0x123   :  { %1931 = vmatmul.mubr.msk.f32.vlgmr.msra.gmra.mxu0 %vm528_vm0, %v2594_v62  ;;  %1942 = vmatmul.mubr.msk.f32.vlgmr.msra.gmra.mxu1 %vm528_vm0, %v2594_v62 }
 0x124   :  { %1945 = vmatpush3.msra.mxu0 %v699_v25  ;;  %1952 = vmatprep.mubr.msk.f32.mxu0 %vm528_vm0, %v2588_v59 }
 0x125   :  { %1946 = vmatprep.subr.mxu0 %v698_v63 }
 0x126   :  { %1947 = vmatpush3.msra.mxu0 %v698_v63 }
 0x127   :  { %1948 = vmatprep.subr.mxu0 %v697_v0 }
 0x128   :  { %1949 = vmatpush3.msra.mxu0 %v697_v0 }
 0x129   :  { %1950 = vmatprep.subr.mxu0 %v696_v1 }
 0x12a   :  { %1951 = vmatpush3.msra.mxu0 %v696_v1 }
 0x12b   :  { %1953 = vmatmul.mubr.msk.f32.vlgmr.msra.gmra.mxu0 %vm528_vm0, %v2594_v62 }
 0x142   :  { %s1989_s20 = spop %1988 }
 0x143   :  { %v978_v61 = vstv %s1989_s20 }
 0x1e3   :  { %v1932_v3 = vpop.f32.mrf.mxu0  ;;  %v1943_v4 = vpop.f32.mrf.mxu1 }
 0x1e4   :  { %v693_v5 = vadd.f32 %v1943_v4, %v1644_v2  ;;  %v607_v13 = vadd.f32 %v1932_v3, %v1641_v6  ;;  %v1336_v4 = vld [vmem:[%s2978_s15 + $0x78] sm:$0xff] }
 0x1e5   :  { %v601_v7 = vpop.f32.mrf.mxu0  ;;  %v687_v8 = vpop.f32.mrf.mxu1 }
 0x1e6   :  { %v602_v9 = vadd.f32 %v1641_v6, %v601_v7  ;;  %v688_v10 = vadd.f32 %v1644_v2, %v687_v8  ;;  %1955 = vmatprep.subr.msk.mxu1 %vm784_vm1, %v693_v5  ;;  %v1350_v6 = vld [vmem:[%s2978_s15 + $0xe8] sm:$0xff]  ;;  %v1349_v8 = vld [vmem:[%s2978_s15 + $0xe0] sm:$0xff] }
 0x1e7   :  { %1956 = vmatpush3.xpose.msk.msra.mxu1 %vm784_vm1, %v693_v5  ;;  %v1351_v5 = vld [vmem:[%s2978_s15 + $0xf0] sm:$0xff]  ;;  %v1334_v7 = vld [vmem:[%s2978_s15 + $0x68] sm:$0xff] }
 0x1e8   :  { %1957 = vmatprep.subr.msk.mxu1 %vm784_vm1, %v688_v10  ;;  %1959 = vmatprep.mubr.msk.f32.mxu1 %vm784_vm1, %v602_v9  ;;  %v1333_v9 = vld [vmem:[%s2978_s15 + $0x60] sm:$0xff] }
 0x1eb   :  { %v1954_v12 = vpop.f32.mrf.mxu0  ;;  %1958 = vmatpush3.xpose.msk.msra.mxu1 %vm784_vm1, %v688_v10  ;;  %v1348_v10 = vld [vmem:[%s2978_s15 + $0xd8] sm:$0xff] }
 0x1ec   :  { %v779_v14 = vadd.f32 %v1954_v12, %v1647_v11  ;;  %1029 = vmatprep.subr.mxu1 %v996_v36  ;;  %v1347_v12 = vld [vmem:[%s2978_s15 + $0xd0] sm:$0xff]  ;;  %v1164_v36 = vld [vmem:[%s2976_s13 + $0x28] sm:$0xff] }
 0x1ed   :  { %v773_v15 = vpop.f32.mrf.mxu0 }
 0x1ee   :  { %v774_v16 = vadd.f32 %v1647_v11, %v773_v15  ;;  %1962 = vmatprep.subr.mxu0 %v779_v14  ;;  %1960 = vmatmul.mubr.msk.f32.vlgmr.msra.gmra.mxu1 %vm784_vm1, %v607_v13  ;;  %v1332_v11 = vld [vmem:[%s2978_s15 + $0x58] sm:$0xff]  ;;  %v1331_v13 = vld [vmem:[%s2978_s15 + $0x50] sm:$0xff]  ;;  %v1330_v15 = vld [vmem:[%s2978_s15 + $0x48] sm:$0xff] }
 0x1ef   :  { %1963 = vmatpush3.msra.mxu0 %v779_v14  ;;  %1030 = vmatpush1.msra.mxu1 %v995_v44  ;;  %v1346_v14 = vld [vmem:[%s2978_s15 + $0xc8] sm:$0xff]  ;;  %v1166_v44 = vld [vmem:[%s2976_s13 + $0x38] sm:$0xff] }
 0x1f0   :  { %1964 = vmatprep.subr.mxu0 %v774_v16  ;;  %1031 = vmatprep.subr.mxu1 %v992_v46  ;;  %v1165_v46 = vld [vmem:[%s2976_s13 + $0x30] sm:$0xff] }
 0x1f1   :  { %1965 = vmatpush3.msra.mxu0 %v774_v16  ;;  %1032 = vmatpush1.msra.mxu1 %v991_v48  ;;  %v1345_v16 = vld [vmem:[%s2978_s15 + $0xc0] sm:$0xff]  ;;  %v1162_v48 = vld [vmem:[%s2976_s13 + $0x18] sm:$0xff] }
 0x1f2   :  { %1106 = vmatprep.subr.mxu0 %v998_v37  ;;  %1033 = vmatprep.subr.mxu1 %v988_v50  ;;  %v1163_v37 = vld [vmem:[%s2976_s13 + $0x20] sm:$0xff]  ;;  %v1161_v50 = vld [vmem:[%s2976_s13 + $0x10] sm:$0xff] }
 0x1f3   :  { %1034 = vmatpush1.msra.mxu1 %v987_v52  ;;  %1069 = vmatprep.mubr.f32.mxu1 %v2025_v58 }
 0x1f4   :  { %1035 = vmatprep.subr.mxu1 %v984_v54 }
 0x1f5   :  { %1036 = vmatpush1.msra.mxu1 %v983_v56  ;;  %v1368_v56 = vld [vmem:[%s2978_s15 + $0x178] sm:$0xff] }
 0x2ae   :  { %v1961_v17 = vpop.f32.mrf.mxu1 }
 0x2af   :  { %v869_v22 = vadd.f32 %v1961_v17, %v783_v19  ;;  %v1329_v17 = vld [vmem:[%s2978_s15 + $0x40] sm:$0xff]  ;;  %v1328_v19 = vld [vmem:[%s2978_s15 + $0x38] sm:$0xff] }
 0x2b0   :  { %v863_v20 = vpop.f32.mrf.mxu1 }
 0x2b1   :  { %v864_v21 = vadd.f32 %v863_v20, %v782_v18  ;;  %v876_v24 = vsel %vm872_vm2, %v869_v22, -inf  ;;  %v1344_v18 = vld [vmem:[%s2978_s15 + $0xb8] sm:$0xff]  ;;  %v1343_v20 = vld [vmem:[%s2978_s15 + $0xb0] sm:$0xff] }
 0x2b3   :  { %v873_v23 = vsel %vm872_vm2, %v864_v21, -inf }
 0x2b4   :  { %874 = vmax.xlane.f32.xlu0 %v873_v23  ;;  %v1326_v23 = vld [vmem:[%s2978_s15 + $0x28] sm:$0xff] }
 0x2b8   :  { %877 = vmax.xlane.f32.xlu0 %v876_v24  ;;  %v1341_v24 = vld [vmem:[%s2978_s15 + $0xa0] sm:$0xff] }
 0x33d   :  { %v875_v25 = vpop.xlane.xlu0 %874 }
 0x33e   :  { %v879_v26 = vsub.f32 %v864_v21, %v875_v25  ;;  %v1327_v21 = vld [vmem:[%s2978_s15 + $0x30] sm:$0xff]  ;;  %v1325_v25 = vld [vmem:[%s2978_s15 + $0x20] sm:$0xff] }
 0x340   :  { %v881_v27 = vmul.f32 1.442695, %v879_v26  ;;  %v1340_v26 = vld [vmem:[%s2978_s15 + $0x98] sm:$0xff] }
 0x341   :  { %v878_v28 = vpop.xlane.xlu0 %877 }
 0x342   :  { %1993 = vpow2.f32 %v881_v27  ;;  %v880_v29 = vsub.f32 %v869_v22, %v878_v28  ;;  %v1342_v22 = vld [vmem:[%s2978_s15 + $0xa8] sm:$0xff]  ;;  %v1324_v27 = vld [vmem:[%s2978_s15 + $0x18] sm:$0xff]  ;;  %v1339_v28 = vld [vmem:[%s2978_s15 + $0x90] sm:$0xff] }
 0x344   :  { %v883_v30 = vmul.f32 1.442695, %v880_v29  ;;  %v1323_v29 = vld [vmem:[%s2978_s15 + $0x10] sm:$0xff] }
 0x346   :  { %1995 = vpow2.f32 %v883_v30 }
 0x34f   :  { %v1994_v31 = vpop.eup %1993 }
 0x350   :  { %v885_v32 = vsel %vm872_vm2, %v1994_v31, 0.0 }
 0x351   :  { %886 = vadd.xlane.f32.xlu1 %v885_v32 }
 0x353   :  { %v1996_v33 = vpop.eup %1995 }
 0x354   :  { %v888_v34 = vsel %vm872_vm2, %v1996_v33, 0.0 }
 0x355   :  { %889 = vadd.xlane.f32.xlu1 %v888_v34 }
 0x3da   :  { %v887_v38 = vpop.xlane.xlu1 %886 }
 0x3db   :  { %1997 = vrcp.f32 %v887_v38  ;;  %v1160_v38 = vld [vmem:[%s2976_s13 + $0x8] sm:$0xff] }
 0x3de   :  { %v890_v39 = vpop.xlane.xlu1 %889 }
 0x3df   :  { %1999 = vrcp.f32 %v890_v39 }
 0x3e8   :  { %v1998_v40 = vpop.eup %1997 }
 0x3e9   :  { %v893_v41 = vmul.f32 %v1998_v40, %v1994_v31  ;;  %v1159_v40 = vld [vmem:[%s2976_s13] sm:$0xff] }
 0x3eb   :  { %1966 = vmatprep.mubr.msk.f32.mxu0 %vm872_vm2, %v893_v41 }
 0x3ec   :  { %v2000_v42 = vpop.eup %1999 }
 0x3ed   :  { %v894_v43 = vmul.f32 %v2000_v42, %v1996_v33 }
 0x3ef   :  { %1967 = vmatmul.mubr.msk.f32.vlgmr.msra.gmra.mxu0 %vm872_vm2, %v894_v43 }
 0x3f0   :  { %1107 = vmatpush1.msra.mxu0 %v997_v45  ;;  %1146 = vmatprep.mubr.f32.mxu0 %v2025_v58 }
 0x3f1   :  { %1108 = vmatprep.subr.mxu0 %v994_v47 }
 0x3f2   :  { %1109 = vmatpush1.msra.mxu0 %v993_v49  ;;  %v1175_v49 = vld [vmem:[%s2977_s14] sm:$0x3] }
 0x3f3   :  { %1110 = vmatprep.subr.mxu0 %v990_v51 }
 0x3f4   :  { %1111 = vmatpush1.msra.mxu0 %v989_v53 }
 0x3f5   :  { %1112 = vmatprep.subr.mxu0 %v986_v55  ;;  %v1384_v55 = vld [vmem:[%s2978_s15 + $0x1f8] sm:$0xff] }
 0x3f6   :  { %1113 = vmatpush1.msra.mxu0 %v985_v57  ;;  %v1383_v57 = vld [vmem:[%s2978_s15 + $0x1f0] sm:$0xff] }
 0x4af   :  { %v1968_v60 = vpop.f32.mrf.mxu0 }
 0x4b0   :  { %v980_v1 = vmul.f32 %v1968_v60, %v978_v61  ;;  %v1367_v60 = vld [vmem:[%s2978_s15 + $0x170] sm:$0xff] }
 0x4b1   :  { %v967_v63 = vpop.f32.mrf.mxu0 }
 0x4b2   :  { %v979_v0 = vmul.f32 %v978_v61, %v967_v63  ;;  %v982_v3 = vadd.f32 %v980_v1, %v2594_v62  ;;  %v1335_v62 = vld [vmem:[%s2978_s15 + $0x70] sm:$0xff]  ;;  %v1382_v61 = vld [vmem:[%s2978_s15 + $0x1e8] sm:$0xff]  ;;  %v1365_v1 = vld [vmem:[%s2978_s15 + $0x160] sm:$0xff] }
 0x4b3   :  { %v1366_v63 = vld [vmem:[%s2978_s15 + $0x168] sm:$0xff] }
 0x4b4   :  { %v981_v2 = vadd.f32 %v979_v0, %v2588_v59  ;;  %v1352_v59 = vld [vmem:[%s2978_s15 + $0xf8] sm:$0xff]  ;;  %v1381_v0 = vld [vmem:[%s2978_s15 + $0x1e0] sm:$0xff] }
 0x4b5   :  { %1843 = vmatprep.subr.mxu1 %v1352_v59  ;;  %v1379_v59 = vld [vmem:[%s2978_s15 + $0x1d0] sm:$0xff] }
 0x4b6   :  { %1656 = vmatmul.mubr.msk.f32.vlgmr.msra.gmra.mxu1 %vm528_vm0, %v981_v2  ;;  %1658 = vmatmul.mubr.msk.f32.vlgmr.msra.gmra.mxu0 %vm528_vm0, %v981_v2  ;;  %v1380_v2 = vld [vmem:[%s2978_s15 + $0x1d8] sm:$0xff] }
 0x4b7   :  { %1075 = vmatprep.mubr.f32.mxu1 %v2025_v58  ;;  %1152 = vmatprep.mubr.f32.mxu0 %v2025_v58 }
 0x4b8   :  { %1844 = vmatpush3.msra.mxu1 %v1336_v4  ;;  %v1363_v4 = vld [vmem:[%s2978_s15 + $0x150] sm:$0xff] }
 0x4b9   :  { %1845 = vmatprep.subr.mxu1 %v1351_v5  ;;  %v1378_v5 = vld [vmem:[%s2978_s15 + $0x1c8] sm:$0xff] }
 0x4ba   :  { %1657 = vmatmul.mubr.msk.f32.gmra.mxu1 %vm528_vm0, %v982_v3  ;;  %1659 = vmatmul.mubr.msk.f32.gmra.mxu0 %vm528_vm0, %v982_v3  ;;  %v1364_v3 = vld [vmem:[%s2978_s15 + $0x158] sm:$0xff] }
 0x4bb   :  { %1243 = vmatprep.mubr.f32.mxu0 %v2025_v58  ;;  %1846 = vmatpush3.msra.mxu1 %v1335_v62  ;;  %v1362_v62 = vld [vmem:[%s2978_s15 + $0x148] sm:$0xff] }
 0x4bc   :  { %1847 = vmatprep.subr.mxu1 %v1350_v6  ;;  %v1377_v6 = vld [vmem:[%s2978_s15 + $0x1c0] sm:$0xff] }
 0x4bd   :  { %1848 = vmatpush3.msra.mxu1 %v1334_v7  ;;  %v1361_v7 = vld [vmem:[%s2978_s15 + $0x140] sm:$0xff] }
 0x4be   :  { %1849 = vmatprep.subr.mxu1 %v1349_v8  ;;  %v1376_v8 = vld [vmem:[%s2978_s15 + $0x1b8] sm:$0xff] }
 0x4bf   :  { %1850 = vmatpush3.msra.mxu1 %v1333_v9  ;;  %v1360_v9 = vld [vmem:[%s2978_s15 + $0x138] sm:$0xff] }
 0x4c0   :  { %1851 = vmatprep.subr.mxu1 %v1348_v10  ;;  %v1375_v10 = vld [vmem:[%s2978_s15 + $0x1b0] sm:$0xff] }
 0x4c1   :  { %1852 = vmatpush3.msra.mxu1 %v1332_v11  ;;  %v1359_v11 = vld [vmem:[%s2978_s15 + $0x130] sm:$0xff] }
 0x4c2   :  { %1853 = vmatprep.subr.mxu1 %v1347_v12  ;;  %v1374_v12 = vld [vmem:[%s2978_s15 + $0x1a8] sm:$0xff] }
 0x4c3   :  { %1854 = vmatpush3.msra.mxu1 %v1331_v13  ;;  %v1358_v13 = vld [vmem:[%s2978_s15 + $0x128] sm:$0xff] }
 0x4c4   :  { %1855 = vmatprep.subr.mxu1 %v1346_v14  ;;  %v1373_v14 = vld [vmem:[%s2978_s15 + $0x1a0] sm:$0xff] }
 0x4c5   :  { %1856 = vmatpush3.msra.mxu1 %v1330_v15  ;;  %v1357_v15 = vld [vmem:[%s2978_s15 + $0x120] sm:$0xff] }
 0x4c6   :  { %1857 = vmatprep.subr.mxu1 %v1345_v16  ;;  %v1338_v16 = vld [vmem:[%s2978_s15 + $0x88] sm:$0xff] }
 0x4c7   :  { %1858 = vmatpush3.msra.mxu1 %v1329_v17  ;;  %v1372_v17 = vld [vmem:[%s2978_s15 + $0x198] sm:$0xff] }
 0x4c8   :  { %1859 = vmatprep.subr.mxu1 %v1344_v18  ;;  %v1322_v18 = vld [vmem:[%s2978_s15 + $0x8] sm:$0xff] }
 0x4c9   :  { %1860 = vmatpush3.msra.mxu1 %v1328_v19  ;;  %v1356_v19 = vld [vmem:[%s2978_s15 + $0x118] sm:$0xff] }
 0x4ca   :  { %1861 = vmatprep.subr.mxu1 %v1343_v20  ;;  %v1337_v20 = vld [vmem:[%s2978_s15 + $0x80] sm:$0xff] }
 0x4cb   :  { %1862 = vmatpush3.msra.mxu1 %v1327_v21  ;;  %v1371_v21 = vld [vmem:[%s2978_s15 + $0x190] sm:$0xff] }
 0x4cc   :  { %1863 = vmatprep.subr.mxu1 %v1342_v22  ;;  %v1321_v22 = vld [vmem:[%s2978_s15] sm:$0xff] }
 0x4cd   :  { %1864 = vmatpush3.msra.mxu1 %v1326_v23  ;;  %v1355_v23 = vld [vmem:[%s2978_s15 + $0x110] sm:$0xff] }
 0x4ce   :  { %1865 = vmatprep.subr.mxu1 %v1341_v24  ;;  %v1370_v24 = vld [vmem:[%s2978_s15 + $0x188] sm:$0xff] }
 0x4cf   :  { %1866 = vmatpush3.msra.mxu1 %v1325_v25  ;;  %v1354_v25 = vld [vmem:[%s2978_s15 + $0x108] sm:$0xff] }
 0x4d0   :  { %1867 = vmatprep.subr.mxu1 %v1340_v26  ;;  %v1369_v26 = vld [vmem:[%s2978_s15 + $0x180] sm:$0xff] }
 0x4d1   :  { %1868 = vmatpush3.msra.mxu1 %v1324_v27  ;;  %v1353_v27 = vld [vmem:[%s2978_s15 + $0x100] sm:$0xff] }
 0x4d2   :  { %1869 = vmatprep.subr.mxu1 %v1339_v28 }
 0x4d3   :  { %1870 = vmatpush3.msra.mxu1 %v1323_v29 }
 0x4d4   :  { %1871 = vmatprep.subr.mxu1 %v1338_v16 }
 0x4d5   :  { %1872 = vmatpush3.msra.mxu1 %v1322_v18 }
 0x4d6   :  { %1873 = vmatprep.subr.mxu1 %v1337_v20 }
 0x4d7   :  { %1874 = vmatpush3.msra.mxu1 %v1321_v22 }
 0x4d8   :  { %1969 = vmatprep.subr.mxu1 %v2025_v58 }
 0x576   :  { %v1071_v30 = vpop.f32.mrf.mxu1  ;;  %v1148_v31 = vpop.f32.mrf.mxu0 }
 0x577   :  { %v1167_v47 = vmul.f32 %v1159_v40, %v1071_v30  ;;  %v1169_v54 = vmul.f32 %v1161_v50, %v1148_v31 }
 0x578   :  { %v1073_v32 = vpop.f32.mrf.mxu1  ;;  %v1150_v33 = vpop.f32.mrf.mxu0 }
 0x579   :  { %v1168_v45 = vmul.f32 %v1160_v38, %v1073_v32  ;;  %v1170_v53 = vmul.f32 %v1162_v48, %v1150_v33  ;;  %v1541_v32 = vld [vmem:[%s2979_s16 + $0x38] sm:$0xff]  ;;  %v1540_v33 = vld [vmem:[%s2979_s16 + $0x30] sm:$0xff]  ;;  %v1535_v38 = vld [vmem:[%s2979_s16 + $0x8] sm:$0xff] }
 0x57a   :  { %v1077_v34 = vpop.f32.mrf.mxu1  ;;  %v1154_v35 = vpop.f32.mrf.mxu0 }
 0x57b   :  { %v1171_v42 = vmul.f32 %v1163_v37, %v1077_v34  ;;  %v1173_v52 = vmul.f32 %v1165_v46, %v1154_v35  ;;  %v1539_v34 = vld [vmem:[%s2979_s16 + $0x28] sm:$0xff]  ;;  %v1538_v35 = vld [vmem:[%s2979_s16 + $0x20] sm:$0xff]  ;;  %v1536_v37 = vld [vmem:[%s2979_s16 + $0x10] sm:$0xff] }
 0x57c   :  { %v1079_v39 = vpop.f32.mrf.mxu1  ;;  %v1156_v43 = vpop.f32.mrf.mxu0 }
 0x57d   :  { %v1172_v41 = vmul.f32 %v1164_v36, %v1079_v39  ;;  %v1174_v51 = vmul.f32 %v1166_v44, %v1156_v43  ;;  %v1537_v36 = vld [vmem:[%s2979_s16 + $0x18] sm:$0xff]  ;;  %v1534_v39 = vld [vmem:[%s2979_s16] sm:$0xff] }
 0x57e   :  { %v1662_v43 = vld [vmem:[%s2975_s12] ss:$0 sm:$0xff]  ;;  %s2003_s12 = scalar_lea.vmem %s1633_s8, 32 }
 0x57f   :  { %1207 = vmatprep.subr.mxu0 %v1172_v41  ;;  %p2004_p0 = scmp.ne.s32.totalorder %s1633_s8, %s2003_s12  ;;  %p2009_p2 = scmp.lt.s32.totalorder %s2003_s12, %s2003_s12 }
 0x580   :  { %1208 = vmatpush1.msra.mxu0 %v1171_v42 }
 0x581   :  { %1209 = vmatprep.subr.mxu0 %v1168_v45  ;;  %p2010_p3 = por %p2009_p2, %p2008_p1 }
 0x582   :  { %1210 = vmatpush1.msra.mxu0 %v1167_v47 }
 0x583   :  { %1660 = vmatmul.mubr.msk.f32.vlgmr.msra.gmra.mxu0 %vm872_vm2, %v1175_v49  ;;  %1278 = vmatprep.subr.mxu0 %v1174_v51  ;;  %p2011_p4 = pnand %p2010_p3, %p2004_p0 }
 0x584   :  { %1279 = vmatpush1.msra.mxu0 %v1173_v52  ;;  %1314 = vmatprep.mubr.f32.mxu0 %v2025_v58 }
 0x585   :  { %1280 = vmatprep.subr.mxu0 %v1170_v53 }
 0x586   :  { %1281 = vmatpush1.msra.mxu0 %v1169_v54 }
 0x587   :  { %1661 = vmatmul.mubr.msk.f32.vlgmr.msra.gmra.mxu0 %vm872_vm2, %v1175_v49  ;;  %1878 = vmatprep.subr.mxu0 %v1384_v55 }
 0x588   :  { %1879 = vmatpush3.msra.mxu0 %v1368_v56 }
 0x589   :  { %1880 = vmatprep.subr.mxu0 %v1383_v57 }
 0x58a   :  { %1881 = vmatpush3.msra.mxu0 %v1367_v60 }
 0x58b   :  { %1882 = vmatprep.subr.mxu0 %v1382_v61 }
 0x58c   :  { %1883 = vmatpush3.msra.mxu0 %v1366_v63 }
 0x58d   :  { %1884 = vmatprep.subr.mxu0 %v1381_v0 }
 0x58e   :  { %1885 = vmatpush3.msra.mxu0 %v1365_v1 }
 0x58f   :  { %1886 = vmatprep.subr.mxu0 %v1380_v2 }
 0x590   :  { %1887 = vmatpush3.msra.mxu0 %v1364_v3 }
 0x591   :  { %1888 = vmatprep.subr.mxu0 %v1379_v59 }
 0x592   :  { %1889 = vmatpush3.msra.mxu0 %v1363_v4 }
 0x593   :  { %1890 = vmatprep.subr.mxu0 %v1378_v5 }
 0x594   :  { %1891 = vmatpush3.msra.mxu0 %v1362_v62 }
 0x595   :  { %1892 = vmatprep.subr.mxu0 %v1377_v6 }
 0x596   :  { %1893 = vmatpush3.msra.mxu0 %v1361_v7 }
 0x597   :  { %1894 = vmatprep.subr.mxu0 %v1376_v8 }
 0x598   :  { %1895 = vmatpush3.msra.mxu0 %v1360_v9 }
 0x599   :  { %1896 = vmatprep.subr.mxu0 %v1375_v10 }
 0x59a   :  { %1897 = vmatpush3.msra.mxu0 %v1359_v11 }
 0x59b   :  { %1898 = vmatprep.subr.mxu0 %v1374_v12 }
 0x59c   :  { %1899 = vmatpush3.msra.mxu0 %v1358_v13 }
 0x59d   :  { %1900 = vmatprep.subr.mxu0 %v1373_v14 }
 0x59e   :  { %1901 = vmatpush3.msra.mxu0 %v1357_v15 }
 0x59f   :  { %1902 = vmatprep.subr.mxu0 %v1372_v17 }
 0x5a0   :  { %1903 = vmatpush3.msra.mxu0 %v1356_v19 }
 0x5a1   :  { %1904 = vmatprep.subr.mxu0 %v1371_v21 }
 0x5a2   :  { %1905 = vmatpush3.msra.mxu0 %v1355_v23 }
 0x5a3   :  { %1906 = vmatprep.subr.mxu0 %v1370_v24 }
 0x5a4   :  { %1907 = vmatpush3.msra.mxu0 %v1354_v25 }
 0x5a5   :  { %1908 = vmatprep.subr.mxu0 %v1369_v26 }
 0x5a6   :  { %1909 = vmatpush3.msra.mxu0 %v1353_v27 }
 0x643   :  { %v1245_v28 = vpop.f32.mrf.mxu0 }
 0x645   :  { %v1247_v29 = vpop.f32.mrf.mxu0 }
 0x646   :  { %1456 = vmatprep.mubr.f32.mxu1 %v1247_v29 }
 0x647   :  { %v1316_v30 = vpop.f32.mrf.mxu0  ;;  %1457 = vmatmul.mubr.f32.vlgmr.msra.gmra.mxu1 %v1245_v28 }
 0x648   :  { %1970 = vmatpush3.msra.mxu1 %v1541_v32  ;;  %1985 = vmatprep.mubr.msk.f32.mxu1 %vm2026_vm3, %v2025_v58 }
 0x649   :  { %v1318_v31 = vpop.f32.mrf.mxu0  ;;  %1971 = vmatprep.subr.mxu1 %v2025_v58 }
 0x64a   :  { %1526 = vmatprep.mubr.f32.mxu0 %v1318_v31  ;;  %1972 = vmatpush3.msra.mxu1 %v1540_v33 }
 0x64b   :  { %1527 = vmatmul.mubr.f32.vlgmr.msra.gmra.mxu0 %v1316_v30  ;;  %1973 = vmatprep.subr.mxu1 %v2025_v58 }
 0x64c   :  { %1974 = vmatpush3.msra.mxu1 %v1539_v34 }
 0x64d   :  { %1975 = vmatprep.subr.mxu1 %v2025_v58 }
 0x64e   :  { %1976 = vmatpush3.msra.mxu1 %v1538_v35 }
 0x64f   :  { %1977 = vmatprep.subr.mxu1 %v2025_v58 }
 0x650   :  { %1978 = vmatpush3.msra.mxu1 %v1537_v36 }
 0x651   :  { %1979 = vmatprep.subr.mxu1 %v2025_v58 }
 0x652   :  { %1980 = vmatpush3.msra.mxu1 %v1536_v37 }
 0x653   :  { %1981 = vmatprep.subr.mxu1 %v2025_v58 }
 0x654   :  { %1982 = vmatpush3.msra.mxu1 %v1535_v38 }
 0x655   :  { %1983 = vmatprep.subr.mxu1 %v2025_v58  ;;  %v1663_v58 = vld [vmem:[%s2980_s17] ss:$0 sm:$0xff] }
 0x656   :  { %1984 = vmatpush3.msra.mxu1 %v1534_v39 }
 0x707   :  { %v1875_v40 = vpop.f32.mrf.mxu1 }
 0x709   :  { %v1876_v41 = vpop.f32.mrf.mxu1 }
 0x70a   :  { %v1877_v42 = vadd.f32 %v1876_v41, %v1875_v40 }
 0x70b   :  { %v1910_v44 = vpop.f32.mrf.mxu0 }
 0x70c   :  { %v1459_v46 = vadd.f32 %v1877_v42, %v1662_v43 }
 0x70d   :  { %v1911_v45 = vpop.f32.mrf.mxu0 }
 0x70e   :  { %v1912_v47 = vadd.f32 %v1911_v45, %v1910_v44 }
 0x710   :  { %v1529_v48 = vadd.f32 %v1912_v47, %v1459_v46 }
 0x712   :  { %v1532_v49 = vmul.f32 0.1, %v1529_v48 }
 0x714   :  { %v1533_v50 = vmax.f32 %v1529_v48, %v1532_v49 }
 0x716   :  { %1986 = vmatmul.mubr.msk.f32.vlgmr.msra.gmra.mxu1 %vm1549_vm4, %v1533_v50 }
 0x7d6   :  { %v1619_v51 = vpop.f32.mrf.mxu1 }
 0x7d7   :  { %v1620_v52 = vadd.f32 %v1663_v58, %v1619_v51 }
 0x7d8   :  { %v1987_v53 = vpop.f32.mrf.mxu1 }
 0x7d9   :  { %2001 = vtanh.f32 %v1620_v52 }
 0x7e6   :  { %v2002_v54 = vpop.eup %2001 }
 0x7e7   :  { %1625 = vst.msk [vmem:[#allocation3] sm:$0x3] %vm1624_vm5, %v2002_v54 }
 0x7e8   :  { %2014 = shalt.err (!%p2011_p4)
}
 0x7e9   :  { %1635 = dma.vmem_to_hbm [thread:$0]  %s1633_s8, 32, %s2981_s18, [#allocation4]  }
 0x7ea   :  { %2023 = dma.done.wait [#allocation4], 32  }
 0x7eb   :  { %2024 = vsyncadd [#allocation4], 4294967264 }
 0x7ec   :  { %1639 = vsyncpa [#allocation4], 1 }

</bundles_post_ra>
